<compile_context>
chip_gen: v7x
topology: tpu7x:2x2x1
jax: 0.10.0
libtpu: 0.0.40
codegen_flags: <defaults>
</compile_context>

<pallas_src>
import jax
import jax.numpy as jnp
from jax.experimental import pallas as pl
from jax.experimental.pallas import tpu as pltpu

# ---- model dims (small, consistent with a decoder layer stack) ----
B, S, H = 2, 8, 32
NUM_HEADS = 4
HEAD_DIM = H // NUM_HEADS
INTER = 64
NUM_LAYERS = 2
EPS = 1e-6
ROPE_THETA = 10000.0
NEG_BIAS = -1e30  # large-but-safe additive mask value (no -inf / NaN risk)


# --------------------------------------------------------------------------
# Single fused kernel: the whole (batch, layer-stack) forward in one call.
# --------------------------------------------------------------------------
def fused_decoder_stack_kernel(x_ref, amask_ref, cos_ref, sin_ref,
                               wqkv_ref, wo_ref, wgu_ref, wd_ref,
                               ln1_ref, ln2_ref, out_ref):
    num_layers = wqkv_ref.shape[0]

    x = x_ref[...]                                   # (B*S, H) f32 residual (VMEM-resident)

    # ---- layer-invariant values, hoisted out of the layer loop --------------
    row = jax.lax.broadcasted_iota(jnp.int32, (S, S), 0)
    col = jax.lax.broadcasted_iota(jnp.int32, (S, S), 1)
    causal = col <= row                              # (S, S)
    pad = amask_ref[...] > 0.5                       # (B, 1, S) key-padding row
    bias = jnp.where(causal[None] & pad, 0.0, NEG_BIAS)   # (B, S, S) additive mask

    cos = cos_ref[...]                               # (B, S, HEAD_DIM)
    sin = sin_ref[...]
    # rotate_half(t) == roll(t, HD//2 lanes) * ([-1]*HD/2 + [+1]*HD/2)
    sign = jnp.where(
        jax.lax.broadcasted_iota(jnp.int32, (1, 1, HEAD_DIM), 2) < HEAD_DIM // 2,
        -1.0, 1.0)
    scale = 1.0 / (HEAD_DIM ** 0.5)

    def rope(t):                                     # t: (B, S, HEAD_DIM)
        return t * cos + pltpu.roll(t, HEAD_DIM // 2, axis=2) * sign * sin

    # Fully unrolled static layer loop (equivalent to fori_loop(unroll=True));
    # all weights are already resident in VMEM, so there is no per-layer DMA.
    for l in range(num_layers):
        # ---- self-attention block ----
        var = jnp.mean(x * x, axis=-1, keepdims=True)
        xn = x * jax.lax.rsqrt(var + EPS) * ln1_ref[l]                 # (BS, H)
        qkv = jnp.dot(xn, wqkv_ref[l],
                      preferred_element_type=jnp.float32)              # (BS, 3H) fused QKV

        ctx_heads = []
        for n in range(NUM_HEADS):
            q_n = qkv[:, n * HEAD_DIM:(n + 1) * HEAD_DIM].reshape(B, S, HEAD_DIM)
            k_n = qkv[:, H + n * HEAD_DIM:H + (n + 1) * HEAD_DIM].reshape(B, S, HEAD_DIM)
            v_n = qkv[:, 2 * H + n * HEAD_DIM:2 * H + (n + 1) * HEAD_DIM].reshape(B, S, HEAD_DIM)
            q_n = rope(q_n)
            k_n = rope(k_n)
            s_n = jnp.einsum('bsd,btd->bst', q_n, k_n,
                             preferred_element_type=jnp.float32) * scale + bias
            m_n = jnp.max(s_n, axis=-1, keepdims=True)
            p_n = jnp.exp(s_n - m_n)
            p_n = p_n / jnp.sum(p_n, axis=-1, keepdims=True)           # exact softmax
            ctx_n = jnp.einsum('bst,btd->bsd', p_n, v_n,
                               preferred_element_type=jnp.float32)     # (B, S, HD)
            ctx_heads.append(ctx_n.reshape(B * S, HEAD_DIM))

        ctx_cat = jnp.concatenate(ctx_heads, axis=-1)                  # (BS, H) head-major
        # Output projection fused with the head reduction: one contraction over H=NH*HD.
        x = x + jnp.dot(ctx_cat, wo_ref[l], preferred_element_type=jnp.float32)

        # ---- MLP block (SwiGLU) ----
        var2 = jnp.mean(x * x, axis=-1, keepdims=True)
        xn2 = x * jax.lax.rsqrt(var2 + EPS) * ln2_ref[l]
        gu = jnp.dot(xn2, wgu_ref[l],
                     preferred_element_type=jnp.float32)               # (BS, 2*INTER) lane-dense
        g = gu[:, :INTER]
        u = gu[:, INTER:]
        x = x + jnp.dot(g * jax.nn.sigmoid(g) * u, wd_ref[l],
                        preferred_element_type=jnp.float32)

    out_ref[...] = x                                                   # single store at the end


def fused_decoder_stack(h2d, amask, cos, sin, w):
    vmem = pl.BlockSpec(memory_space=pltpu.MemorySpace.VMEM)
    return pl.pallas_call(
        fused_decoder_stack_kernel,
        out_shape=jax.ShapeDtypeStruct(h2d.shape, jnp.float32),
        in_specs=[vmem] * 10,
        out_specs=vmem,
    )(h2d, amask, cos, sin,
      w["wqkv"], w["wo"], w["wgu"], w["wd"], w["ln1"], w["ln2"])


# ---- plain-JAX glue ------------------------------------------------------

def rope_cos_sin(position_ids, head_dim, theta=ROPE_THETA):
    inv_freq = 1.0 / (theta ** (jnp.arange(0, head_dim, 2, dtype=jnp.float32) / head_dim))
    freqs = position_ids.astype(jnp.float32)[..., None] * inv_freq[None, None, :]
    emb = jnp.concatenate([freqs, freqs], axis=-1)          # (B, S, head_dim)
    return jnp.cos(emb), jnp.sin(emb)


def init_layer_params(key):
    ks = jax.random.split(key, 7)
    scale = 0.02
    return {
        "wq": scale * jax.random.normal(ks[0], (H, H), jnp.float32),
        "wk": scale * jax.random.normal(ks[1], (H, H), jnp.float32),
        "wv": scale * jax.random.normal(ks[2], (H, H), jnp.float32),
        "wo": scale * jax.random.normal(ks[3], (H, H), jnp.float32),
        "wg": scale * jax.random.normal(ks[4], (H, INTER), jnp.float32),
        "wu": scale * jax.random.normal(ks[5], (H, INTER), jnp.float32),
        "wd": scale * jax.random.normal(ks[6], (INTER, H), jnp.float32),
        "ln1": jnp.ones((H,), jnp.float32),
        "ln2": jnp.ones((H,), jnp.float32),
    }


def stack_layer_params(layer_params):
    """Stack per-layer weights along a leading layer axis; fuse QKV and gate+up.

    NOTE: weights here are (in_features, out_features) and used as y = x @ W.
    Real PyTorch nn.Linear weights ((out, in)) must be transposed first.
    Everything stays f32 (no bf16 casts, per v5e feedback / tolerance concerns).
    """
    def stack(name):
        return jnp.stack([p[name] for p in layer_params])
    wq, wk, wv = stack("wq"), stack("wk"), stack("wv")
    num_layers = wq.shape[0]
    return {
        "wqkv": jnp.concatenate([wq, wk, wv], axis=-1),              # (L, H, 3H)
        "wo": stack("wo"),                                           # (L, H, H)
        "wgu": jnp.concatenate([stack("wg"), stack("wu")], axis=-1), # (L, H, 2*INTER)
        "wd": stack("wd"),                                           # (L, INTER, H)
        "ln1": stack("ln1").reshape(num_layers, 1, H),
        "ln2": stack("ln2").reshape(num_layers, 1, H),
    }


def language_model_layer_wrapper(layer_params, inputs):
    hidden_states, attention_mask, position_ids, labels = inputs
    batch_size, seq_length, hidden = hidden_states.shape
    # The 4D causal-SDPA mask (0 where attended, large-negative where masked)
    # is built inside the kernel from this per-key row + broadcasted_iota.
    amask = attention_mask.astype(jnp.float32).reshape(batch_size, 1, seq_length)
    cos, sin = rope_cos_sin(position_ids, HEAD_DIM)
    stacked = stack_layer_params(layer_params)
    h2d = hidden_states.reshape(batch_size * seq_length, hidden)     # fold batch into rows
    out2d = fused_decoder_stack(h2d, amask, cos, sin, stacked)
    hidden_states = out2d.reshape(batch_size, seq_length, hidden)
    return (hidden_states, attention_mask, position_ids, labels)


if __name__ == "__main__":
    root = jax.random.PRNGKey(0)
    k_h, k_lbl, *layer_keys = jax.random.split(root, 2 + NUM_LAYERS)

    hidden_states = jax.random.normal(k_h, (B, S, H), jnp.float32)
    attention_mask = jnp.ones((B, S), jnp.int32).at[1, -2:].set(0)  # pad tail of seq 1
    position_ids = jnp.broadcast_to(jnp.arange(S, dtype=jnp.int32), (B, S))
    labels = jax.random.randint(k_lbl, (B, S), 0, 100, jnp.int32)

    layer_params = [init_layer_params(k) for k in layer_keys]

    outputs = language_model_layer_wrapper(
        layer_params, (hidden_states, attention_mask, position_ids, labels))
    out_hidden = jax.block_until_ready(outputs[0])

    assert out_hidden.shape == (B, S, H)
    assert bool(jnp.all(jnp.isfinite(out_hidden)))
    print("KERNEL_OK")
</pallas_src>

<mosaic_0001>
module attributes {stable_mosaic.version = 11 : i64} {
  func.func @fused_decoder_stack_kernel(%arg0: memref<16x32xf32, #tpu.memory_space<vmem>>, %arg1: memref<2x1x8xf32, #tpu.memory_space<vmem>>, %arg2: memref<2x8x8xf32, #tpu.memory_space<vmem>>, %arg3: memref<2x8x8xf32, #tpu.memory_space<vmem>>, %arg4: memref<2x32x96xf32, #tpu.memory_space<vmem>>, %arg5: memref<2x32x32xf32, #tpu.memory_space<vmem>>, %arg6: memref<2x32x128xf32, #tpu.memory_space<vmem>>, %arg7: memref<2x64x32xf32, #tpu.memory_space<vmem>>, %arg8: memref<2x1x32xf32, #tpu.memory_space<vmem>>, %arg9: memref<2x1x32xf32, #tpu.memory_space<vmem>>, %arg10: memref<16x32xf32, #tpu.memory_space<vmem>>) attributes {dimension_semantics = [], scalar_prefetch = 0 : i64, scratch_operands = 0 : i64, tpu.core_type = #tpu.core_type<tc>} {
    %c0 = arith.constant 0 : index
    %c0_0 = arith.constant 0 : index
    %0 = vector.load %arg0[%c0, %c0_0] : memref<16x32xf32, #tpu.memory_space<vmem>>, vector<16x32xf32>
    %1 = tpu.iota {dimensions = array<i32: 0>} : vector<8x8xi32>
    %2 = tpu.iota {dimensions = array<i32: 1>} : vector<8x8xi32>
    %3 = arith.cmpi sle, %2, %1 : vector<8x8xi32>
    %c0_1 = arith.constant 0 : index
    %c0_2 = arith.constant 0 : index
    %c0_3 = arith.constant 0 : index
    %4 = vector.load %arg1[%c0_1, %c0_2, %c0_3] : memref<2x1x8xf32, #tpu.memory_space<vmem>>, vector<2x1x8xf32>
    %cst = arith.constant 5.000000e-01 : f32
    %5 = vector.broadcast %cst : f32 to vector<2x1x8xf32>
    %6 = arith.cmpf ogt, %4, %5 : vector<2x1x8xf32>
    %7 = vector.shape_cast %3 : vector<8x8xi1> to vector<1x8x8xi1>
    %8 = vector.broadcast %7 : vector<1x8x8xi1> to vector<2x8x8xi1>
    %9 = vector.broadcast %6 : vector<2x1x8xi1> to vector<2x8x8xi1>
    %10 = arith.andi %8, %9 : vector<2x8x8xi1>
    %cst_4 = arith.constant 0.000000e+00 : f32
    %cst_5 = arith.constant -1.000000e+30 : f32
    %11 = vector.broadcast %cst_4 : f32 to vector<2x8x8xf32>
    %12 = vector.broadcast %cst_5 : f32 to vector<2x8x8xf32>
    %13 = arith.select %10, %11, %12 : vector<2x8x8xi1>, vector<2x8x8xf32>
    %c0_6 = arith.constant 0 : index
    %c0_7 = arith.constant 0 : index
    %c0_8 = arith.constant 0 : index
    %14 = vector.load %arg2[%c0_6, %c0_7, %c0_8] : memref<2x8x8xf32, #tpu.memory_space<vmem>>, vector<2x8x8xf32>
    %c0_9 = arith.constant 0 : index
    %c0_10 = arith.constant 0 : index
    %c0_11 = arith.constant 0 : index
    %15 = vector.load %arg3[%c0_9, %c0_10, %c0_11] : memref<2x8x8xf32, #tpu.memory_space<vmem>>, vector<2x8x8xf32>
    %16 = tpu.iota {dimensions = array<i32: 2>} : vector<1x1x8xi32>
    %c4_i32 = arith.constant 4 : i32
    %17 = vector.broadcast %c4_i32 : i32 to vector<1x1x8xi32>
    %18 = arith.cmpi slt, %16, %17 : vector<1x1x8xi32>
    %cst_12 = arith.constant -1.000000e+00 : f32
    %cst_13 = arith.constant 1.000000e+00 : f32
    %19 = vector.broadcast %cst_12 : f32 to vector<1x1x8xf32>
    %20 = vector.broadcast %cst_13 : f32 to vector<1x1x8xf32>
    %21 = arith.select %18, %19, %20 : vector<1x1x8xi1>, vector<1x1x8xf32>
    %22 = arith.mulf %0, %0 : vector<16x32xf32>
    %cst_14 = arith.constant dense<0.000000e+00> : vector<16xf32>
    %23 = vector.multi_reduction <add>, %22, %cst_14 [1] : vector<16x32xf32> to vector<16xf32>
    %24 = vector.shape_cast %23 : vector<16xf32> to vector<16x1xf32>
    %cst_15 = arith.constant 3.200000e+01 : f32
    %25 = vector.broadcast %cst_15 : f32 to vector<16x1xf32>
    %26 = arith.divf %24, %25 : vector<16x1xf32>
    %cst_16 = arith.constant 9.99999997E-7 : f32
    %27 = vector.broadcast %cst_16 : f32 to vector<16x1xf32>
    %28 = arith.addf %26, %27 : vector<16x1xf32>
    %29 = math.rsqrt %28 : vector<16x1xf32>
    %30 = vector.broadcast %29 : vector<16x1xf32> to vector<16x32xf32>
    %31 = arith.mulf %0, %30 : vector<16x32xf32>
    %c0_17 = arith.constant 0 : index
    %c0_18 = arith.constant 0 : index
    %c0_19 = arith.constant 0 : index
    %32 = vector.load %arg8[%c0_17, %c0_18, %c0_19] : memref<2x1x32xf32, #tpu.memory_space<vmem>>, vector<1x1x32xf32>
    %33 = vector.shape_cast %32 : vector<1x1x32xf32> to vector<1x32xf32>
    %34 = vector.broadcast %33 : vector<1x32xf32> to vector<16x32xf32>
    %35 = arith.mulf %31, %34 : vector<16x32xf32>
    %c0_20 = arith.constant 0 : index
    %c0_21 = arith.constant 0 : index
    %c0_22 = arith.constant 0 : index
    %36 = vector.load %arg4[%c0_20, %c0_21, %c0_22] : memref<2x32x96xf32, #tpu.memory_space<vmem>>, vector<1x32x96xf32>
    %37 = vector.shape_cast %36 : vector<1x32x96xf32> to vector<32x96xf32>
    %cst_23 = arith.constant dense<0.000000e+00> : vector<16x96xf32>
    %38 = tpu.matmul %35, %37, %cst_23 {dimension_numbers = #tpu.dot_dimension_numbers<[1], [0], [0], [1], [0, 0, 1, 1], [], []>} : vector<16x32xf32>, vector<32x96xf32>, vector<16x96xf32> -> vector<16x96xf32>
    %39 = vector.extract_strided_slice %38 {offsets = [0, 0], sizes = [16, 8], strides = [1, 1]} : vector<16x96xf32> to vector<16x8xf32>
    %40 = vector.shape_cast %39 : vector<16x8xf32> to vector<2x8x8xf32>
    %41 = vector.extract_strided_slice %38 {offsets = [0, 32], sizes = [16, 8], strides = [1, 1]} : vector<16x96xf32> to vector<16x8xf32>
    %42 = vector.shape_cast %41 : vector<16x8xf32> to vector<2x8x8xf32>
    %43 = vector.extract_strided_slice %38 {offsets = [0, 64], sizes = [16, 8], strides = [1, 1]} : vector<16x96xf32> to vector<16x8xf32>
    %44 = vector.shape_cast %43 : vector<16x8xf32> to vector<2x8x8xf32>
    %45 = arith.mulf %40, %14 : vector<2x8x8xf32>
    %c4_i32_24 = arith.constant 4 : i32
    %46 = tpu.dynamic_rotate %40 by %c4_i32_24 dim 2 : vector<2x8x8xf32>, i32 -> vector<2x8x8xf32>
    %47 = vector.broadcast %21 : vector<1x1x8xf32> to vector<2x8x8xf32>
    %48 = arith.mulf %46, %47 : vector<2x8x8xf32>
    %49 = arith.mulf %48, %15 : vector<2x8x8xf32>
    %50 = arith.addf %45, %49 : vector<2x8x8xf32>
    %51 = arith.mulf %42, %14 : vector<2x8x8xf32>
    %c4_i32_25 = arith.constant 4 : i32
    %52 = tpu.dynamic_rotate %42 by %c4_i32_25 dim 2 : vector<2x8x8xf32>, i32 -> vector<2x8x8xf32>
    %53 = vector.broadcast %21 : vector<1x1x8xf32> to vector<2x8x8xf32>
    %54 = arith.mulf %52, %53 : vector<2x8x8xf32>
    %55 = arith.mulf %54, %15 : vector<2x8x8xf32>
    %56 = arith.addf %51, %55 : vector<2x8x8xf32>
    "tpu.trace_start"() <{level = 10 : i32, message = "bsd,btd->bst"}> : () -> ()
    %cst_26 = arith.constant dense<0.000000e+00> : vector<2x8x8xf32>
    %57 = tpu.matmul %50, %56, %cst_26 {dimension_numbers = #tpu.dot_dimension_numbers<[2], [2], [1], [1], [0, 0, 0, 1, 1, 1], [0], [0]>} : vector<2x8x8xf32>, vector<2x8x8xf32>, vector<2x8x8xf32> -> vector<2x8x8xf32>
    "tpu.trace_stop"() : () -> ()
    %cst_27 = arith.constant 0.353553385 : f32
    %58 = vector.broadcast %cst_27 : f32 to vector<2x8x8xf32>
    %59 = arith.mulf %57, %58 : vector<2x8x8xf32>
    %60 = arith.addf %59, %13 : vector<2x8x8xf32>
    %cst_28 = arith.constant dense<0xFF800000> : vector<2x8xf32>
    %61 = vector.multi_reduction <maximumf>, %60, %cst_28 [2] : vector<2x8x8xf32> to vector<2x8xf32>
    %62 = vector.shape_cast %61 : vector<2x8xf32> to vector<2x8x1xf32>
    %63 = vector.broadcast %62 : vector<2x8x1xf32> to vector<2x8x8xf32>
    %64 = arith.subf %60, %63 : vector<2x8x8xf32>
    %65 = math.exp %64 : vector<2x8x8xf32>
    %cst_29 = arith.constant dense<0.000000e+00> : vector<2x8xf32>
    %66 = vector.multi_reduction <add>, %65, %cst_29 [2] : vector<2x8x8xf32> to vector<2x8xf32>
    %67 = vector.shape_cast %66 : vector<2x8xf32> to vector<2x8x1xf32>
    %68 = vector.broadcast %67 : vector<2x8x1xf32> to vector<2x8x8xf32>
    %69 = arith.divf %65, %68 : vector<2x8x8xf32>
    "tpu.trace_start"() <{level = 10 : i32, message = "bst,btd->bsd"}> : () -> ()
    %cst_30 = arith.constant dense<0.000000e+00> : vector<2x8x8xf32>
    %70 = tpu.matmul %69, %44, %cst_30 {dimension_numbers = #tpu.dot_dimension_numbers<[2], [1], [1], [2], [0, 0, 0, 1, 1, 2], [0], [0]>} : vector<2x8x8xf32>, vector<2x8x8xf32>, vector<2x8x8xf32> -> vector<2x8x8xf32>
    "tpu.trace_stop"() : () -> ()
    %71 = vector.shape_cast %70 : vector<2x8x8xf32> to vector<16x8xf32>
    %72 = vector.extract_strided_slice %38 {offsets = [0, 8], sizes = [16, 8], strides = [1, 1]} : vector<16x96xf32> to vector<16x8xf32>
    %73 = vector.shape_cast %72 : vector<16x8xf32> to vector<2x8x8xf32>
    %74 = vector.extract_strided_slice %38 {offsets = [0, 40], sizes = [16, 8], strides = [1, 1]} : vector<16x96xf32> to vector<16x8xf32>
    %75 = vector.shape_cast %74 : vector<16x8xf32> to vector<2x8x8xf32>
    %76 = vector.extract_strided_slice %38 {offsets = [0, 72], sizes = [16, 8], strides = [1, 1]} : vector<16x96xf32> to vector<16x8xf32>
    %77 = vector.shape_cast %76 : vector<16x8xf32> to vector<2x8x8xf32>
    %78 = arith.mulf %73, %14 : vector<2x8x8xf32>
    %c4_i32_31 = arith.constant 4 : i32
    %79 = tpu.dynamic_rotate %73 by %c4_i32_31 dim 2 : vector<2x8x8xf32>, i32 -> vector<2x8x8xf32>
    %80 = vector.broadcast %21 : vector<1x1x8xf32> to vector<2x8x8xf32>
    %81 = arith.mulf %79, %80 : vector<2x8x8xf32>
    %82 = arith.mulf %81, %15 : vector<2x8x8xf32>
    %83 = arith.addf %78, %82 : vector<2x8x8xf32>
    %84 = arith.mulf %75, %14 : vector<2x8x8xf32>
    %c4_i32_32 = arith.constant 4 : i32
    %85 = tpu.dynamic_rotate %75 by %c4_i32_32 dim 2 : vector<2x8x8xf32>, i32 -> vector<2x8x8xf32>
    %86 = vector.broadcast %21 : vector<1x1x8xf32> to vector<2x8x8xf32>
    %87 = arith.mulf %85, %86 : vector<2x8x8xf32>
    %88 = arith.mulf %87, %15 : vector<2x8x8xf32>
    %89 = arith.addf %84, %88 : vector<2x8x8xf32>
    "tpu.trace_start"() <{level = 10 : i32, message = "bsd,btd->bst"}> : () -> ()
    %cst_33 = arith.constant dense<0.000000e+00> : vector<2x8x8xf32>
    %90 = tpu.matmul %83, %89, %cst_33 {dimension_numbers = #tpu.dot_dimension_numbers<[2], [2], [1], [1], [0, 0, 0, 1, 1, 1], [0], [0]>} : vector<2x8x8xf32>, vector<2x8x8xf32>, vector<2x8x8xf32> -> vector<2x8x8xf32>
    "tpu.trace_stop"() : () -> ()
    %cst_34 = arith.constant 0.353553385 : f32
    %91 = vector.broadcast %cst_34 : f32 to vector<2x8x8xf32>
    %92 = arith.mulf %90, %91 : vector<2x8x8xf32>
    %93 = arith.addf %92, %13 : vector<2x8x8xf32>
    %cst_35 = arith.constant dense<0xFF800000> : vector<2x8xf32>
    %94 = vector.multi_reduction <maximumf>, %93, %cst_35 [2] : vector<2x8x8xf32> to vector<2x8xf32>
    %95 = vector.shape_cast %94 : vector<2x8xf32> to vector<2x8x1xf32>
    %96 = vector.broadcast %95 : vector<2x8x1xf32> to vector<2x8x8xf32>
    %97 = arith.subf %93, %96 : vector<2x8x8xf32>
    %98 = math.exp %97 : vector<2x8x8xf32>
    %cst_36 = arith.constant dense<0.000000e+00> : vector<2x8xf32>
    %99 = vector.multi_reduction <add>, %98, %cst_36 [2] : vector<2x8x8xf32> to vector<2x8xf32>
    %100 = vector.shape_cast %99 : vector<2x8xf32> to vector<2x8x1xf32>
    %101 = vector.broadcast %100 : vector<2x8x1xf32> to vector<2x8x8xf32>
    %102 = arith.divf %98, %101 : vector<2x8x8xf32>
    "tpu.trace_start"() <{level = 10 : i32, message = "bst,btd->bsd"}> : () -> ()
    %cst_37 = arith.constant dense<0.000000e+00> : vector<2x8x8xf32>
    %103 = tpu.matmul %102, %77, %cst_37 {dimension_numbers = #tpu.dot_dimension_numbers<[2], [1], [1], [2], [0, 0, 0, 1, 1, 2], [0], [0]>} : vector<2x8x8xf32>, vector<2x8x8xf32>, vector<2x8x8xf32> -> vector<2x8x8xf32>
    "tpu.trace_stop"() : () -> ()
    %104 = vector.shape_cast %103 : vector<2x8x8xf32> to vector<16x8xf32>
    %105 = vector.extract_strided_slice %38 {offsets = [0, 16], sizes = [16, 8], strides = [1, 1]} : vector<16x96xf32> to vector<16x8xf32>
    %106 = vector.shape_cast %105 : vector<16x8xf32> to vector<2x8x8xf32>
    %107 = vector.extract_strided_slice %38 {offsets = [0, 48], sizes = [16, 8], strides = [1, 1]} : vector<16x96xf32> to vector<16x8xf32>
    %108 = vector.shape_cast %107 : vector<16x8xf32> to vector<2x8x8xf32>
    %109 = vector.extract_strided_slice %38 {offsets = [0, 80], sizes = [16, 8], strides = [1, 1]} : vector<16x96xf32> to vector<16x8xf32>
    %110 = vector.shape_cast %109 : vector<16x8xf32> to vector<2x8x8xf32>
    %111 = arith.mulf %106, %14 : vector<2x8x8xf32>
    %c4_i32_38 = arith.constant 4 : i32
    %112 = tpu.dynamic_rotate %106 by %c4_i32_38 dim 2 : vector<2x8x8xf32>, i32 -> vector<2x8x8xf32>
    %113 = vector.broadcast %21 : vector<1x1x8xf32> to vector<2x8x8xf32>
    %114 = arith.mulf %112, %113 : vector<2x8x8xf32>
    %115 = arith.mulf %114, %15 : vector<2x8x8xf32>
    %116 = arith.addf %111, %115 : vector<2x8x8xf32>
    %117 = arith.mulf %108, %14 : vector<2x8x8xf32>
    %c4_i32_39 = arith.constant 4 : i32
    %118 = tpu.dynamic_rotate %108 by %c4_i32_39 dim 2 : vector<2x8x8xf32>, i32 -> vector<2x8x8xf32>
    %119 = vector.broadcast %21 : vector<1x1x8xf32> to vector<2x8x8xf32>
    %120 = arith.mulf %118, %119 : vector<2x8x8xf32>
    %121 = arith.mulf %120, %15 : vector<2x8x8xf32>
    %122 = arith.addf %117, %121 : vector<2x8x8xf32>
    "tpu.trace_start"() <{level = 10 : i32, message = "bsd,btd->bst"}> : () -> ()
    %cst_40 = arith.constant dense<0.000000e+00> : vector<2x8x8xf32>
    %123 = tpu.matmul %116, %122, %cst_40 {dimension_numbers = #tpu.dot_dimension_numbers<[2], [2], [1], [1], [0, 0, 0, 1, 1, 1], [0], [0]>} : vector<2x8x8xf32>, vector<2x8x8xf32>, vector<2x8x8xf32> -> vector<2x8x8xf32>
    "tpu.trace_stop"() : () -> ()
    %cst_41 = arith.constant 0.353553385 : f32
    %124 = vector.broadcast %cst_41 : f32 to vector<2x8x8xf32>
    %125 = arith.mulf %123, %124 : vector<2x8x8xf32>
    %126 = arith.addf %125, %13 : vector<2x8x8xf32>
    %cst_42 = arith.constant dense<0xFF800000> : vector<2x8xf32>
    %127 = vector.multi_reduction <maximumf>, %126, %cst_42 [2] : vector<2x8x8xf32> to vector<2x8xf32>
    %128 = vector.shape_cast %127 : vector<2x8xf32> to vector<2x8x1xf32>
    %129 = vector.broadcast %128 : vector<2x8x1xf32> to vector<2x8x8xf32>
    %130 = arith.subf %126, %129 : vector<2x8x8xf32>
    %131 = math.exp %130 : vector<2x8x8xf32>
    %cst_43 = arith.constant dense<0.000000e+00> : vector<2x8xf32>
    %132 = vector.multi_reduction <add>, %131, %cst_43 [2] : vector<2x8x8xf32> to vector<2x8xf32>
    %133 = vector.shape_cast %132 : vector<2x8xf32> to vector<2x8x1xf32>
    %134 = vector.broadcast %133 : vector<2x8x1xf32> to vector<2x8x8xf32>
    %135 = arith.divf %131, %134 : vector<2x8x8xf32>
    "tpu.trace_start"() <{level = 10 : i32, message = "bst,btd->bsd"}> : () -> ()
    %cst_44 = arith.constant dense<0.000000e+00> : vector<2x8x8xf32>
    %136 = tpu.matmul %135, %110, %cst_44 {dimension_numbers = #tpu.dot_dimension_numbers<[2], [1], [1], [2], [0, 0, 0, 1, 1, 2], [0], [0]>} : vector<2x8x8xf32>, vector<2x8x8xf32>, vector<2x8x8xf32> -> vector<2x8x8xf32>
    "tpu.trace_stop"() : () -> ()
    %137 = vector.shape_cast %136 : vector<2x8x8xf32> to vector<16x8xf32>
    %138 = vector.extract_strided_slice %38 {offsets = [0, 24], sizes = [16, 8], strides = [1, 1]} : vector<16x96xf32> to vector<16x8xf32>
    %139 = vector.shape_cast %138 : vector<16x8xf32> to vector<2x8x8xf32>
    %140 = vector.extract_strided_slice %38 {offsets = [0, 56], sizes = [16, 8], strides = [1, 1]} : vector<16x96xf32> to vector<16x8xf32>
    %141 = vector.shape_cast %140 : vector<16x8xf32> to vector<2x8x8xf32>
    %142 = vector.extract_strided_slice %38 {offsets = [0, 88], sizes = [16, 8], strides = [1, 1]} : vector<16x96xf32> to vector<16x8xf32>
    %143 = vector.shape_cast %142 : vector<16x8xf32> to vector<2x8x8xf32>
    %144 = arith.mulf %139, %14 : vector<2x8x8xf32>
    %c4_i32_45 = arith.constant 4 : i32
    %145 = tpu.dynamic_rotate %139 by %c4_i32_45 dim 2 : vector<2x8x8xf32>, i32 -> vector<2x8x8xf32>
    %146 = vector.broadcast %21 : vector<1x1x8xf32> to vector<2x8x8xf32>
    %147 = arith.mulf %145, %146 : vector<2x8x8xf32>
    %148 = arith.mulf %147, %15 : vector<2x8x8xf32>
    %149 = arith.addf %144, %148 : vector<2x8x8xf32>
    %150 = arith.mulf %141, %14 : vector<2x8x8xf32>
    %c4_i32_46 = arith.constant 4 : i32
    %151 = tpu.dynamic_rotate %141 by %c4_i32_46 dim 2 : vector<2x8x8xf32>, i32 -> vector<2x8x8xf32>
    %152 = vector.broadcast %21 : vector<1x1x8xf32> to vector<2x8x8xf32>
    %153 = arith.mulf %151, %152 : vector<2x8x8xf32>
    %154 = arith.mulf %153, %15 : vector<2x8x8xf32>
    %155 = arith.addf %150, %154 : vector<2x8x8xf32>
    "tpu.trace_start"() <{level = 10 : i32, message = "bsd,btd->bst"}> : () -> ()
    %cst_47 = arith.constant dense<0.000000e+00> : vector<2x8x8xf32>
    %156 = tpu.matmul %149, %155, %cst_47 {dimension_numbers = #tpu.dot_dimension_numbers<[2], [2], [1], [1], [0, 0, 0, 1, 1, 1], [0], [0]>} : vector<2x8x8xf32>, vector<2x8x8xf32>, vector<2x8x8xf32> -> vector<2x8x8xf32>
    "tpu.trace_stop"() : () -> ()
    %cst_48 = arith.constant 0.353553385 : f32
    %157 = vector.broadcast %cst_48 : f32 to vector<2x8x8xf32>
    %158 = arith.mulf %156, %157 : vector<2x8x8xf32>
    %159 = arith.addf %158, %13 : vector<2x8x8xf32>
    %cst_49 = arith.constant dense<0xFF800000> : vector<2x8xf32>
    %160 = vector.multi_reduction <maximumf>, %159, %cst_49 [2] : vector<2x8x8xf32> to vector<2x8xf32>
    %161 = vector.shape_cast %160 : vector<2x8xf32> to vector<2x8x1xf32>
    %162 = vector.broadcast %161 : vector<2x8x1xf32> to vector<2x8x8xf32>
    %163 = arith.subf %159, %162 : vector<2x8x8xf32>
    %164 = math.exp %163 : vector<2x8x8xf32>
    %cst_50 = arith.constant dense<0.000000e+00> : vector<2x8xf32>
    %165 = vector.multi_reduction <add>, %164, %cst_50 [2] : vector<2x8x8xf32> to vector<2x8xf32>
    %166 = vector.shape_cast %165 : vector<2x8xf32> to vector<2x8x1xf32>
    %167 = vector.broadcast %166 : vector<2x8x1xf32> to vector<2x8x8xf32>
    %168 = arith.divf %164, %167 : vector<2x8x8xf32>
    "tpu.trace_start"() <{level = 10 : i32, message = "bst,btd->bsd"}> : () -> ()
    %cst_51 = arith.constant dense<0.000000e+00> : vector<2x8x8xf32>
    %169 = tpu.matmul %168, %143, %cst_51 {dimension_numbers = #tpu.dot_dimension_numbers<[2], [1], [1], [2], [0, 0, 0, 1, 1, 2], [0], [0]>} : vector<2x8x8xf32>, vector<2x8x8xf32>, vector<2x8x8xf32> -> vector<2x8x8xf32>
    "tpu.trace_stop"() : () -> ()
    %170 = vector.shape_cast %169 : vector<2x8x8xf32> to vector<16x8xf32>
    %171 = tpu.concatenate %71, %104, %137, %170 in 1 : vector<16x8xf32>, vector<16x8xf32>, vector<16x8xf32>, vector<16x8xf32> -> vector<16x32xf32>
    %c0_52 = arith.constant 0 : index
    %c0_53 = arith.constant 0 : index
    %c0_54 = arith.constant 0 : index
    %172 = vector.load %arg5[%c0_52, %c0_53, %c0_54] : memref<2x32x32xf32, #tpu.memory_space<vmem>>, vector<1x32x32xf32>
    %173 = vector.shape_cast %172 : vector<1x32x32xf32> to vector<32x32xf32>
    %cst_55 = arith.constant dense<0.000000e+00> : vector<16x32xf32>
    %174 = tpu.matmul %171, %173, %cst_55 {dimension_numbers = #tpu.dot_dimension_numbers<[1], [0], [0], [1], [0, 0, 1, 1], [], []>} : vector<16x32xf32>, vector<32x32xf32>, vector<16x32xf32> -> vector<16x32xf32>
    %175 = arith.addf %0, %174 : vector<16x32xf32>
    %176 = arith.mulf %175, %175 : vector<16x32xf32>
    %cst_56 = arith.constant dense<0.000000e+00> : vector<16xf32>
    %177 = vector.multi_reduction <add>, %176, %cst_56 [1] : vector<16x32xf32> to vector<16xf32>
    %178 = vector.shape_cast %177 : vector<16xf32> to vector<16x1xf32>
    %cst_57 = arith.constant 3.200000e+01 : f32
    %179 = vector.broadcast %cst_57 : f32 to vector<16x1xf32>
    %180 = arith.divf %178, %179 : vector<16x1xf32>
    %cst_58 = arith.constant 9.99999997E-7 : f32
    %181 = vector.broadcast %cst_58 : f32 to vector<16x1xf32>
    %182 = arith.addf %180, %181 : vector<16x1xf32>
    %183 = math.rsqrt %182 : vector<16x1xf32>
    %184 = vector.broadcast %183 : vector<16x1xf32> to vector<16x32xf32>
    %185 = arith.mulf %175, %184 : vector<16x32xf32>
    %c0_59 = arith.constant 0 : index
    %c0_60 = arith.constant 0 : index
    %c0_61 = arith.constant 0 : index
    %186 = vector.load %arg9[%c0_59, %c0_60, %c0_61] : memref<2x1x32xf32, #tpu.memory_space<vmem>>, vector<1x1x32xf32>
    %187 = vector.shape_cast %186 : vector<1x1x32xf32> to vector<1x32xf32>
    %188 = vector.broadcast %187 : vector<1x32xf32> to vector<16x32xf32>
    %189 = arith.mulf %185, %188 : vector<16x32xf32>
    %c0_62 = arith.constant 0 : index
    %c0_63 = arith.constant 0 : index
    %c0_64 = arith.constant 0 : index
    %190 = vector.load %arg6[%c0_62, %c0_63, %c0_64] : memref<2x32x128xf32, #tpu.memory_space<vmem>>, vector<1x32x128xf32>
    %191 = vector.shape_cast %190 : vector<1x32x128xf32> to vector<32x128xf32>
    %cst_65 = arith.constant dense<0.000000e+00> : vector<16x128xf32>
    %192 = tpu.matmul %189, %191, %cst_65 {dimension_numbers = #tpu.dot_dimension_numbers<[1], [0], [0], [1], [0, 0, 1, 1], [], []>} : vector<16x32xf32>, vector<32x128xf32>, vector<16x128xf32> -> vector<16x128xf32>
    %193 = vector.extract_strided_slice %192 {offsets = [0, 0], sizes = [16, 64], strides = [1, 1]} : vector<16x128xf32> to vector<16x64xf32>
    %194 = vector.extract_strided_slice %192 {offsets = [0, 64], sizes = [16, 64], strides = [1, 1]} : vector<16x128xf32> to vector<16x64xf32>
    %195 = arith.negf %193 : vector<16x64xf32>
    %196 = math.exp %195 : vector<16x64xf32>
    %cst_66 = arith.constant 1.000000e+00 : f32
    %197 = vector.broadcast %cst_66 : f32 to vector<16x64xf32>
    %198 = arith.addf %197, %196 : vector<16x64xf32>
    %199 = arith.divf %197, %198 : vector<16x64xf32>
    %200 = arith.mulf %193, %199 : vector<16x64xf32>
    %201 = arith.mulf %200, %194 : vector<16x64xf32>
    %c0_67 = arith.constant 0 : index
    %c0_68 = arith.constant 0 : index
    %c0_69 = arith.constant 0 : index
    %202 = vector.load %arg7[%c0_67, %c0_68, %c0_69] : memref<2x64x32xf32, #tpu.memory_space<vmem>>, vector<1x64x32xf32>
    %203 = vector.shape_cast %202 : vector<1x64x32xf32> to vector<64x32xf32>
    %cst_70 = arith.constant dense<0.000000e+00> : vector<16x32xf32>
    %204 = tpu.matmul %201, %203, %cst_70 {dimension_numbers = #tpu.dot_dimension_numbers<[1], [0], [0], [1], [0, 0, 1, 1], [], []>} : vector<16x64xf32>, vector<64x32xf32>, vector<16x32xf32> -> vector<16x32xf32>
    %205 = arith.addf %175, %204 : vector<16x32xf32>
    %206 = arith.mulf %205, %205 : vector<16x32xf32>
    %cst_71 = arith.constant dense<0.000000e+00> : vector<16xf32>
    %207 = vector.multi_reduction <add>, %206, %cst_71 [1] : vector<16x32xf32> to vector<16xf32>
    %208 = vector.shape_cast %207 : vector<16xf32> to vector<16x1xf32>
    %cst_72 = arith.constant 3.200000e+01 : f32
    %209 = vector.broadcast %cst_72 : f32 to vector<16x1xf32>
    %210 = arith.divf %208, %209 : vector<16x1xf32>
    %cst_73 = arith.constant 9.99999997E-7 : f32
    %211 = vector.broadcast %cst_73 : f32 to vector<16x1xf32>
    %212 = arith.addf %210, %211 : vector<16x1xf32>
    %213 = math.rsqrt %212 : vector<16x1xf32>
    %214 = vector.broadcast %213 : vector<16x1xf32> to vector<16x32xf32>
    %215 = arith.mulf %205, %214 : vector<16x32xf32>
    %c1 = arith.constant 1 : index
    %c0_74 = arith.constant 0 : index
    %c0_75 = arith.constant 0 : index
    %216 = vector.load %arg8[%c1, %c0_74, %c0_75] : memref<2x1x32xf32, #tpu.memory_space<vmem>>, vector<1x1x32xf32>
    %217 = vector.shape_cast %216 : vector<1x1x32xf32> to vector<1x32xf32>
    %218 = vector.broadcast %217 : vector<1x32xf32> to vector<16x32xf32>
    %219 = arith.mulf %215, %218 : vector<16x32xf32>
    %c1_76 = arith.constant 1 : index
    %c0_77 = arith.constant 0 : index
    %c0_78 = arith.constant 0 : index
    %220 = vector.load %arg4[%c1_76, %c0_77, %c0_78] : memref<2x32x96xf32, #tpu.memory_space<vmem>>, vector<1x32x96xf32>
    %221 = vector.shape_cast %220 : vector<1x32x96xf32> to vector<32x96xf32>
    %cst_79 = arith.constant dense<0.000000e+00> : vector<16x96xf32>
    %222 = tpu.matmul %219, %221, %cst_79 {dimension_numbers = #tpu.dot_dimension_numbers<[1], [0], [0], [1], [0, 0, 1, 1], [], []>} : vector<16x32xf32>, vector<32x96xf32>, vector<16x96xf32> -> vector<16x96xf32>
    %223 = vector.extract_strided_slice %222 {offsets = [0, 0], sizes = [16, 8], strides = [1, 1]} : vector<16x96xf32> to vector<16x8xf32>
    %224 = vector.shape_cast %223 : vector<16x8xf32> to vector<2x8x8xf32>
    %225 = vector.extract_strided_slice %222 {offsets = [0, 32], sizes = [16, 8], strides = [1, 1]} : vector<16x96xf32> to vector<16x8xf32>
    %226 = vector.shape_cast %225 : vector<16x8xf32> to vector<2x8x8xf32>
    %227 = vector.extract_strided_slice %222 {offsets = [0, 64], sizes = [16, 8], strides = [1, 1]} : vector<16x96xf32> to vector<16x8xf32>
    %228 = vector.shape_cast %227 : vector<16x8xf32> to vector<2x8x8xf32>
    %229 = arith.mulf %224, %14 : vector<2x8x8xf32>
    %c4_i32_80 = arith.constant 4 : i32
    %230 = tpu.dynamic_rotate %224 by %c4_i32_80 dim 2 : vector<2x8x8xf32>, i32 -> vector<2x8x8xf32>
    %231 = vector.broadcast %21 : vector<1x1x8xf32> to vector<2x8x8xf32>
    %232 = arith.mulf %230, %231 : vector<2x8x8xf32>
    %233 = arith.mulf %232, %15 : vector<2x8x8xf32>
    %234 = arith.addf %229, %233 : vector<2x8x8xf32>
    %235 = arith.mulf %226, %14 : vector<2x8x8xf32>
    %c4_i32_81 = arith.constant 4 : i32
    %236 = tpu.dynamic_rotate %226 by %c4_i32_81 dim 2 : vector<2x8x8xf32>, i32 -> vector<2x8x8xf32>
    %237 = vector.broadcast %21 : vector<1x1x8xf32> to vector<2x8x8xf32>
    %238 = arith.mulf %236, %237 : vector<2x8x8xf32>
    %239 = arith.mulf %238, %15 : vector<2x8x8xf32>
    %240 = arith.addf %235, %239 : vector<2x8x8xf32>
    "tpu.trace_start"() <{level = 10 : i32, message = "bsd,btd->bst"}> : () -> ()
    %cst_82 = arith.constant dense<0.000000e+00> : vector<2x8x8xf32>
    %241 = tpu.matmul %234, %240, %cst_82 {dimension_numbers = #tpu.dot_dimension_numbers<[2], [2], [1], [1], [0, 0, 0, 1, 1, 1], [0], [0]>} : vector<2x8x8xf32>, vector<2x8x8xf32>, vector<2x8x8xf32> -> vector<2x8x8xf32>
    "tpu.trace_stop"() : () -> ()
    %cst_83 = arith.constant 0.353553385 : f32
    %242 = vector.broadcast %cst_83 : f32 to vector<2x8x8xf32>
    %243 = arith.mulf %241, %242 : vector<2x8x8xf32>
    %244 = arith.addf %243, %13 : vector<2x8x8xf32>
    %cst_84 = arith.constant dense<0xFF800000> : vector<2x8xf32>
    %245 = vector.multi_reduction <maximumf>, %244, %cst_84 [2] : vector<2x8x8xf32> to vector<2x8xf32>
    %246 = vector.shape_cast %245 : vector<2x8xf32> to vector<2x8x1xf32>
    %247 = vector.broadcast %246 : vector<2x8x1xf32> to vector<2x8x8xf32>
    %248 = arith.subf %244, %247 : vector<2x8x8xf32>
    %249 = math.exp %248 : vector<2x8x8xf32>
    %cst_85 = arith.constant dense<0.000000e+00> : vector<2x8xf32>
    %250 = vector.multi_reduction <add>, %249, %cst_85 [2] : vector<2x8x8xf32> to vector<2x8xf32>
    %251 = vector.shape_cast %250 : vector<2x8xf32> to vector<2x8x1xf32>
    %252 = vector.broadcast %251 : vector<2x8x1xf32> to vector<2x8x8xf32>
    %253 = arith.divf %249, %252 : vector<2x8x8xf32>
    "tpu.trace_start"() <{level = 10 : i32, message = "bst,btd->bsd"}> : () -> ()
    %cst_86 = arith.constant dense<0.000000e+00> : vector<2x8x8xf32>
    %254 = tpu.matmul %253, %228, %cst_86 {dimension_numbers = #tpu.dot_dimension_numbers<[2], [1], [1], [2], [0, 0, 0, 1, 1, 2], [0], [0]>} : vector<2x8x8xf32>, vector<2x8x8xf32>, vector<2x8x8xf32> -> vector<2x8x8xf32>
    "tpu.trace_stop"() : () -> ()
    %255 = vector.shape_cast %254 : vector<2x8x8xf32> to vector<16x8xf32>
    %256 = vector.extract_strided_slice %222 {offsets = [0, 8], sizes = [16, 8], strides = [1, 1]} : vector<16x96xf32> to vector<16x8xf32>
    %257 = vector.shape_cast %256 : vector<16x8xf32> to vector<2x8x8xf32>
    %258 = vector.extract_strided_slice %222 {offsets = [0, 40], sizes = [16, 8], strides = [1, 1]} : vector<16x96xf32> to vector<16x8xf32>
    %259 = vector.shape_cast %258 : vector<16x8xf32> to vector<2x8x8xf32>
    %260 = vector.extract_strided_slice %222 {offsets = [0, 72], sizes = [16, 8], strides = [1, 1]} : vector<16x96xf32> to vector<16x8xf32>
    %261 = vector.shape_cast %260 : vector<16x8xf32> to vector<2x8x8xf32>
    %262 = arith.mulf %257, %14 : vector<2x8x8xf32>
    %c4_i32_87 = arith.constant 4 : i32
    %263 = tpu.dynamic_rotate %257 by %c4_i32_87 dim 2 : vector<2x8x8xf32>, i32 -> vector<2x8x8xf32>
    %264 = vector.broadcast %21 : vector<1x1x8xf32> to vector<2x8x8xf32>
    %265 = arith.mulf %263, %264 : vector<2x8x8xf32>
    %266 = arith.mulf %265, %15 : vector<2x8x8xf32>
    %267 = arith.addf %262, %266 : vector<2x8x8xf32>
    %268 = arith.mulf %259, %14 : vector<2x8x8xf32>
    %c4_i32_88 = arith.constant 4 : i32
    %269 = tpu.dynamic_rotate %259 by %c4_i32_88 dim 2 : vector<2x8x8xf32>, i32 -> vector<2x8x8xf32>
    %270 = vector.broadcast %21 : vector<1x1x8xf32> to vector<2x8x8xf32>
    %271 = arith.mulf %269, %270 : vector<2x8x8xf32>
    %272 = arith.mulf %271, %15 : vector<2x8x8xf32>
    %273 = arith.addf %268, %272 : vector<2x8x8xf32>
    "tpu.trace_start"() <{level = 10 : i32, message = "bsd,btd->bst"}> : () -> ()
    %cst_89 = arith.constant dense<0.000000e+00> : vector<2x8x8xf32>
    %274 = tpu.matmul %267, %273, %cst_89 {dimension_numbers = #tpu.dot_dimension_numbers<[2], [2], [1], [1], [0, 0, 0, 1, 1, 1], [0], [0]>} : vector<2x8x8xf32>, vector<2x8x8xf32>, vector<2x8x8xf32> -> vector<2x8x8xf32>
    "tpu.trace_stop"() : () -> ()
    %cst_90 = arith.constant 0.353553385 : f32
    %275 = vector.broadcast %cst_90 : f32 to vector<2x8x8xf32>
    %276 = arith.mulf %274, %275 : vector<2x8x8xf32>
    %277 = arith.addf %276, %13 : vector<2x8x8xf32>
    %cst_91 = arith.constant dense<0xFF800000> : vector<2x8xf32>
    %278 = vector.multi_reduction <maximumf>, %277, %cst_91 [2] : vector<2x8x8xf32> to vector<2x8xf32>
    %279 = vector.shape_cast %278 : vector<2x8xf32> to vector<2x8x1xf32>
    %280 = vector.broadcast %279 : vector<2x8x1xf32> to vector<2x8x8xf32>
    %281 = arith.subf %277, %280 : vector<2x8x8xf32>
    %282 = math.exp %281 : vector<2x8x8xf32>
    %cst_92 = arith.constant dense<0.000000e+00> : vector<2x8xf32>
    %283 = vector.multi_reduction <add>, %282, %cst_92 [2] : vector<2x8x8xf32> to vector<2x8xf32>
    %284 = vector.shape_cast %283 : vector<2x8xf32> to vector<2x8x1xf32>
    %285 = vector.broadcast %284 : vector<2x8x1xf32> to vector<2x8x8xf32>
    %286 = arith.divf %282, %285 : vector<2x8x8xf32>
    "tpu.trace_start"() <{level = 10 : i32, message = "bst,btd->bsd"}> : () -> ()
    %cst_93 = arith.constant dense<0.000000e+00> : vector<2x8x8xf32>
    %287 = tpu.matmul %286, %261, %cst_93 {dimension_numbers = #tpu.dot_dimension_numbers<[2], [1], [1], [2], [0, 0, 0, 1, 1, 2], [0], [0]>} : vector<2x8x8xf32>, vector<2x8x8xf32>, vector<2x8x8xf32> -> vector<2x8x8xf32>
    "tpu.trace_stop"() : () -> ()
    %288 = vector.shape_cast %287 : vector<2x8x8xf32> to vector<16x8xf32>
    %289 = vector.extract_strided_slice %222 {offsets = [0, 16], sizes = [16, 8], strides = [1, 1]} : vector<16x96xf32> to vector<16x8xf32>
    %290 = vector.shape_cast %289 : vector<16x8xf32> to vector<2x8x8xf32>
    %291 = vector.extract_strided_slice %222 {offsets = [0, 48], sizes = [16, 8], strides = [1, 1]} : vector<16x96xf32> to vector<16x8xf32>
    %292 = vector.shape_cast %291 : vector<16x8xf32> to vector<2x8x8xf32>
    %293 = vector.extract_strided_slice %222 {offsets = [0, 80], sizes = [16, 8], strides = [1, 1]} : vector<16x96xf32> to vector<16x8xf32>
    %294 = vector.shape_cast %293 : vector<16x8xf32> to vector<2x8x8xf32>
    %295 = arith.mulf %290, %14 : vector<2x8x8xf32>
    %c4_i32_94 = arith.constant 4 : i32
    %296 = tpu.dynamic_rotate %290 by %c4_i32_94 dim 2 : vector<2x8x8xf32>, i32 -> vector<2x8x8xf32>
    %297 = vector.broadcast %21 : vector<1x1x8xf32> to vector<2x8x8xf32>
    %298 = arith.mulf %296, %297 : vector<2x8x8xf32>
    %299 = arith.mulf %298, %15 : vector<2x8x8xf32>
    %300 = arith.addf %295, %299 : vector<2x8x8xf32>
    %301 = arith.mulf %292, %14 : vector<2x8x8xf32>
    %c4_i32_95 = arith.constant 4 : i32
    %302 = tpu.dynamic_rotate %292 by %c4_i32_95 dim 2 : vector<2x8x8xf32>, i32 -> vector<2x8x8xf32>
    %303 = vector.broadcast %21 : vector<1x1x8xf32> to vector<2x8x8xf32>
    %304 = arith.mulf %302, %303 : vector<2x8x8xf32>
    %305 = arith.mulf %304, %15 : vector<2x8x8xf32>
    %306 = arith.addf %301, %305 : vector<2x8x8xf32>
    "tpu.trace_start"() <{level = 10 : i32, message = "bsd,btd->bst"}> : () -> ()
    %cst_96 = arith.constant dense<0.000000e+00> : vector<2x8x8xf32>
    %307 = tpu.matmul %300, %306, %cst_96 {dimension_numbers = #tpu.dot_dimension_numbers<[2], [2], [1], [1], [0, 0, 0, 1, 1, 1], [0], [0]>} : vector<2x8x8xf32>, vector<2x8x8xf32>, vector<2x8x8xf32> -> vector<2x8x8xf32>
    "tpu.trace_stop"() : () -> ()
    %cst_97 = arith.constant 0.353553385 : f32
    %308 = vector.broadcast %cst_97 : f32 to vector<2x8x8xf32>
    %309 = arith.mulf %307, %308 : vector<2x8x8xf32>
    %310 = arith.addf %309, %13 : vector<2x8x8xf32>
    %cst_98 = arith.constant dense<0xFF800000> : vector<2x8xf32>
    %311 = vector.multi_reduction <maximumf>, %310, %cst_98 [2] : vector<2x8x8xf32> to vector<2x8xf32>
    %312 = vector.shape_cast %311 : vector<2x8xf32> to vector<2x8x1xf32>
    %313 = vector.broadcast %312 : vector<2x8x1xf32> to vector<2x8x8xf32>
    %314 = arith.subf %310, %313 : vector<2x8x8xf32>
    %315 = math.exp %314 : vector<2x8x8xf32>
    %cst_99 = arith.constant dense<0.000000e+00> : vector<2x8xf32>
    %316 = vector.multi_reduction <add>, %315, %cst_99 [2] : vector<2x8x8xf32> to vector<2x8xf32>
    %317 = vector.shape_cast %316 : vector<2x8xf32> to vector<2x8x1xf32>
    %318 = vector.broadcast %317 : vector<2x8x1xf32> to vector<2x8x8xf32>
    %319 = arith.divf %315, %318 : vector<2x8x8xf32>
    "tpu.trace_start"() <{level = 10 : i32, message = "bst,btd->bsd"}> : () -> ()
    %cst_100 = arith.constant dense<0.000000e+00> : vector<2x8x8xf32>
    %320 = tpu.matmul %319, %294, %cst_100 {dimension_numbers = #tpu.dot_dimension_numbers<[2], [1], [1], [2], [0, 0, 0, 1, 1, 2], [0], [0]>} : vector<2x8x8xf32>, vector<2x8x8xf32>, vector<2x8x8xf32> -> vector<2x8x8xf32>
    "tpu.trace_stop"() : () -> ()
    %321 = vector.shape_cast %320 : vector<2x8x8xf32> to vector<16x8xf32>
    %322 = vector.extract_strided_slice %222 {offsets = [0, 24], sizes = [16, 8], strides = [1, 1]} : vector<16x96xf32> to vector<16x8xf32>
    %323 = vector.shape_cast %322 : vector<16x8xf32> to vector<2x8x8xf32>
    %324 = vector.extract_strided_slice %222 {offsets = [0, 56], sizes = [16, 8], strides = [1, 1]} : vector<16x96xf32> to vector<16x8xf32>
    %325 = vector.shape_cast %324 : vector<16x8xf32> to vector<2x8x8xf32>
    %326 = vector.extract_strided_slice %222 {offsets = [0, 88], sizes = [16, 8], strides = [1, 1]} : vector<16x96xf32> to vector<16x8xf32>
    %327 = vector.shape_cast %326 : vector<16x8xf32> to vector<2x8x8xf32>
    %328 = arith.mulf %323, %14 : vector<2x8x8xf32>
    %c4_i32_101 = arith.constant 4 : i32
    %329 = tpu.dynamic_rotate %323 by %c4_i32_101 dim 2 : vector<2x8x8xf32>, i32 -> vector<2x8x8xf32>
    %330 = vector.broadcast %21 : vector<1x1x8xf32> to vector<2x8x8xf32>
    %331 = arith.mulf %329, %330 : vector<2x8x8xf32>
    %332 = arith.mulf %331, %15 : vector<2x8x8xf32>
    %333 = arith.addf %328, %332 : vector<2x8x8xf32>
    %334 = arith.mulf %325, %14 : vector<2x8x8xf32>
    %c4_i32_102 = arith.constant 4 : i32
    %335 = tpu.dynamic_rotate %325 by %c4_i32_102 dim 2 : vector<2x8x8xf32>, i32 -> vector<2x8x8xf32>
    %336 = vector.broadcast %21 : vector<1x1x8xf32> to vector<2x8x8xf32>
    %337 = arith.mulf %335, %336 : vector<2x8x8xf32>
    %338 = arith.mulf %337, %15 : vector<2x8x8xf32>
    %339 = arith.addf %334, %338 : vector<2x8x8xf32>
    "tpu.trace_start"() <{level = 10 : i32, message = "bsd,btd->bst"}> : () -> ()
    %cst_103 = arith.constant dense<0.000000e+00> : vector<2x8x8xf32>
    %340 = tpu.matmul %333, %339, %cst_103 {dimension_numbers = #tpu.dot_dimension_numbers<[2], [2], [1], [1], [0, 0, 0, 1, 1, 1], [0], [0]>} : vector<2x8x8xf32>, vector<2x8x8xf32>, vector<2x8x8xf32> -> vector<2x8x8xf32>
    "tpu.trace_stop"() : () -> ()
    %cst_104 = arith.constant 0.353553385 : f32
    %341 = vector.broadcast %cst_104 : f32 to vector<2x8x8xf32>
    %342 = arith.mulf %340, %341 : vector<2x8x8xf32>
    %343 = arith.addf %342, %13 : vector<2x8x8xf32>
    %cst_105 = arith.constant dense<0xFF800000> : vector<2x8xf32>
    %344 = vector.multi_reduction <maximumf>, %343, %cst_105 [2] : vector<2x8x8xf32> to vector<2x8xf32>
    %345 = vector.shape_cast %344 : vector<2x8xf32> to vector<2x8x1xf32>
    %346 = vector.broadcast %345 : vector<2x8x1xf32> to vector<2x8x8xf32>
    %347 = arith.subf %343, %346 : vector<2x8x8xf32>
    %348 = math.exp %347 : vector<2x8x8xf32>
    %cst_106 = arith.constant dense<0.000000e+00> : vector<2x8xf32>
    %349 = vector.multi_reduction <add>, %348, %cst_106 [2] : vector<2x8x8xf32> to vector<2x8xf32>
    %350 = vector.shape_cast %349 : vector<2x8xf32> to vector<2x8x1xf32>
    %351 = vector.broadcast %350 : vector<2x8x1xf32> to vector<2x8x8xf32>
    %352 = arith.divf %348, %351 : vector<2x8x8xf32>
    "tpu.trace_start"() <{level = 10 : i32, message = "bst,btd->bsd"}> : () -> ()
    %cst_107 = arith.constant dense<0.000000e+00> : vector<2x8x8xf32>
    %353 = tpu.matmul %352, %327, %cst_107 {dimension_numbers = #tpu.dot_dimension_numbers<[2], [1], [1], [2], [0, 0, 0, 1, 1, 2], [0], [0]>} : vector<2x8x8xf32>, vector<2x8x8xf32>, vector<2x8x8xf32> -> vector<2x8x8xf32>
    "tpu.trace_stop"() : () -> ()
    %354 = vector.shape_cast %353 : vector<2x8x8xf32> to vector<16x8xf32>
    %355 = tpu.concatenate %255, %288, %321, %354 in 1 : vector<16x8xf32>, vector<16x8xf32>, vector<16x8xf32>, vector<16x8xf32> -> vector<16x32xf32>
    %c1_108 = arith.constant 1 : index
    %c0_109 = arith.constant 0 : index
    %c0_110 = arith.constant 0 : index
    %356 = vector.load %arg5[%c1_108, %c0_109, %c0_110] : memref<2x32x32xf32, #tpu.memory_space<vmem>>, vector<1x32x32xf32>
    %357 = vector.shape_cast %356 : vector<1x32x32xf32> to vector<32x32xf32>
    %cst_111 = arith.constant dense<0.000000e+00> : vector<16x32xf32>
    %358 = tpu.matmul %355, %357, %cst_111 {dimension_numbers = #tpu.dot_dimension_numbers<[1], [0], [0], [1], [0, 0, 1, 1], [], []>} : vector<16x32xf32>, vector<32x32xf32>, vector<16x32xf32> -> vector<16x32xf32>
    %359 = arith.addf %205, %358 : vector<16x32xf32>
    %360 = arith.mulf %359, %359 : vector<16x32xf32>
    %cst_112 = arith.constant dense<0.000000e+00> : vector<16xf32>
    %361 = vector.multi_reduction <add>, %360, %cst_112 [1] : vector<16x32xf32> to vector<16xf32>
    %362 = vector.shape_cast %361 : vector<16xf32> to vector<16x1xf32>
    %cst_113 = arith.constant 3.200000e+01 : f32
    %363 = vector.broadcast %cst_113 : f32 to vector<16x1xf32>
    %364 = arith.divf %362, %363 : vector<16x1xf32>
    %cst_114 = arith.constant 9.99999997E-7 : f32
    %365 = vector.broadcast %cst_114 : f32 to vector<16x1xf32>
    %366 = arith.addf %364, %365 : vector<16x1xf32>
    %367 = math.rsqrt %366 : vector<16x1xf32>
    %368 = vector.broadcast %367 : vector<16x1xf32> to vector<16x32xf32>
    %369 = arith.mulf %359, %368 : vector<16x32xf32>
    %c1_115 = arith.constant 1 : index
    %c0_116 = arith.constant 0 : index
    %c0_117 = arith.constant 0 : index
    %370 = vector.load %arg9[%c1_115, %c0_116, %c0_117] : memref<2x1x32xf32, #tpu.memory_space<vmem>>, vector<1x1x32xf32>
    %371 = vector.shape_cast %370 : vector<1x1x32xf32> to vector<1x32xf32>
    %372 = vector.broadcast %371 : vector<1x32xf32> to vector<16x32xf32>
    %373 = arith.mulf %369, %372 : vector<16x32xf32>
    %c1_118 = arith.constant 1 : index
    %c0_119 = arith.constant 0 : index
    %c0_120 = arith.constant 0 : index
    %374 = vector.load %arg6[%c1_118, %c0_119, %c0_120] : memref<2x32x128xf32, #tpu.memory_space<vmem>>, vector<1x32x128xf32>
    %375 = vector.shape_cast %374 : vector<1x32x128xf32> to vector<32x128xf32>
    %cst_121 = arith.constant dense<0.000000e+00> : vector<16x128xf32>
    %376 = tpu.matmul %373, %375, %cst_121 {dimension_numbers = #tpu.dot_dimension_numbers<[1], [0], [0], [1], [0, 0, 1, 1], [], []>} : vector<16x32xf32>, vector<32x128xf32>, vector<16x128xf32> -> vector<16x128xf32>
    %377 = vector.extract_strided_slice %376 {offsets = [0, 0], sizes = [16, 64], strides = [1, 1]} : vector<16x128xf32> to vector<16x64xf32>
    %378 = vector.extract_strided_slice %376 {offsets = [0, 64], sizes = [16, 64], strides = [1, 1]} : vector<16x128xf32> to vector<16x64xf32>
    %379 = arith.negf %377 : vector<16x64xf32>
    %380 = math.exp %379 : vector<16x64xf32>
    %cst_122 = arith.constant 1.000000e+00 : f32
    %381 = vector.broadcast %cst_122 : f32 to vector<16x64xf32>
    %382 = arith.addf %381, %380 : vector<16x64xf32>
    %383 = arith.divf %381, %382 : vector<16x64xf32>
    %384 = arith.mulf %377, %383 : vector<16x64xf32>
    %385 = arith.mulf %384, %378 : vector<16x64xf32>
    %c1_123 = arith.constant 1 : index
    %c0_124 = arith.constant 0 : index
    %c0_125 = arith.constant 0 : index
    %386 = vector.load %arg7[%c1_123, %c0_124, %c0_125] : memref<2x64x32xf32, #tpu.memory_space<vmem>>, vector<1x64x32xf32>
    %387 = vector.shape_cast %386 : vector<1x64x32xf32> to vector<64x32xf32>
    %cst_126 = arith.constant dense<0.000000e+00> : vector<16x32xf32>
    %388 = tpu.matmul %385, %387, %cst_126 {dimension_numbers = #tpu.dot_dimension_numbers<[1], [0], [0], [1], [0, 0, 1, 1], [], []>} : vector<16x64xf32>, vector<64x32xf32>, vector<16x32xf32> -> vector<16x32xf32>
    %389 = arith.addf %359, %388 : vector<16x32xf32>
    %c0_127 = arith.constant 0 : index
    %c0_128 = arith.constant 0 : index
    %390 = vector.load %arg10[%c0_127, %c0_128] : memref<16x32xf32, #tpu.memory_space<vmem>>, vector<16x32xf32>
    tpu.vector_store %arg10[%c0_127, %c0_128], %389 {strides = array<i32>} : memref<16x32xf32, #tpu.memory_space<vmem>>, vector<16x32xf32>,
    return
  }
}

</mosaic_0001>

<bundles_post_ra>
// kernel: tpu_custom_call.1
= control target key start
LH: loop header
LB: loop body
LE: loop exit
PB: predicated region body
PF: predicated region fallthrough
CT: control target
= control target key end

     0   :  { %15 = vsyncpa [#allocation3], 0  ;;  %s6226_s0 = inlined_call_operand.hbm [shape: f32[16,32], index: 0, kind: input, shape index: {}]   ;;  %s6227_s1 = inlined_call_operand.vmem [shape: f32[2,1,8], index: 1, kind: input, shape index: {}]   ;;  %s6228_s2 = inlined_call_operand.hbm [shape: f32[2,8,8], index: 2, kind: input, shape index: {}]   ;;  %s6229_s3 = inlined_call_operand.hbm [shape: f32[2,8,8], index: 3, kind: input, shape index: {}]   ;;  %s6230_s4 = inlined_call_operand.vmem [shape: f32[2,32,96], index: 4, kind: input, shape index: {}]   ;;  %s6231_s5 = inlined_call_operand.vmem [shape: f32[2,32,32], index: 5, kind: input, shape index: {}]   ;;  %s6232_s6 = inlined_call_operand.vmem [shape: f32[2,32,128], index: 6, kind: input, shape index: {}]   ;;  %s6233_s7 = inlined_call_operand.vmem [shape: f32[2,64,32], index: 7, kind: input, shape index: {}]   ;;  %s6234_s8 = inlined_call_operand.vmem [shape: f32[2,1,32], index: 8, kind: input, shape index: {}]   ;;  %s6235_s9 = inlined_call_operand.vmem [shape: f32[2,1,32], index: 9, kind: input, shape index: {}]   ;;  %s6236_s10 = inlined_call_operand.hbm [shape: f32[16,32], index: 10, kind: output, shape index: {}]  }
   0x1   :  { %16 = vsyncpa [#allocation6], 0 }
   0x2   :  { %17 = vsyncpa [#allocation4], 0  ;;  %s5122_s13 = smov [#allocation5]   ;;  %s5123_s15 = smov [#allocation2]  }
   0x3   :  { %s37_s14 = sshll.u32 %s5122_s13, 4  ;;  %s23_s16 = sshll.u32 %s5123_s15, 4  ;;  %s38_s14 = int_to_ptr.vmem [resolvable:$true] %s37_s14  ;;  %s5210_s16 = int_to_ptr.vmem [resolvable:$true] %s23_s16 }
   0x4   :  { %s5028_s19 = scalar_lea.hbm %s6228_s2, 256 }
   0x5   :  { %p5029_p0 = scmp.ne.s32.totalorder %s6228_s2, %s5028_s19  ;;  %p5032_p1 = scmp.lt.u32.totalorder %s5028_s19, %s6228_s2 }
   0x7   :  { %p5034_p2 = pnand %p5032_p1, %p5029_p0 }
   0x9   :  { %5037 = shalt.err (!%p5034_p2)
}
   0xa   :  { %s5038_s24 = scalar_lea.vmem %s38_s14, 256  ;;  %p5043_p4 = scmp.lt.s32.totalorder %s38_s14, %s38_s14 }
   0xb   :  { %p5039_p3 = scmp.ne.s32.totalorder %s38_s14, %s5038_s24  ;;  %p5044_p5 = scmp.lt.s32.totalorder %s5038_s24, %s5038_s24 }
   0xd   :  { %p5045_p6 = por %p5044_p5, %p5043_p4 }
   0xf   :  { %p5046_p7 = pnand %p5045_p6, %p5039_p3 }
  0x11   :  { %5049 = shalt.err (!%p5046_p7)
}
  0x12   :  { %s6237_s25 = smov 128   ;;  %s5125_s26 = smov 8  }
  0x13   :  { %43 = dma.hbm_to_vmem [thread:$0]  %s6228_s2, 256, %s38_s14, [#allocation6], %s6237_s25, %s6237_s25, %s5125_s26  }
  0x14   :  { %s5050_s11 = scalar_lea.hbm %s6226_s0, 256 }
  0x15   :  { %p5051_p8 = scmp.ne.s32.totalorder %s6226_s0, %s5050_s11  ;;  %p5054_p9 = scmp.lt.u32.totalorder %s5050_s11, %s6226_s0 }
  0x17   :  { %p5056_p10 = pnand %p5054_p9, %p5051_p8 }
  0x19   :  { %5059 = shalt.err (!%p5056_p10)
}
  0x1a   :  { %s5060_s18 = scalar_lea.vmem %s5210_s16, 256  ;;  %p5065_p12 = scmp.lt.s32.totalorder %s5210_s16, %s5210_s16 }
  0x1b   :  { %p5061_p11 = scmp.ne.s32.totalorder %s5210_s16, %s5060_s18  ;;  %p5066_p13 = scmp.lt.s32.totalorder %s5060_s18, %s5060_s18 }
  0x1d   :  { %p5067_p0 = por %p5066_p13, %p5065_p12 }
  0x1f   :  { %p5068_p1 = pnand %p5067_p0, %p5061_p11 }
  0x21   :  { %5071 = shalt.err (!%p5068_p1)
}
  0x22   :  { %29 = dma.hbm_to_vmem [thread:$0]  %s6226_s0, 256, %s5210_s16, [#allocation3], %s6237_s25, %s6237_s25, %s5125_s26  }
  0x23   :  { %s5126_s19 = smov [#allocation7]   ;;  %s5072_s23 = scalar_lea.hbm %s6229_s3, 256 }
  0x24   :  { %s49_s20 = sshll.u32 %s5126_s19, 4  ;;  %p5073_p2 = scmp.ne.s32.totalorder %s6229_s3, %s5072_s23  ;;  %s50_s20 = int_to_ptr.vmem [resolvable:$true] %s49_s20 }
  0x25   :  { %p5076_p3 = scmp.lt.u32.totalorder %s5072_s23, %s6229_s3 }
  0x27   :  { %p5078_p4 = pnand %p5076_p3, %p5073_p2 }
  0x29   :  { %5081 = shalt.err (!%p5078_p4)
}
  0x2a   :  { %s5082_s30 = scalar_lea.vmem %s50_s20, 256  ;;  %p5087_p6 = scmp.lt.s32.totalorder %s50_s20, %s50_s20 }
  0x2b   :  { %p5083_p5 = scmp.ne.s32.totalorder %s50_s20, %s5082_s30  ;;  %p5088_p7 = scmp.lt.s32.totalorder %s5082_s30, %s5082_s30 }
  0x2d   :  { %p5089_p8 = por %p5088_p7, %p5087_p6 }
  0x2f   :  { %p5090_p9 = pnand %p5089_p8, %p5083_p5 }
  0x31   :  { %5093 = shalt.err (!%p5090_p9)
}
  0x32   :  { %55 = dma.hbm_to_vmem [thread:$0]  %s6229_s3, 256, %s50_s20, [#allocation6], %s6237_s25, %s6237_s25, %s5125_s26  }
  0x33   :  { %5116 = dma.done.wait [#allocation3], 256  }
  0x34   :  { %5117 = vsyncadd [#allocation3], 4294967040 }
  0x35   :  { %5118 = dma.done.wait [#allocation6], 512  }
  0x36   :  { %5119 = vsyncadd [#allocation6], 4294966784  ;;  %v77_v0 = vld [vmem:[#allocation2] sm:$0xff]  ;;  %vm114_vm0 = vcmask 261120   ;;  %v78_v1 = vld [vmem:[#allocation2 + $0x8] sm:$0xff]  ;;  %v79_v25 = vlaneseq  ;;  %v5127_v30 = vmov 0  }
  0x37   :  { %v112_v2 = vmul.f32 %v77_v0, %v77_v0  ;;  %v113_v3 = vmul.f32 %v78_v1, %v78_v1  ;;  %v139_v6 = vld [vmem:[%s6230_s4] sm:$0xff]  ;;  %v140_v7 = vld [vmem:[%s6230_s4 + $0x8] sm:$0xff]  ;;  %v141_v8 = vld [vmem:[%s6230_s4 + $0x10] sm:$0xff]  ;;  %v5129_v42 = vmov 1.0   ;;  %s5130_s24 = smov 4   ;;  %vm226_vm9 = vcmask 1047616  }
  0x38   :  { %v4815_v9 = vpack.c.bf16 %v140_v7, %v139_v6  ;;  %v142_v10 = vld [vmem:[%s6230_s4 + $0x18] sm:$0xff]  ;;  %v4337_v19 = vld [vmem:[%s6234_s8] ss:$0 sm:$0xff]  ;;  %v80_v26 = vshrl.u32 %v79_v25, 7  ;;  %v82_v27 = vand.u32 127, %v79_v25  ;;  %v109_v49 = vld [vmem:[#allocation7 + $0x8] sm:$0xff] }
  0x39   :  { %v115_v4 = vsel %vm114_vm0, %v112_v2, 0.0  ;;  %v118_v5 = vsel %vm114_vm0, %v113_v3, 0.0  ;;  %v4819_v11 = vpack.c.bf16 %v142_v10, %v141_v8  ;;  %v84_v28 = vld [vmem:[%s6227_s1] sm:$0x1]  ;;  %v85_v29 = vld [vmem:[%s6227_s1 + $0x1] sm:$0x1] }
  0x3a   :  { %116 = vadd.xlane.f32.xlu0 %v115_v4  ;;  %4816 = vmatprep.subr.bf16.mxu1 %v4815_v9  ;;  %vm86_vm1 = vcmp.gt.f32.partialorder %v84_v28, 0.5  ;;  %vm87_vm2 = vcmp.gt.f32.partialorder %v85_v29, 0.5  ;;  %vm83_vm3 = vcmp.le.s32.totalorder %v82_v27, %v80_v26  ;;  %v94_v33 = vsub.s32 0, %v80_v26  ;;  %s5128_s1 = smov 96   ;;  %v108_v44 = vld [vmem:[#allocation7] sm:$0xff]  ;;  %v5318_v52 = vld [vmem:[#allocation5] sm:$0xff] }
  0x3b   :  { %4818 = vmatpush3.bf16.msra.mxu1 %v4815_v9  ;;  %v90_v31 = vsel %vm86_vm1, 1, %v5127_v30  ;;  %v91_v32 = vsel %vm87_vm2, 1, %v5127_v30  ;;  %vm110_vm8 = vcmp.lt.s32.totalorder %v82_v27, 4  ;;  %s5131_s27 = smov 32   ;;  %s5132_s28 = smov 28   ;;  %vm5137_vm10 = vmmov 0  }
  0x3c   :  { %4820 = vmatprep.subr.bf16.mxu1 %v4819_v11  ;;  %v95_v34 = vrot.slane %v90_v31, %v94_v33  ;;  %v99_v35 = vrot.slane %v91_v32, %v94_v33  ;;  %v111_v43 = vsel %vm110_vm8, -1.0, %v5129_v42  ;;  %s5133_s29 = smov 124   ;;  %s5135_s30 = smov 88   ;;  %vm312_vm11 = vcmask 64512  }
  0x3d   :  { %s5136_s0 = smov 120   ;;  %s6238_s16 = smov 40   ;;  %vm1927_vm12 = vcmask 195584   ;;  %vm1924_vm13 = vcmask 130048   ;;  %vm2159_vm14 = vcmask 523264  }
  0x3e   :  { %119 = vadd.xlane.f32.xlu0 %v118_v5  ;;  %vm100_vm4 = vcmp.eq.s32.totalorder %v95_v34, 1  ;;  %vm101_vm5 = vcmp.eq.s32.totalorder %v99_v35, 1  ;;  %s5140_s11 = smov 36   ;;  %s5141_s12 = smov 64  }
  0x3f   :  { %4822 = vmatpush3.bf16.msra.mxu1 %v4819_v11  ;;  %vm5289_vm6 = vmand %vm83_vm3, %vm100_vm4  ;;  %v5134_v11 = vmov 0.0   ;;  %s5142_s3 = smov 80   ;;  %s5143_s13 = smov 112  }
  0x40   :  { %vm5295_vm7 = vmand %vm83_vm3, %vm101_vm5  ;;  %4562 = vmatprep.subr.mxu1 %v5134_v11  ;;  %4572 = vmatprep.subr.mxu0 %v5134_v11  ;;  %s6242_s15 = smov 48   ;;  %s5145_s17 = smov 44  }
  0x41   :  { %4574 = vmatprep.mubr.msk.f32.mxu0 %vm5137_vm10, %v5134_v11  ;;  %s6240_s18 = smov 16   ;;  %s5147_s2 = smov 12  }
  0x42   :  { %s5148_s14 = smov 56   ;;  %s6252_s19 = smov 72  }
  0x43   :  { %s6248_s20 = smov 104   ;;  %s6246_s21 = smov 52  }
  0x44   :  { %s6250_s22 = smov 24   ;;  %s6244_s23 = smov 20  }
  0xc7   :  { %v117_v12 = vpop.xlane.xlu0 %116 }
  0xc8   :  { %v122_v13 = vmul.f32 0.03125, %v117_v12 }
  0xca   :  { %v124_v14 = vadd.f32 1e-06, %v122_v13 }
  0xcb   :  { %v120_v15 = vpop.xlane.xlu0 %119 }
  0xcc   :  { %4928 = vrsqrt.f32 %v124_v14  ;;  %v123_v16 = vmul.f32 0.03125, %v120_v15 }
  0xce   :  { %v125_v17 = vadd.f32 1e-06, %v123_v16 }
  0xd0   :  { %4930 = vrsqrt.f32 %v125_v17 }
  0xd6   :  { %v4929_v18 = vpop.eup %4928 }
  0xd7   :  { %v128_v20 = vmul.f32 %v4929_v18, %v77_v0 }
  0xd9   :  { %v137_v21 = vmul.f32 %v4337_v19, %v128_v20 }
  0xda   :  { %v4931_v22 = vpop.eup %4930 }
  0xdb   :  { %v129_v23 = vmul.f32 %v4931_v22, %v78_v1  ;;  %4559 = vmatprep.mubr.msk.f32.mxu1 %vm114_vm0, %v137_v21  ;;  %v5337_v1 = vld [vmem:[#allocation5 + $0x8] sm:$0xff] }
  0xdd   :  { %v138_v24 = vmul.f32 %v4337_v19, %v129_v23 }
  0xdf   :  { %4560 = vmatmul.mubr.msk.f32.vlgmr.msra.gmra.mrb[0].mxu1 %vm114_vm0, %v138_v24 }
  0xe0   :  { %4564 = vmatprep.mubr.msk.f32.mxu1 %vm5137_vm10, %v5134_v11 }
 0x1b2   :  { %v5287_v36 = vpop.f32.mrb[0].mxu1 }
 0x1b3   :  { %v5293_v38 = vpop.f32.mrb[1].mxu1  ;;  %v225_v27 = vmul.f32 %v5287_v36, %v5337_v1 }
 0x1b4   :  { %277 = vrot.lane.b32.xlu1 %v5293_v38, %s5128_s1  ;;  %v224_v24 = vmul.f32 %v5293_v38, %v5318_v52 }
 0x1b8   :  { %279 = vrot.lane.b32.xlu1 %v5287_v36, %s5128_s1 }
 0x226   :  { %v278_v40 = vpop.permute.xlu1 %277 }
 0x227   :  { %283 = vrot.lane.b32.xlu0 %v278_v40, %s5125_s26 }
 0x22a   :  { %v280_v41 = vpop.permute.xlu1 %279 }
 0x22b   :  { %230 = vrot.lane.b32.xlu0 %v5287_v36, %s5125_s26  ;;  %286 = vrot.lane.b32.xlu1 %v280_v41, %s5125_s26 }
 0x22f   :  { %240 = vrot.lane.b32.xlu1 %v111_v43, %s5130_s24 }
 0x233   :  { %227 = vrot.lane.b32.xlu1 %v5293_v38, %s5125_s26 }
 0x237   :  { %247 = vrot.lane.b32.xlu1 %v108_v44, %s5130_s24  ;;  %v5138_v44 = vmov -1e+30  }
 0x299   :  { %v284_v45 = vpop.permute.xlu0 %283 }
 0x29a   :  { %v285_v46 = vsel %vm226_vm9, %v284_v45, %v278_v40  ;;  %v5404_v45 = vsel %vm5289_vm6, 0.0, %v5138_v44 }
 0x29b   :  { %289 = vrot.lane.b32.xlu1 %v285_v46, %s5125_s26 }
 0x29d   :  { %v287_v47 = vpop.permute.xlu1 %286  ;;  %v231_v54 = vpop.permute.xlu0 %230 }
 0x29e   :  { %v288_v48 = vsel %vm226_vm9, %v287_v47, %v280_v41  ;;  %v232_v55 = vsel %vm226_vm9, %v231_v54, %v5287_v36 }
 0x29f   :  { %291 = vrot.lane.b32.xlu1 %v288_v48, %s5125_s26 }
 0x2a1   :  { %v5315_v50 = vpop.permute.xlu1 %240 }
 0x2a3   :  { %249 = vrot.lane.b32.xlu1 %v109_v49, %s5130_s24 }
 0x2a5   :  { %v228_v51 = vpop.permute.xlu1 %227 }
 0x2a6   :  { %v229_v53 = vsel %vm226_vm9, %v228_v51, %v5293_v38 }
 0x2a7   :  { %267 = vrot.lane.b32.xlu1 %v5318_v52, %s5131_s27  ;;  %233 = vrot.lane.b32.xlu0 %v229_v53, %s5125_s26  ;;  %v5410_v53 = vsel %vm5295_vm7, 0.0, %v5138_v44 }
 0x2a9   :  { %v5327_v56 = vpop.permute.xlu1 %247 }
 0x2ab   :  { %235 = vrot.lane.b32.xlu1 %v232_v55, %s5125_s26 }
 0x30d   :  { %v290_v57 = vpop.permute.xlu1 %289 }
 0x30e   :  { %v293_v58 = vsel %vm226_vm9, %v290_v57, %v278_v40 }
 0x30f   :  { %v295_v59 = vmul.f32 %v293_v58, %v5315_v50 }
 0x311   :  { %v292_v60 = vpop.permute.xlu1 %291  ;;  %v297_v61 = vmul.f32 %v295_v59, %v5327_v56 }
 0x312   :  { %v294_v62 = vsel %vm226_vm9, %v292_v60, %v280_v41 }
 0x313   :  { %v296_v63 = vmul.f32 %v294_v62, %v5315_v50  ;;  %301 = vrot.lane.b32.xlu0 %v297_v61, %s5132_s28 }
 0x315   :  { %v5335_v0 = vpop.permute.xlu1 %249 }
 0x316   :  { %v298_v2 = vmul.f32 %v296_v63, %v5335_v0 }
 0x317   :  { %269 = vrot.lane.b32.xlu0 %v5337_v1, %s5131_s27 }
 0x318   :  { %303 = vrot.lane.b32.xlu1 %v298_v2, %s5132_s28 }
 0x319   :  { %v234_v3 = vpop.permute.xlu0 %233  ;;  %v5342_v4 = vpop.permute.xlu1 %267 }
 0x31a   :  { %v237_v5 = vsel %vm226_vm9, %v234_v3, %v5293_v38  ;;  %v273_v13 = vmul.f32 %v5342_v4, %v5293_v38 }
 0x31b   :  { %v243_v6 = vmul.f32 %v5315_v50, %v237_v5 }
 0x31d   :  { %v236_v7 = vpop.permute.xlu1 %235  ;;  %v253_v8 = vmul.f32 %v5327_v56, %v243_v6 }
 0x31e   :  { %v238_v9 = vsel %vm226_vm9, %v236_v7, %v5287_v36 }
 0x31f   :  { %v244_v10 = vmul.f32 %v5315_v50, %v238_v9  ;;  %257 = vrot.lane.b32.xlu1 %v253_v8, %s5133_s29 }
 0x321   :  { %v254_v12 = vmul.f32 %v5335_v0, %v244_v10 }
 0x323   :  { %259 = vrot.lane.b32.xlu1 %v254_v12, %s5133_s29 }
 0x327   :  { %694 = vrot.lane.b32.xlu1 %v5287_v36, %s5135_s30 }
 0x32b   :  { %654 = vrot.lane.b32.xlu1 %v5287_v36, %s5136_s0 }
 0x385   :  { %v302_v14 = vpop.permute.xlu0 %301 }
 0x386   :  { %v307_v15 = vadd.f32 %v302_v14, %v273_v13 }
 0x388   :  { %310 = vrot.lane.b32.xlu0 %v307_v15, %s5128_s1 }
 0x389   :  { %v5367_v16 = vpop.permute.xlu0 %269 }
 0x38a   :  { %v274_v17 = vmul.f32 %v5287_v36, %v5367_v16  ;;  %v304_v18 = vpop.permute.xlu1 %303 }
 0x38c   :  { %v308_v19 = vadd.f32 %v304_v18, %v274_v17 }
 0x38e   :  { %389 = vrot.lane.b32.xlu0 %v308_v19, %s5128_s1 }
 0x391   :  { %v258_v20 = vpop.permute.xlu1 %257 }
 0x392   :  { %692 = vrot.lane.b32.xlu0 %v5293_v38, %s5135_s30  ;;  %v263_v26 = vadd.f32 %v258_v20, %v224_v24 }
 0x395   :  { %v260_v21 = vpop.permute.xlu1 %259 }
 0x396   :  { %652 = vrot.lane.b32.xlu0 %v5293_v38, %s5136_s0  ;;  %v264_v29 = vadd.f32 %v260_v21, %v225_v27 }
 0x399   :  { %v695_v22 = vpop.permute.xlu1 %694 }
 0x39a   :  { %701 = vrot.lane.b32.xlu1 %v695_v22, %s5125_s26 }
 0x39d   :  { %v655_v23 = vpop.permute.xlu1 %654 }
 0x39e   :  { %661 = vrot.lane.b32.xlu1 %v655_v23, %s5125_s26 }
 0x3fa   :  { %v311_v25 = vpop.permute.xlu0 %310 }
 0x3fb   :  { %4563 = vmatpush3.xpose.msk.msra.mxu1 %vm312_vm11, %v311_v25 }
 0x3fc   :  { %4567 = vmatprep.subr.mxu1 %v5134_v11 }
 0x3fe   :  { %4565 = vmatmul.mubr.msk.f32.vlgmr.msra.gmra.mrb[2].mxu1 %vm312_vm11, %v263_v26 }
 0x3ff   :  { %4569 = vmatprep.mubr.msk.f32.mxu1 %vm5137_vm10, %v5134_v11 }
 0x400   :  { %v390_v28 = vpop.permute.xlu0 %389 }
 0x401   :  { %4568 = vmatpush3.xpose.msk.msra.mxu1 %vm312_vm11, %v390_v28 }
 0x402   :  { %4577 = vmatprep.subr.mxu1 %v5134_v11 }
 0x404   :  { %v693_v30 = vpop.permute.xlu0 %692  ;;  %4570 = vmatmul.mubr.msk.f32.vlgmr.msra.gmra.mrb[4].mxu1 %vm312_vm11, %v264_v29 }
 0x405   :  { %698 = vrot.lane.b32.xlu0 %v693_v30, %s5125_s26  ;;  %4579 = vmatprep.mubr.msk.f32.mxu1 %vm5137_vm10, %v5134_v11 }
 0x408   :  { %v653_v31 = vpop.permute.xlu0 %652 }
 0x409   :  { %658 = vrot.lane.b32.xlu0 %v653_v31, %s5125_s26 }
 0x40c   :  { %v702_v32 = vpop.permute.xlu1 %701 }
 0x40d   :  { %v703_v33 = vsel %vm226_vm9, %v702_v32, %v695_v22 }
 0x40e   :  { %706 = vrot.lane.b32.xlu1 %v703_v33, %s5125_s26 }
 0x410   :  { %v662_v34 = vpop.permute.xlu1 %661 }
 0x411   :  { %v663_v35 = vsel %vm226_vm9, %v662_v34, %v655_v23 }
 0x412   :  { %666 = vrot.lane.b32.xlu1 %v663_v35, %s5125_s26 }
 0x477   :  { %v699_v40 = vpop.permute.xlu0 %698 }
 0x478   :  { %v700_v41 = vsel %vm226_vm9, %v699_v40, %v693_v30 }
 0x479   :  { %704 = vrot.lane.b32.xlu0 %v700_v41, %s5125_s26 }
 0x47b   :  { %v659_v42 = vpop.permute.xlu0 %658 }
 0x47c   :  { %v660_v43 = vsel %vm226_vm9, %v659_v42, %v653_v31 }
 0x47d   :  { %664 = vrot.lane.b32.xlu0 %v660_v43, %s5125_s26 }
 0x480   :  { %v707_v59 = vpop.permute.xlu1 %706 }
 0x481   :  { %v709_v61 = vsel %vm226_vm9, %v707_v59, %v695_v22 }
 0x482   :  { %v711_v2 = vmul.f32 %v709_v61, %v5315_v50 }
 0x484   :  { %v667_v39 = vpop.permute.xlu1 %666  ;;  %v713_v9 = vmul.f32 %v711_v2, %v5335_v0 }
 0x485   :  { %v669_v7 = vsel %vm226_vm9, %v667_v39, %v655_v23 }
 0x486   :  { %v671_v10 = vmul.f32 %v669_v7, %v5315_v50 }
 0x488   :  { %v673_v13 = vmul.f32 %v671_v10, %v5335_v0 }
 0x4d1   :  { %v384_v46 = vpop.f32.mrb[2].mxu1 }
 0x4d2   :  { %v466_v47 = vmul.f32 0.35355338, %v384_v46  ;;  %v4566_v48 = vpop.f32.mrb[3].mxu1 }
 0x4d4   :  { %v468_v49 = vadd.f32 %v466_v47, %v5404_v45 }
 0x4d6   :  { %v470_v51 = vsel %vm312_vm11, %v468_v49, -inf }
 0x4d7   :  { %471 = vmax.xlane.f32.xlu0 %v470_v51  ;;  %v462_v54 = vpop.f32.mrb[4].mxu1 }
 0x4d8   :  { %v467_v55 = vmul.f32 0.35355338, %v462_v54  ;;  %v4571_v57 = vpop.f32.mrb[5].mxu1 }
 0x4da   :  { %v469_v58 = vadd.f32 %v467_v55, %v5410_v53 }
 0x4dc   :  { %v473_v37 = vsel %vm312_vm11, %v469_v58, -inf }
 0x4dd   :  { %474 = vmax.xlane.f32.xlu1 %v473_v37 }
 0x4eb   :  { %v705_v60 = vpop.permute.xlu0 %704 }
 0x4ec   :  { %v708_v62 = vsel %vm226_vm9, %v705_v60, %v693_v30 }
 0x4ed   :  { %v710_v63 = vmul.f32 %v708_v62, %v5315_v50  ;;  %684 = vrot.lane.b32.xlu0 %v5318_v52, %s6238_s16 }
 0x4ee   :  { %686 = vrot.lane.b32.xlu1 %v5337_v1, %s6238_s16 }
 0x4ef   :  { %v665_v3 = vpop.permute.xlu0 %664  ;;  %v712_v5 = vmul.f32 %v710_v63, %v5327_v56 }
 0x4f0   :  { %v668_v6 = vsel %vm226_vm9, %v665_v3, %v653_v31 }
 0x4f1   :  { %716 = vrot.lane.b32.xlu0 %v712_v5, %s5140_s11  ;;  %v670_v8 = vmul.f32 %v668_v6, %v5315_v50 }
 0x4f2   :  { %644 = vrot.lane.b32.xlu1 %v5318_v52, %s5125_s26 }
 0x4f3   :  { %v672_v12 = vmul.f32 %v670_v8, %v5327_v56 }
 0x4f5   :  { %718 = vrot.lane.b32.xlu0 %v713_v9, %s5140_s11 }
 0x4f6   :  { %646 = vrot.lane.b32.xlu1 %v5337_v1, %s5125_s26 }
 0x4f9   :  { %676 = vrot.lane.b32.xlu0 %v672_v12, %s5130_s24 }
 0x4fa   :  { %678 = vrot.lane.b32.xlu1 %v673_v13, %s5130_s24 }
 0x4fd   :  { %492 = vrot.lane.b32.xlu0 %v5293_v38, %s5141_s12 }
 0x4fe   :  { %568 = vrot.lane.b32.xlu1 %v5287_v36, %s5141_s12 }
 0x564   :  { %v472_v14 = vpop.xlane.xlu0 %471 }
 0x565   :  { %v476_v28 = vsub.f32 %v468_v49, %v472_v14 }
 0x567   :  { %v478_v31 = vmul.f32 1.442695, %v476_v28 }
 0x568   :  { %v5442_v15 = vpop.permute.xlu0 %684 }
 0x569   :  { %v690_v18 = vmul.f32 %v5442_v15, %v5293_v38  ;;  %4932 = vpow2.f32 %v478_v31 }
 0x56a   :  { %v475_v17 = vpop.xlane.xlu1 %474 }
 0x56b   :  { %v477_v33 = vsub.f32 %v469_v58, %v475_v17 }
 0x56c   :  { %v717_v19 = vpop.permute.xlu0 %716 }
 0x56d   :  { %v722_v20 = vadd.f32 %v717_v19, %v690_v18  ;;  %v480_v34 = vmul.f32 1.442695, %v477_v33 }
 0x56e   :  { %v5446_v21 = vpop.permute.xlu1 %686 }
 0x56f   :  { %v691_v22 = vmul.f32 %v5287_v36, %v5446_v21  ;;  %728 = vrot.lane.b32.xlu0 %v722_v20, %s5135_s30  ;;  %4934 = vpow2.f32 %v480_v34 }
 0x570   :  { %v719_v23 = vpop.permute.xlu0 %718 }
 0x571   :  { %v723_v24 = vadd.f32 %v719_v23, %v691_v22 }
 0x572   :  { %v5451_v25 = vpop.permute.xlu1 %644 }
 0x573   :  { %808 = vrot.lane.b32.xlu1 %v723_v24, %s5135_s30  ;;  %v4933_v35 = vpop.eup %4932  ;;  %v650_v43 = vmul.f32 %v5451_v25, %v5293_v38 }
 0x574   :  { %v677_v26 = vpop.permute.xlu0 %676  ;;  %v482_v40 = vsel %vm312_vm11, %v4933_v35, 0.0 }
 0x575   :  { %v682_v44 = vadd.f32 %v677_v26, %v650_v43 }
 0x576   :  { %v5454_v27 = vpop.permute.xlu1 %646 }
 0x577   :  { %v651_v46 = vmul.f32 %v5287_v36, %v5454_v27 }
 0x578   :  { %v493_v29 = vpop.permute.xlu0 %492 }
 0x579   :  { %4573 = vmatpush3.msra.mxu0 %v493_v29  ;;  %v4935_v41 = vpop.eup %4934 }
 0x57a   :  { %v679_v30 = vpop.permute.xlu1 %678  ;;  %4582 = vmatprep.subr.mxu0 %v5134_v11  ;;  %v485_v42 = vsel %vm312_vm11, %v4935_v41, 0.0 }
 0x57b   :  { %v683_v47 = vadd.f32 %v679_v30, %v651_v46 }
 0x57e   :  { %v569_v32 = vpop.permute.xlu1 %568 }
 0x57f   :  { %4578 = vmatpush3.msra.mxu1 %v569_v32 }
 0x580   :  { %4587 = vmatprep.subr.mxu1 %v5134_v11 }
 0x58e   :  { %483 = vadd.xlane.f32.xlu0 %v482_v40 }
 0x597   :  { %486 = vadd.xlane.f32.xlu1 %v485_v42 }
 0x5a4   :  { %725 = vrot.lane.b32.xlu0 %v682_v44, %s5136_s0 }
 0x5a8   :  { %1110 = vrot.lane.b32.xlu0 %v5293_v38, %s5142_s3  ;;  %805 = vrot.lane.b32.xlu1 %v683_v47, %s5136_s0 }
 0x5ac   :  { %1070 = vrot.lane.b32.xlu0 %v5293_v38, %s5143_s13  ;;  %1112 = vrot.lane.b32.xlu1 %v5287_v36, %s5142_s3 }
 0x5b0   :  { %1072 = vrot.lane.b32.xlu1 %v5287_v36, %s5143_s13 }
 0x5e1   :  { %v729_v48 = vpop.permute.xlu0 %728 }
 0x5e5   :  { %v809_v54 = vpop.permute.xlu1 %808 }
 0x61b   :  { %v484_v49 = vpop.xlane.xlu0 %483 }
 0x61c   :  { %4936 = vrcp.f32 %v484_v49 }
 0x61f   :  { %v726_v51 = vpop.permute.xlu0 %725 }
 0x623   :  { %v1111_v55 = vpop.permute.xlu0 %1110 }
 0x624   :  { %1116 = vrot.lane.b32.xlu0 %v1111_v55, %s5125_s26  ;;  %v487_v57 = vpop.xlane.xlu1 %486 }
 0x625   :  { %4938 = vrcp.f32 %v487_v57 }
 0x626   :  { %v4937_v58 = vpop.eup %4936 }
 0x627   :  { %v1071_v37 = vpop.permute.xlu0 %1070  ;;  %v489_v59 = vmul.f32 %v4937_v58, %v4933_v35 }
 0x628   :  { %1076 = vrot.lane.b32.xlu0 %v1071_v37, %s5125_s26  ;;  %v806_v60 = vpop.permute.xlu1 %805 }
 0x629   :  { %4575 = vmatmul.mubr.msk.f32.vlgmr.msra.gmra.mrb[0].mxu0 %vm312_vm11, %v489_v59 }
 0x62a   :  { %4583 = vmatpush3.xpose.msk.msra.mxu0 %vm312_vm11, %v729_v48  ;;  %4584 = vmatprep.mubr.msk.f32.mxu0 %vm5137_vm10, %v5134_v11 }
 0x62b   :  { %4592 = vmatprep.subr.mxu0 %v5134_v11 }
 0x62c   :  { %v1113_v61 = vpop.permute.xlu1 %1112 }
 0x62d   :  { %4585 = vmatmul.mubr.msk.f32.vlgmr.msra.gmra.mrb[2].mxu0 %vm312_vm11, %v726_v51  ;;  %1119 = vrot.lane.b32.xlu1 %v1113_v61, %s5125_s26 }
 0x62e   :  { %4594 = vmatprep.mubr.msk.f32.mxu0 %vm5137_vm10, %v5134_v11 }
 0x62f   :  { %v4939_v62 = vpop.eup %4938 }
 0x630   :  { %v1073_v63 = vpop.permute.xlu1 %1072  ;;  %v491_v39 = vmul.f32 %v4939_v62, %v4935_v41 }
 0x631   :  { %1079 = vrot.lane.b32.xlu1 %v1073_v63, %s5125_s26 }
 0x632   :  { %4580 = vmatmul.mubr.msk.f32.vlgmr.msra.gmra.mrb[6].mxu1 %vm312_vm11, %v491_v39 }
 0x633   :  { %4588 = vmatpush3.xpose.msk.msra.mxu1 %vm312_vm11, %v809_v54  ;;  %4589 = vmatprep.mubr.msk.f32.mxu1 %vm5137_vm10, %v5134_v11 }
 0x634   :  { %4597 = vmatprep.subr.mxu1 %v5134_v11 }
 0x636   :  { %4590 = vmatmul.mubr.msk.f32.vlgmr.msra.gmra.mrb[8].mxu1 %vm312_vm11, %v806_v60 }
 0x637   :  { %4599 = vmatprep.mubr.msk.f32.mxu1 %vm5137_vm10, %v5134_v11 }
 0x696   :  { %v1117_v2 = vpop.permute.xlu0 %1116 }
 0x697   :  { %v1118_v3 = vsel %vm226_vm9, %v1117_v2, %v1111_v55 }
 0x698   :  { %1122 = vrot.lane.b32.xlu0 %v1118_v3, %s5125_s26 }
 0x69a   :  { %v1077_v5 = vpop.permute.xlu0 %1076 }
 0x69b   :  { %v1078_v6 = vsel %vm226_vm9, %v1077_v5, %v1071_v37 }
 0x69c   :  { %1082 = vrot.lane.b32.xlu0 %v1078_v6, %s5125_s26 }
 0x69f   :  { %v1120_v7 = vpop.permute.xlu1 %1119 }
 0x6a0   :  { %v1121_v8 = vsel %vm226_vm9, %v1120_v7, %v1113_v61 }
 0x6a1   :  { %1124 = vrot.lane.b32.xlu1 %v1121_v8, %s5125_s26 }
 0x6a3   :  { %v1080_v9 = vpop.permute.xlu1 %1079 }
 0x6a4   :  { %v1081_v10 = vsel %vm226_vm9, %v1080_v9, %v1073_v63 }
 0x6a5   :  { %1084 = vrot.lane.b32.xlu1 %v1081_v10, %s5125_s26 }
 0x6fc   :  { %v5502_v12 = vpop.f32.mrb[0].mxu0 }
 0x6fd   :  { %v4576_v13 = vpop.f32.mrb[1].mxu0 }
 0x700   :  { %v800_v14 = vpop.f32.mrb[2].mxu0 }
 0x701   :  { %v884_v17 = vmul.f32 0.35355338, %v800_v14  ;;  %v4586_v18 = vpop.f32.mrb[3].mxu0 }
 0x703   :  { %v886_v19 = vadd.f32 %v884_v17, %v5404_v45 }
 0x705   :  { %v5505_v20 = vpop.f32.mrb[6].mxu1  ;;  %v888_v22 = vsel %vm312_vm11, %v886_v19, -inf }
 0x706   :  { %889 = vmax.xlane.f32.xlu0 %v888_v22  ;;  %v4581_v23 = vpop.f32.mrb[7].mxu1 }
 0x709   :  { %v880_v24 = vpop.f32.mrb[8].mxu1 }
 0x70a   :  { %v885_v26 = vmul.f32 0.35355338, %v880_v24  ;;  %v4591_v28 = vpop.f32.mrb[9].mxu1  ;;  %v1123_v31 = vpop.permute.xlu0 %1122 }
 0x70b   :  { %v1126_v32 = vsel %vm226_vm9, %v1123_v31, %v1111_v55 }
 0x70c   :  { %v887_v29 = vadd.f32 %v885_v26, %v5410_v53  ;;  %v1128_v34 = vmul.f32 %v1126_v32, %v5315_v50 }
 0x70e   :  { %v891_v30 = vsel %vm312_vm11, %v887_v29, -inf  ;;  %v1083_v40 = vpop.permute.xlu0 %1082  ;;  %v1130_v42 = vmul.f32 %v1128_v34, %v5327_v56 }
 0x70f   :  { %892 = vmax.xlane.f32.xlu1 %v891_v30  ;;  %v1086_v43 = vsel %vm226_vm9, %v1083_v40, %v1071_v37 }
 0x710   :  { %v1088_v46 = vmul.f32 %v1086_v43, %v5315_v50 }
 0x712   :  { %v1090_v51 = vmul.f32 %v1088_v46, %v5327_v56 }
 0x713   :  { %v1125_v33 = vpop.permute.xlu1 %1124 }
 0x714   :  { %v1127_v35 = vsel %vm226_vm9, %v1125_v33, %v1113_v61 }
 0x715   :  { %v1129_v41 = vmul.f32 %v1127_v35, %v5315_v50 }
 0x717   :  { %v1085_v44 = vpop.permute.xlu1 %1084  ;;  %v1131_v47 = vmul.f32 %v1129_v41, %v5335_v0 }
 0x718   :  { %v1087_v48 = vsel %vm226_vm9, %v1085_v44, %v1073_v63 }
 0x719   :  { %v1089_v49 = vmul.f32 %v1087_v48, %v5315_v50 }
 0x71b   :  { %v1091_v54 = vmul.f32 %v1089_v49, %v5335_v0 }
 0x71c   :  { %1102 = vrot.lane.b32.xlu0 %v5318_v52, %s6242_s15 }
 0x720   :  { %1134 = vrot.lane.b32.xlu0 %v1130_v42, %s5145_s17  ;;  %1104 = vrot.lane.b32.xlu1 %v5337_v1, %s6242_s15 }
 0x724   :  { %1136 = vrot.lane.b32.xlu0 %v1131_v47, %s5145_s17  ;;  %1062 = vrot.lane.b32.xlu1 %v5318_v52, %s6240_s18 }
 0x728   :  { %1094 = vrot.lane.b32.xlu0 %v1090_v51, %s5147_s2  ;;  %1064 = vrot.lane.b32.xlu1 %v5337_v1, %s6240_s18 }
 0x72c   :  { %910 = vrot.lane.b32.xlu0 %v5293_v38, %s5148_s14  ;;  %1096 = vrot.lane.b32.xlu1 %v1091_v54, %s5147_s2 }
 0x730   :  { %986 = vrot.lane.b32.xlu1 %v5287_v36, %s5148_s14 }
 0x793   :  { %v890_v55 = vpop.xlane.xlu0 %889 }
 0x794   :  { %v894_v5 = vsub.f32 %v886_v19, %v890_v55 }
 0x796   :  { %v896_v8 = vmul.f32 1.442695, %v894_v5 }
 0x797   :  { %v5538_v57 = vpop.permute.xlu0 %1102 }
 0x798   :  { %v1108_v58 = vmul.f32 %v5538_v57, %v5293_v38  ;;  %4940 = vpow2.f32 %v896_v8 }
 0x79b   :  { %v1135_v37 = vpop.permute.xlu0 %1134 }
 0x79c   :  { %v1140_v59 = vadd.f32 %v1135_v37, %v1108_v58  ;;  %v893_v60 = vpop.xlane.xlu1 %892 }
 0x79d   :  { %v895_v13 = vsub.f32 %v887_v29, %v893_v60 }
 0x79e   :  { %1146 = vrot.lane.b32.xlu0 %v1140_v59, %s5142_s3 }
 0x79f   :  { %v1137_v61 = vpop.permute.xlu0 %1136  ;;  %v898_v14 = vmul.f32 1.442695, %v895_v13 }
 0x7a0   :  { %v5543_v62 = vpop.permute.xlu1 %1104 }
 0x7a1   :  { %v1109_v63 = vmul.f32 %v5287_v36, %v5543_v62  ;;  %4942 = vpow2.f32 %v898_v14 }
 0x7a2   :  { %v4941_v17 = vpop.eup %4940 }
 0x7a3   :  { %v1095_v39 = vpop.permute.xlu0 %1094  ;;  %v1141_v2 = vadd.f32 %v1137_v61, %v1109_v63  ;;  %v900_v18 = vsel %vm312_vm11, %v4941_v17, 0.0 }
 0x7a4   :  { %v5547_v3 = vpop.permute.xlu1 %1062 }
 0x7a5   :  { %1226 = vrot.lane.b32.xlu1 %v1141_v2, %s5142_s3  ;;  %v1068_v23 = vmul.f32 %v5547_v3, %v5293_v38 }
 0x7a7   :  { %v911_v6 = vpop.permute.xlu0 %910  ;;  %v1100_v24 = vadd.f32 %v1095_v39, %v1068_v23 }
 0x7a8   :  { %4593 = vmatpush3.msra.mxu0 %v911_v6  ;;  %v5550_v7 = vpop.permute.xlu1 %1064 }
 0x7a9   :  { %4602 = vmatprep.subr.mxu0 %v5134_v11  ;;  %v1069_v26 = vmul.f32 %v5287_v36, %v5550_v7 }
 0x7ab   :  { %v4943_v19 = vpop.eup %4942 }
 0x7ac   :  { %v1097_v9 = vpop.permute.xlu1 %1096  ;;  %v903_v22 = vsel %vm312_vm11, %v4943_v19, 0.0 }
 0x7ad   :  { %v1101_v28 = vadd.f32 %v1097_v9, %v1069_v26 }
 0x7b0   :  { %v987_v10 = vpop.permute.xlu1 %986 }
 0x7b1   :  { %4598 = vmatpush3.msra.mxu1 %v987_v10 }
 0x7b2   :  { %4607 = vmatprep.subr.mxu1 %v5134_v11 }
 0x7bd   :  { %901 = vadd.xlane.f32.xlu0 %v900_v18 }
 0x7c9   :  { %904 = vadd.xlane.f32.xlu1 %v903_v22 }
 0x7d3   :  { %1143 = vrot.lane.b32.xlu0 %v1100_v24, %s5143_s13 }
 0x7d7   :  { %1528 = vrot.lane.b32.xlu0 %v5293_v38, %s6252_s19 }
 0x7da   :  { %1223 = vrot.lane.b32.xlu1 %v1101_v28, %s5143_s13 }
 0x7db   :  { %1488 = vrot.lane.b32.xlu0 %v5293_v38, %s6248_s20 }
 0x7de   :  { %1530 = vrot.lane.b32.xlu1 %v5287_v36, %s6252_s19 }
 0x7e2   :  { %1490 = vrot.lane.b32.xlu1 %v5287_v36, %s6248_s20 }
 0x810   :  { %v1147_v29 = vpop.permute.xlu0 %1146 }
 0x817   :  { %v1227_v32 = vpop.permute.xlu1 %1226 }
 0x84a   :  { %v902_v30 = vpop.xlane.xlu0 %901 }
 0x84b   :  { %4944 = vrcp.f32 %v902_v30 }
 0x84e   :  { %v1144_v31 = vpop.permute.xlu0 %1143 }
 0x852   :  { %v1529_v33 = vpop.permute.xlu0 %1528 }
 0x853   :  { %1534 = vrot.lane.b32.xlu0 %v1529_v33, %s5125_s26 }
 0x855   :  { %v4945_v34 = vpop.eup %4944 }
 0x856   :  { %v1489_v35 = vpop.permute.xlu0 %1488  ;;  %v905_v40 = vpop.xlane.xlu1 %904  ;;  %v907_v41 = vmul.f32 %v4945_v34, %v4941_v17 }
 0x857   :  { %4946 = vrcp.f32 %v905_v40  ;;  %1494 = vrot.lane.b32.xlu0 %v1489_v35, %s5125_s26 }
 0x858   :  { %4595 = vmatmul.mubr.msk.f32.vlgmr.msra.gmra.mrb[4].mxu0 %vm312_vm11, %v907_v41 }
 0x859   :  { %4603 = vmatpush3.xpose.msk.msra.mxu0 %vm312_vm11, %v1147_v29  ;;  %4604 = vmatprep.mubr.msk.f32.mxu0 %vm5137_vm10, %v5134_v11 }
 0x85a   :  { %v1224_v42 = vpop.permute.xlu1 %1223  ;;  %4612 = vmatprep.subr.mxu0 %v5134_v11 }
 0x85c   :  { %4605 = vmatmul.mubr.msk.f32.vlgmr.msra.gmra.mrb[6].mxu0 %vm312_vm11, %v1144_v31 }
 0x85d   :  { %4614 = vmatprep.mubr.msk.f32.mxu0 %vm5137_vm10, %v5134_v11 }
 0x85e   :  { %v1531_v43 = vpop.permute.xlu1 %1530 }
 0x85f   :  { %1537 = vrot.lane.b32.xlu1 %v1531_v43, %s5125_s26 }
 0x861   :  { %v4947_v44 = vpop.eup %4946 }
 0x862   :  { %v1491_v46 = vpop.permute.xlu1 %1490  ;;  %v909_v47 = vmul.f32 %v4947_v44, %v4943_v19 }
 0x863   :  { %1497 = vrot.lane.b32.xlu1 %v1491_v46, %s5125_s26 }
 0x864   :  { %4600 = vmatmul.mubr.msk.f32.vlgmr.msra.gmra.mrb[10].mxu1 %vm312_vm11, %v909_v47 }
 0x865   :  { %4608 = vmatpush3.xpose.msk.msra.mxu1 %vm312_vm11, %v1227_v32  ;;  %4609 = vmatprep.mubr.msk.f32.mxu1 %vm5137_vm10, %v5134_v11 }
 0x866   :  { %4617 = vmatprep.subr.mxu1 %v5134_v11 }
 0x868   :  { %4610 = vmatmul.mubr.msk.f32.vlgmr.msra.gmra.mrb[12].mxu1 %vm312_vm11, %v1224_v42 }
 0x869   :  { %4619 = vmatprep.mubr.msk.f32.mxu1 %vm5137_vm10, %v5134_v11 }
 0x8c5   :  { %v1535_v48 = vpop.permute.xlu0 %1534 }
 0x8c6   :  { %v1536_v49 = vsel %vm226_vm9, %v1535_v48, %v1529_v33 }
 0x8c7   :  { %1540 = vrot.lane.b32.xlu0 %v1536_v49, %s5125_s26 }
 0x8c9   :  { %v1495_v51 = vpop.permute.xlu0 %1494 }
 0x8ca   :  { %v1496_v54 = vsel %vm226_vm9, %v1495_v51, %v1489_v35 }
 0x8cb   :  { %1500 = vrot.lane.b32.xlu0 %v1496_v54, %s5125_s26 }
 0x8d1   :  { %v1538_v55 = vpop.permute.xlu1 %1537 }
 0x8d2   :  { %v1539_v58 = vsel %vm226_vm9, %v1538_v55, %v1531_v43 }
 0x8d3   :  { %1542 = vrot.lane.b32.xlu1 %v1539_v58, %s5125_s26 }
 0x8d5   :  { %v1498_v37 = vpop.permute.xlu1 %1497 }
 0x8d6   :  { %v1499_v59 = vsel %vm226_vm9, %v1498_v37, %v1491_v46 }
 0x8d7   :  { %1502 = vrot.lane.b32.xlu1 %v1499_v59, %s5125_s26 }
 0x92b   :  { %v5598_v60 = vpop.f32.mrb[4].mxu0 }
 0x92c   :  { %v4596_v61 = vpop.f32.mrb[5].mxu0 }
 0x92f   :  { %v1218_v63 = vpop.f32.mrb[6].mxu0 }
 0x930   :  { %v1302_v39 = vmul.f32 0.35355338, %v1218_v63  ;;  %v4606_v2 = vpop.f32.mrb[7].mxu0 }
 0x932   :  { %v1304_v5 = vadd.f32 %v1302_v39, %v5404_v45 }
 0x934   :  { %v1306_v6 = vsel %vm312_vm11, %v1304_v5, -inf }
 0x935   :  { %1307 = vmax.xlane.f32.xlu0 %v1306_v6 }
 0x937   :  { %v5602_v8 = vpop.f32.mrb[10].mxu1 }
 0x938   :  { %v4601_v9 = vpop.f32.mrb[11].mxu1 }
 0x939   :  { %v1541_v19 = vpop.permute.xlu0 %1540 }
 0x93a   :  { %v1544_v22 = vsel %vm226_vm9, %v1541_v19, %v1529_v33 }
 0x93b   :  { %v1298_v10 = vpop.f32.mrb[12].mxu1  ;;  %v1546_v24 = vmul.f32 %v1544_v22, %v5315_v50 }
 0x93c   :  { %v1303_v13 = vmul.f32 0.35355338, %v1298_v10  ;;  %v4611_v14 = vpop.f32.mrb[13].mxu1 }
 0x93d   :  { %v1501_v28 = vpop.permute.xlu0 %1500  ;;  %v1548_v30 = vmul.f32 %v1546_v24, %v5327_v56 }
 0x93e   :  { %v1305_v17 = vadd.f32 %v1303_v13, %v5410_v53  ;;  %v1504_v31 = vsel %vm226_vm9, %v1501_v28, %v1489_v35 }
 0x93f   :  { %v1506_v32 = vmul.f32 %v1504_v31, %v5315_v50 }
 0x940   :  { %v1309_v18 = vsel %vm312_vm11, %v1305_v17, -inf }
 0x941   :  { %1310 = vmax.xlane.f32.xlu1 %v1309_v18  ;;  %v1508_v40 = vmul.f32 %v1506_v32, %v5327_v56 }
 0x945   :  { %v1543_v23 = vpop.permute.xlu1 %1542 }
 0x946   :  { %v1545_v26 = vsel %vm226_vm9, %v1543_v23, %v1531_v43 }
 0x947   :  { %v1547_v29 = vmul.f32 %v1545_v26, %v5315_v50 }
 0x949   :  { %v1549_v33 = vmul.f32 %v1547_v29, %v5335_v0  ;;  %v1503_v34 = vpop.permute.xlu1 %1502 }
 0x94a   :  { %v1505_v41 = vsel %vm226_vm9, %v1503_v34, %v1491_v46 }
 0x94b   :  { %1520 = vrot.lane.b32.xlu0 %v5318_v52, %s5148_s14  ;;  %v1507_v35 = vmul.f32 %v1505_v41, %v5315_v50 }
 0x94d   :  { %v1509_v42 = vmul.f32 %v1507_v35, %v5335_v0 }
 0x94f   :  { %1552 = vrot.lane.b32.xlu0 %v1548_v30, %s6246_s21 }
 0x952   :  { %1522 = vrot.lane.b32.xlu1 %v5337_v1, %s5148_s14 }
 0x953   :  { %1554 = vrot.lane.b32.xlu0 %v1549_v33, %s6246_s21 }
 0x956   :  { %1480 = vrot.lane.b32.xlu1 %v5318_v52, %s6250_s22 }
 0x957   :  { %1512 = vrot.lane.b32.xlu0 %v1508_v40, %s6244_s23 }
 0x95a   :  { %1482 = vrot.lane.b32.xlu1 %v5337_v1, %s6250_s22 }
 0x95b   :  { %1328 = vrot.lane.b32.xlu0 %v5293_v38, %s6242_s15 }
 0x95e   :  { %1514 = vrot.lane.b32.xlu1 %v1509_v42, %s6244_s23 }
 0x962   :  { %1404 = vrot.lane.b32.xlu1 %v5287_v36, %s6242_s15 }
 0x9c2   :  { %v1308_v43 = vpop.xlane.xlu0 %1307 }
 0x9c3   :  { %v1312_v58 = vsub.f32 %v1304_v5, %v1308_v43 }
 0x9c5   :  { %v1314_v61 = vmul.f32 1.442695, %v1312_v58 }
 0x9c6   :  { %v5634_v52 = vpop.permute.xlu0 %1520 }
 0x9c7   :  { %v1526_v44 = vmul.f32 %v5634_v52, %v5293_v38  ;;  %4948 = vpow2.f32 %v1314_v61 }
 0x9ca   :  { %v1553_v46 = vpop.permute.xlu0 %1552 }
 0x9cb   :  { %v1558_v47 = vadd.f32 %v1553_v46, %v1526_v44 }
 0x9cd   :  { %1564 = vrot.lane.b32.xlu0 %v1558_v47, %s6252_s19 }
 0x9ce   :  { %v1555_v1 = vpop.permute.xlu0 %1554  ;;  %v1311_v48 = vpop.xlane.xlu1 %1310 }
 0x9cf   :  { %v1313_v6 = vsub.f32 %v1305_v17, %v1311_v48 }
 0x9d1   :  { %v4949_v9 = vpop.eup %4948  ;;  %v1316_v5 = vmul.f32 1.442695, %v1313_v6 }
 0x9d2   :  { %v1513_v49 = vpop.permute.xlu0 %1512  ;;  %v5639_v51 = vpop.permute.xlu1 %1522  ;;  %v1318_v10 = vsel %vm312_vm11, %v4949_v9, 0.0 }
 0x9d3   :  { %v1527_v54 = vmul.f32 %v5287_v36, %v5639_v51  ;;  %4950 = vpow2.f32 %v1316_v5 }
 0x9d5   :  { %v1559_v55 = vadd.f32 %v1555_v1, %v1527_v54 }
 0x9d6   :  { %v1329_v37 = vpop.permute.xlu0 %1328  ;;  %v5643_v59 = vpop.permute.xlu1 %1480 }
 0x9d7   :  { %4613 = vmatpush3.msra.mxu0 %v1329_v37  ;;  %1644 = vrot.lane.b32.xlu1 %v1559_v55, %s6252_s19  ;;  %v1486_v18 = vmul.f32 %v5643_v59, %v5293_v38 }
 0x9d8   :  { %4622 = vmatprep.subr.mxu0 %v5134_v11 }
 0x9d9   :  { %v1518_v19 = vadd.f32 %v1513_v49, %v1486_v18 }
 0x9da   :  { %v5647_v63 = vpop.permute.xlu1 %1482 }
 0x9db   :  { %v1487_v22 = vmul.f32 %v5287_v36, %v5647_v63 }
 0x9dd   :  { %v4951_v13 = vpop.eup %4950 }
 0x9de   :  { %v1515_v39 = vpop.permute.xlu1 %1514  ;;  %v1321_v14 = vsel %vm312_vm11, %v4951_v13, 0.0 }
 0x9df   :  { %v1519_v17 = vadd.f32 %v1515_v39, %v1487_v22 }
 0x9e2   :  { %v1405_v2 = vpop.permute.xlu1 %1404 }
 0x9e3   :  { %4618 = vmatpush3.msra.mxu1 %v1405_v2 }
 0x9e4   :  { %4627 = vmatprep.subr.mxu1 %v5134_v11 }
 0x9ec   :  { %1319 = vadd.xlane.f32.xlu0 %v1318_v10 }
 0x9fb   :  { %1322 = vadd.xlane.f32.xlu1 %v1321_v14 }
 0xa02   :  { %1561 = vrot.lane.b32.xlu0 %v1518_v19, %s6248_s20 }
 0xa0c   :  { %1641 = vrot.lane.b32.xlu1 %v1519_v17, %s6248_s20 }
 0xa3f   :  { %v1565_v23 = vpop.permute.xlu0 %1564 }
 0xa49   :  { %v1645_v28 = vpop.permute.xlu1 %1644 }
 0xa79   :  { %v1320_v24 = vpop.xlane.xlu0 %1319 }
 0xa7a   :  { %4952 = vrcp.f32 %v1320_v24  ;;  %v1931_v24 = vld [vmem:[%s6231_s5 + $0x8] sm:$0xff] }
 0xa7d   :  { %v1562_v31 = vpop.permute.xlu0 %1561 }
 0xa84   :  { %v4953_v26 = vpop.eup %4952 }
 0xa85   :  { %v1325_v29 = vmul.f32 %v4953_v26, %v4949_v9  ;;  %v1932_v26 = vld [vmem:[%s6231_s5 + $0x10] sm:$0xff] }
 0xa87   :  { %4615 = vmatmul.mubr.msk.f32.vlgmr.msra.gmra.mrb[8].mxu0 %vm312_vm11, %v1325_v29  ;;  %v1933_v29 = vld [vmem:[%s6231_s5 + $0x18] sm:$0xff] }
 0xa88   :  { %4623 = vmatpush3.xpose.msk.msra.mxu0 %vm312_vm11, %v1565_v23  ;;  %v1323_v30 = vpop.xlane.xlu1 %1322  ;;  %4624 = vmatprep.mubr.msk.f32.mxu0 %vm5137_vm10, %v5134_v11 }
 0xa89   :  { %4954 = vrcp.f32 %v1323_v30  ;;  %4632 = vmatprep.subr.mxu0 %v5134_v11  ;;  %v4827_v30 = vpack.c.bf16 %v1933_v29, %v1932_v26 }
 0xa8b   :  { %4625 = vmatmul.mubr.msk.f32.vlgmr.msra.gmra.mrb[10].mxu0 %vm312_vm11, %v1562_v31 }
 0xa8c   :  { %4634 = vmatprep.mubr.msk.f32.mxu0 %vm5137_vm10, %v5134_v11  ;;  %v1642_v34 = vpop.permute.xlu1 %1641 }
 0xa93   :  { %v4955_v32 = vpop.eup %4954 }
 0xa94   :  { %v1327_v33 = vmul.f32 %v4955_v32, %v4951_v13 }
 0xa96   :  { %4620 = vmatmul.mubr.msk.f32.vlgmr.msra.gmra.mrb[14].mxu1 %vm312_vm11, %v1327_v33 }
 0xa97   :  { %4628 = vmatpush3.xpose.msk.msra.mxu1 %vm312_vm11, %v1645_v28  ;;  %4629 = vmatprep.mubr.msk.f32.mxu1 %vm5137_vm10, %v5134_v11 }
 0xa98   :  { %4637 = vmatprep.subr.mxu1 %v5134_v11 }
 0xa9a   :  { %4630 = vmatmul.mubr.msk.f32.vlgmr.msra.gmra.mrb[16].mxu1 %vm312_vm11, %v1642_v34 }
 0xa9b   :  { %4639 = vmatprep.mubr.msk.f32.mxu1 %vm5137_vm10, %v5134_v11 }
 0xb5a   :  { %v1400_v40 = vpop.f32.mrb[8].mxu0 }
 0xb5b   :  { %v4616_v41 = vpop.f32.mrb[9].mxu0 }
 0xb5e   :  { %v1636_v35 = vpop.f32.mrb[10].mxu0 }
 0xb5f   :  { %v1720_v42 = vmul.f32 0.35355338, %v1636_v35  ;;  %v4626_v43 = vpop.f32.mrb[11].mxu0 }
 0xb61   :  { %v1722_v44 = vadd.f32 %v1720_v42, %v5404_v45 }
 0xb63   :  { %v1724_v46 = vsel %vm312_vm11, %v1722_v44, -inf }
 0xb64   :  { %1725 = vmax.xlane.f32.xlu0 %v1724_v46 }
 0xb69   :  { %v1476_v47 = vpop.f32.mrb[14].mxu1 }
 0xb6a   :  { %v4621_v1 = vpop.f32.mrb[15].mxu1 }
 0xb6d   :  { %v1716_v48 = vpop.f32.mrb[16].mxu1 }
 0xb6e   :  { %v1721_v49 = vmul.f32 0.35355338, %v1716_v48  ;;  %v4631_v54 = vpop.f32.mrb[17].mxu1 }
 0xb70   :  { %v1723_v55 = vadd.f32 %v1721_v49, %v5410_v53 }
 0xb72   :  { %v1727_v58 = vsel %vm312_vm11, %v1723_v55, -inf }
 0xb73   :  { %1728 = vmax.xlane.f32.xlu1 %v1727_v58 }
 0xb84   :  { %1746 = vrot.lane.b32.xlu1 %v5293_v38, %s6238_s16 }
 0xb88   :  { %1900 = vrot.lane.b32.xlu1 %v5598_v60, %s5125_s26 }
 0xb8c   :  { %1902 = vrot.lane.b32.xlu1 %v5602_v8, %s5125_s26 }
 0xb90   :  { %1910 = vrot.lane.b32.xlu1 %v1476_v47, %s6240_s18 }
 0xbf1   :  { %v1726_v37 = vpop.xlane.xlu0 %1725 }
 0xbf2   :  { %v1730_v61 = vsub.f32 %v1722_v44, %v1726_v37 }
 0xbf4   :  { %v1732_v39 = vmul.f32 1.442695, %v1730_v61  ;;  %v5025_v61 = vld [vmem:[#allocation2] sm:$0xff] }
 0xbf6   :  { %4956 = vpow2.f32 %v1732_v39 }
 0xc00   :  { %v4957_v2 = vpop.eup %4956  ;;  %v1729_v6 = vpop.xlane.xlu1 %1728 }
 0xc01   :  { %v1731_v9 = vsub.f32 %v1723_v55, %v1729_v6  ;;  %v1736_v5 = vsel %vm312_vm11, %v4957_v2, 0.0  ;;  %v5024_v55 = vld [vmem:[#allocation2 + $0x8] sm:$0xff] }
 0xc02   :  { %1737 = vadd.xlane.f32.xlu0 %v1736_v5  ;;  %v2042_v5 = vld [vmem:[%s6232_s6] sm:$0xff] }
 0xc03   :  { %v1734_v10 = vmul.f32 1.442695, %v1731_v9 }
 0xc04   :  { %v1747_v38 = vpop.permute.xlu1 %1746 }
 0xc05   :  { %4958 = vpow2.f32 %v1734_v10  ;;  %4633 = vmatpush3.msra.mxu0 %v1747_v38  ;;  %v2043_v10 = vld [vmem:[%s6232_s6 + $0x8] sm:$0xff]  ;;  %v2044_v38 = vld [vmem:[%s6232_s6 + $0x10] sm:$0xff] }
 0xc0f   :  { %v4959_v60 = vpop.eup %4958 }
 0xc10   :  { %v1739_v13 = vsel %vm312_vm11, %v4959_v60, 0.0 }
 0xc11   :  { %1740 = vadd.xlane.f32.xlu0 %v1739_v13  ;;  %v2045_v13 = vld [vmem:[%s6232_s6 + $0x18] sm:$0xff] }
 0xc27   :  { %1822 = vrot.lane.b32.xlu0 %v5287_v36, %s6238_s16  ;;  %v1930_v36 = vld [vmem:[%s6231_s5] sm:$0xff] }
 0xc28   :  { %v4823_v28 = vpack.c.bf16 %v1931_v24, %v1930_v36 }
 0xc2a   :  { %4824 = vmatprep.subr.bf16.mxu0 %v4823_v28 }
 0xc2b   :  { %1908 = vrot.lane.b32.xlu0 %v1400_v40, %s6240_s18  ;;  %v1901_v40 = vpop.permute.xlu1 %1900 }
 0xc2c   :  { %v1922_v35 = vsel %vm312_vm11, %v5502_v12, %v1901_v40 }
 0xc2f   :  { %v1903_v46 = vpop.permute.xlu1 %1902 }
 0xc30   :  { %v1923_v1 = vsel %vm312_vm11, %v5505_v20, %v1903_v46  ;;  %v2157_v46 = vld [vmem:[%s6233_s7 + $0x30] sm:$0xff] }
 0xc33   :  { %v1911_v47 = vpop.permute.xlu1 %1910 }
 0xc34   :  { %v1926_v48 = vsel %vm1924_vm13, %v1923_v1, %v1911_v47  ;;  %v2158_v47 = vld [vmem:[%s6233_s7 + $0x38] sm:$0xff] }
 0xc35   :  { %v4851_v1 = vpack.c.bf16 %v2158_v47, %v2157_v46 }
 0xc8f   :  { %v1738_v8 = vpop.xlane.xlu0 %1737 }
 0xc90   :  { %4960 = vrcp.f32 %v1738_v8  ;;  %v4835_v8 = vpack.c.bf16 %v2045_v13, %v2044_v38 }
 0xc9a   :  { %v4961_v14 = vpop.eup %4960 }
 0xc9b   :  { %v1743_v18 = vmul.f32 %v4961_v14, %v4957_v2 }
 0xc9d   :  { %4635 = vmatmul.mubr.msk.f32.vlgmr.msra.gmra.mrb[12].mxu0 %vm312_vm11, %v1743_v18 }
 0xc9e   :  { %v1741_v19 = vpop.xlane.xlu0 %1740  ;;  %4826 = vmatpush3.bf16.msra.mxu0 %v4823_v28  ;;  %v4366_v28 = vld [vmem:[%s6235_s9] ss:$0 sm:$0xff] }
 0xc9f   :  { %4962 = vrcp.f32 %v1741_v19  ;;  %4828 = vmatprep.subr.bf16.mxu0 %v4827_v30 }
 0xca2   :  { %v1823_v22 = vpop.permute.xlu0 %1822  ;;  %4830 = vmatpush3.bf16.msra.mxu0 %v4827_v30 }
 0xca3   :  { %4638 = vmatpush3.msra.mxu1 %v1823_v22 }
 0xca6   :  { %v1909_v41 = vpop.permute.xlu0 %1908 }
 0xca7   :  { %v1925_v42 = vsel %vm1924_vm13, %v1922_v35, %v1909_v41  ;;  %v2154_v41 = vld [vmem:[%s6233_s7 + $0x18] sm:$0xff] }
 0xca9   :  { %v4963_v17 = vpop.eup %4962 }
 0xcaa   :  { %v1745_v23 = vmul.f32 %v4963_v17, %v4959_v60  ;;  %v4831_v60 = vpack.c.bf16 %v2043_v10, %v2042_v5 }
 0xcac   :  { %4640 = vmatmul.mubr.msk.f32.vlgmr.msra.gmra.mrb[18].mxu1 %vm312_vm11, %v1745_v23  ;;  %4832 = vmatprep.subr.bf16.mxu1 %v4831_v60 }
 0xcad   :  { %4834 = vmatpush3.bf16.msra.mxu1 %v4831_v60 }
 0xcae   :  { %4836 = vmatprep.subr.bf16.mxu1 %v4835_v8 }
 0xcb1   :  { %4838 = vmatpush3.bf16.msra.mxu1 %v4835_v8 }
 0xd70   :  { %v1818_v31 = vpop.f32.mrb[12].mxu0 }
 0xd71   :  { %1916 = vrot.lane.b32.xlu0 %v1818_v31, %s6250_s22  ;;  %v4636_v32 = vpop.f32.mrb[13].mxu0 }
 0xd72   :  { %v2151_v32 = vld [vmem:[%s6233_s7] sm:$0xff] }
 0xd7f   :  { %v1894_v33 = vpop.f32.mrb[18].mxu1 }
 0xd80   :  { %1918 = vrot.lane.b32.xlu1 %v1894_v33, %s6250_s22  ;;  %v4641_v34 = vpop.f32.mrb[19].mxu1  ;;  %v2152_v33 = vld [vmem:[%s6233_s7 + $0x8] sm:$0xff]  ;;  %s6265_s22 = smov 24  }
 0xd81   :  { %v2153_v34 = vld [vmem:[%s6233_s7 + $0x10] sm:$0xff]  ;;  %v4839_v40 = vpack.c.bf16 %v2152_v33, %v2151_v32 }
 0xd82   :  { %v4843_v35 = vpack.c.bf16 %v2154_v41, %v2153_v34 }
 0xd83   :  { %4840 = vmatprep.subr.bf16.mxu0 %v4839_v40 }
 0xde3   :  { %v1917_v43 = vpop.permute.xlu0 %1916 }
 0xde4   :  { %v1928_v44 = vsel %vm1927_vm12, %v1925_v42, %v1917_v43  ;;  %v2155_v42 = vld [vmem:[%s6233_s7 + $0x20] sm:$0xff]  ;;  %v2156_v43 = vld [vmem:[%s6233_s7 + $0x28] sm:$0xff] }
 0xde5   :  { %4650 = vmatprep.mubr.msk.f32.mxu0 %vm114_vm0, %v1928_v44  ;;  %v4847_v44 = vpack.c.bf16 %v2156_v43, %v2155_v42  ;;  %v4374_v43 = vld [vmem:[%s6234_s8 + $0x1] ss:$0 sm:$0xff]  ;;  %s6258_s8 = smov 72  }
 0xdf2   :  { %v1919_v49 = vpop.permute.xlu1 %1918 }
 0xdf3   :  { %v1929_v54 = vsel %vm1927_vm12, %v1926_v48, %v1919_v49 }
 0xdf4   :  { %4651 = vmatmul.mubr.msk.f32.vlgmr.msra.gmra.mrb[14].mxu0 %vm114_vm0, %v1929_v54 }
 0xdf5   :  { %4842 = vmatpush3.bf16.msra.mxu0 %v4839_v40 }
 0xdf6   :  { %4844 = vmatprep.subr.bf16.mxu0 %v4843_v35 }
 0xdf9   :  { %4846 = vmatpush3.bf16.msra.mxu0 %v4843_v35 }
 0xdfa   :  { %4848 = vmatprep.subr.bf16.mxu0 %v4847_v44 }
 0xdfd   :  { %4850 = vmatpush3.bf16.msra.mxu0 %v4847_v44 }
 0xdfe   :  { %4852 = vmatprep.subr.bf16.mxu0 %v4851_v1 }
 0xe01   :  { %4854 = vmatpush3.bf16.msra.mxu0 %v4851_v1 }
 0xe02   :  { %4704 = vmatprep.subr.mxu0 %v5134_v11 }
 0xec7   :  { %v4652_v12 = vpop.f32.mrb[14].mxu0 }
 0xec8   :  { %v5716_v58 = vadd.f32 %v5024_v55, %v4652_v12  ;;  %v2006_v37 = vpop.f32.mrb[15].mxu0 }
 0xec9   :  { %v5718_v39 = vadd.f32 %v5025_v61, %v2006_v37 }
 0xeca   :  { %v2018_v2 = vmul.f32 %v5716_v58, %v5716_v58 }
 0xecb   :  { %v2017_v20 = vmul.f32 %v5718_v39, %v5718_v39 }
 0xecc   :  { %v2022_v6 = vsel %vm114_vm0, %v2018_v2, 0.0 }
 0xecd   :  { %2023 = vadd.xlane.f32.xlu1 %v2022_v6  ;;  %v2019_v9 = vsel %vm114_vm0, %v2017_v20, 0.0 }
 0xece   :  { %2020 = vadd.xlane.f32.xlu0 %v2019_v9 }
 0xf5a   :  { %v2024_v14 = vpop.xlane.xlu1 %2023 }
 0xf5b   :  { %v2026_v18 = vmul.f32 0.03125, %v2024_v14  ;;  %v2021_v19 = vpop.xlane.xlu0 %2020 }
 0xf5c   :  { %v2025_v22 = vmul.f32 0.03125, %v2021_v19 }
 0xf5d   :  { %v2028_v17 = vadd.f32 1e-06, %v2026_v18 }
 0xf5e   :  { %v2027_v23 = vadd.f32 1e-06, %v2025_v22 }
 0xf5f   :  { %4964 = vrsqrt.f32 %v2028_v17 }
 0xf60   :  { %4966 = vrsqrt.f32 %v2027_v23 }
 0xf69   :  { %v4965_v36 = vpop.eup %4964 }
 0xf6a   :  { %v4967_v24 = vpop.eup %4966  ;;  %v2032_v26 = vmul.f32 %v4965_v36, %v5716_v58 }
 0xf6b   :  { %v2031_v29 = vmul.f32 %v4967_v24, %v5718_v39  ;;  %v4377_v24 = vld [vmem:[%s6230_s4 + $0x30] sm:$0xff] }
 0xf6c   :  { %v2041_v31 = vmul.f32 %v4366_v28, %v2032_v26 }
 0xf6d   :  { %v2040_v30 = vmul.f32 %v4366_v28, %v2031_v29  ;;  %v4378_v28 = vld [vmem:[%s6230_s4 + $0x38] sm:$0xff] }
 0xf6e   :  { %v4859_v29 = vpack.c.bf16 %v4378_v28, %v4377_v24 }
 0xf6f   :  { %4661 = vmatprep.mubr.msk.f32.mxu1 %vm114_vm0, %v2040_v30 }
 0xf70   :  { %4662 = vmatmul.mubr.msk.f32.vlgmr.msra.gmra.mrb[20].mxu1 %vm114_vm0, %v2041_v31 }
0x1043   :  { %v4663_v48 = vpop.f32.mrb[20].mxu1 }
0x1044   :  { %2145 = vrot.lane.b32.xlu1 %v4663_v48, %s5141_s12  ;;  %v2118_v49 = vpop.f32.mrb[21].mxu1  ;;  %v4370_v12 = vmul.f32 -1.442695, %v4663_v48 }
0x1045   :  { %2143 = vrot.lane.b32.xlu0 %v2118_v49, %s5141_s12  ;;  %v4369_v54 = vmul.f32 -1.442695, %v2118_v49 }
0x1047   :  { %4968 = vpow2.f32 %v4369_v54 }
0x1048   :  { %4970 = vpow2.f32 %v4370_v12 }
0x1051   :  { %v4969_v55 = vpop.eup %4968 }
0x1052   :  { %v4971_v37 = vpop.eup %4970  ;;  %v2133_v61 = vadd.f32 1.0, %v4969_v55 }
0x1053   :  { %v2134_v2 = vadd.f32 1.0, %v4971_v37 }
0x1054   :  { %4972 = vrcp.f32 %v2133_v61 }
0x1055   :  { %4974 = vrcp.f32 %v2134_v2 }
0x105e   :  { %v4973_v20 = vpop.eup %4972 }
0x105f   :  { %v4975_v6 = vpop.eup %4974  ;;  %v2139_v9 = vmul.f32 %v4973_v20, %v2118_v49 }
0x1060   :  { %v2140_v10 = vmul.f32 %v4975_v6, %v4663_v48 }
0x10b6   :  { %v2146_v5 = vpop.permute.xlu1 %2145 }
0x10b7   :  { %v2144_v38 = vpop.permute.xlu0 %2143  ;;  %v2150_v13 = vmul.f32 %v2146_v5, %v2140_v10 }
0x10b8   :  { %v2149_v60 = vmul.f32 %v2144_v38, %v2139_v9 }
0x10ba   :  { %4680 = vmatprep.mubr.msk.f32.mxu0 %vm2159_vm14, %v2149_v60 }
0x10bb   :  { %4681 = vmatmul.mubr.msk.f32.vlgmr.msra.gmra.mrb[16].mxu0 %vm2159_vm14, %v2150_v13 }
0x10bc   :  { %4706 = vmatprep.mubr.msk.f32.mxu0 %vm5137_vm10, %v5134_v11 }
0x118e   :  { %v4682_v8 = vpop.f32.mrb[16].mxu0 }
0x118f   :  { %v5777_v14 = vadd.f32 %v4682_v8, %v5716_v58  ;;  %v2232_v18 = vpop.f32.mrb[17].mxu0  ;;  %v4375_v58 = vld [vmem:[%s6230_s4 + $0x20] sm:$0xff] }
0x1190   :  { %v5780_v19 = vadd.f32 %v2232_v18, %v5718_v39  ;;  %v4376_v39 = vld [vmem:[%s6230_s4 + $0x28] sm:$0xff] }
0x1191   :  { %v2244_v22 = vmul.f32 %v5777_v14, %v5777_v14  ;;  %v4855_v26 = vpack.c.bf16 %v4376_v39, %v4375_v58 }
0x1192   :  { %v2243_v17 = vmul.f32 %v5780_v19, %v5780_v19 }
0x1193   :  { %v2248_v23 = vsel %vm114_vm0, %v2244_v22, 0.0  ;;  %4856 = vmatprep.subr.bf16.mxu1 %v4855_v26 }
0x1194   :  { %2249 = vadd.xlane.f32.xlu1 %v2248_v23  ;;  %v2245_v36 = vsel %vm114_vm0, %v2243_v17, 0.0  ;;  %4858 = vmatpush3.bf16.msra.mxu1 %v4855_v26 }
0x1195   :  { %2246 = vadd.xlane.f32.xlu0 %v2245_v36  ;;  %4860 = vmatprep.subr.bf16.mxu1 %v4859_v29 }
0x1198   :  { %4862 = vmatpush3.bf16.msra.mxu1 %v4859_v29 }
0x1199   :  { %4694 = vmatprep.subr.mxu1 %v5134_v11 }
0x1221   :  { %v2250_v30 = vpop.xlane.xlu1 %2249 }
0x1222   :  { %v2252_v31 = vmul.f32 0.03125, %v2250_v30  ;;  %v2247_v32 = vpop.xlane.xlu0 %2246 }
0x1223   :  { %v2251_v33 = vmul.f32 0.03125, %v2247_v32 }
0x1224   :  { %v2254_v34 = vadd.f32 1e-06, %v2252_v31 }
0x1225   :  { %v2253_v40 = vadd.f32 1e-06, %v2251_v33 }
0x1226   :  { %4976 = vrsqrt.f32 %v2254_v34 }
0x1227   :  { %4978 = vrsqrt.f32 %v2253_v40  ;;  %v5026_v40 = vld [vmem:[#allocation5] sm:$0xff] }
0x1230   :  { %v4977_v41 = vpop.eup %4976 }
0x1231   :  { %v4979_v35 = vpop.eup %4978  ;;  %v2258_v42 = vmul.f32 %v4977_v41, %v5777_v14 }
0x1232   :  { %v2257_v44 = vmul.f32 %v4979_v35, %v5780_v19 }
0x1233   :  { %v2268_v47 = vmul.f32 %v4374_v43, %v2258_v42 }
0x1234   :  { %v2267_v46 = vmul.f32 %v4374_v43, %v2257_v44 }
0x1236   :  { %4691 = vmatprep.mubr.msk.f32.mxu1 %vm114_vm0, %v2267_v46 }
0x1237   :  { %4692 = vmatmul.mubr.msk.f32.vlgmr.msra.gmra.mrb[22].mxu1 %vm114_vm0, %v2268_v47 }
0x1238   :  { %4696 = vmatprep.mubr.msk.f32.mxu1 %vm5137_vm10, %v5134_v11 }
0x130a   :  { %v5810_v1 = vpop.f32.mrb[22].mxu1 }
0x130b   :  { %2389 = vrot.lane.b32.xlu1 %v5810_v1, %s5128_s1  ;;  %v5814_v48 = vpop.f32.mrb[23].mxu1  ;;  %v2384_v32 = vmul.f32 %v5810_v1, %v5367_v16 }
0x130c   :  { %2387 = vrot.lane.b32.xlu0 %v5814_v48, %s5128_s1  ;;  %v2383_v29 = vmul.f32 %v5814_v48, %v5342_v4  ;;  %v2355_v41 = vmul.f32 %v5026_v40, %v5814_v48  ;;  %v5027_v4 = vld [vmem:[#allocation5 + $0x8] sm:$0xff] }
0x130d   :  { %v2356_v43 = vmul.f32 %v5027_v4, %v5810_v1 }
0x137d   :  { %v2390_v49 = vpop.permute.xlu1 %2389 }
0x137e   :  { %2396 = vrot.lane.b32.xlu1 %v2390_v49, %s5125_s26  ;;  %v2388_v54 = vpop.permute.xlu0 %2387 }
0x137f   :  { %2393 = vrot.lane.b32.xlu0 %v2388_v54, %s5125_s26 }
0x1382   :  { %2357 = vrot.lane.b32.xlu1 %v5814_v48, %s5125_s26 }
0x1386   :  { %2360 = vrot.lane.b32.xlu1 %v5810_v1, %s5125_s26 }
0x13f0   :  { %v2397_v12 = vpop.permute.xlu1 %2396 }
0x13f1   :  { %v2394_v55 = vpop.permute.xlu0 %2393  ;;  %v2398_v2 = vsel %vm226_vm9, %v2397_v12, %v2390_v49 }
0x13f2   :  { %v2395_v37 = vsel %vm226_vm9, %v2394_v55, %v2388_v54 }
0x13f3   :  { %2399 = vrot.lane.b32.xlu0 %v2395_v37, %s5125_s26 }
0x13f4   :  { %v2358_v61 = vpop.permute.xlu1 %2357 }
0x13f5   :  { %v2359_v20 = vsel %vm226_vm9, %v2358_v61, %v5814_v48 }
0x13f7   :  { %2401 = vrot.lane.b32.xlu0 %v2398_v2, %s5125_s26 }
0x13f8   :  { %v2361_v6 = vpop.permute.xlu1 %2360 }
0x13f9   :  { %v2362_v9 = vsel %vm226_vm9, %v2361_v6, %v5810_v1 }
0x13fb   :  { %2363 = vrot.lane.b32.xlu0 %v2359_v20, %s5125_s26 }
0x13ff   :  { %2365 = vrot.lane.b32.xlu0 %v2362_v9, %s5125_s26 }
0x1465   :  { %v2400_v5 = vpop.permute.xlu0 %2399 }
0x1466   :  { %v2403_v10 = vsel %vm226_vm9, %v2400_v5, %v2388_v54 }
0x1467   :  { %v2405_v38 = vmul.f32 %v2403_v10, %v5315_v50 }
0x1469   :  { %v2407_v60 = vmul.f32 %v2405_v38, %v5327_v56  ;;  %v2402_v13 = vpop.permute.xlu0 %2401 }
0x146a   :  { %v2404_v8 = vsel %vm226_vm9, %v2402_v13, %v2390_v49 }
0x146b   :  { %v2406_v18 = vmul.f32 %v2404_v8, %v5315_v50  ;;  %2411 = vrot.lane.b32.xlu1 %v2407_v60, %s5132_s28 }
0x146d   :  { %v2408_v22 = vmul.f32 %v2406_v18, %v5335_v0  ;;  %v2364_v17 = vpop.permute.xlu0 %2363 }
0x146e   :  { %v2367_v23 = vsel %vm226_vm9, %v2364_v17, %v5814_v48 }
0x146f   :  { %v2369_v36 = vmul.f32 %v2367_v23, %v5315_v50  ;;  %2413 = vrot.lane.b32.xlu1 %v2408_v22, %s5132_s28  ;;  %s6261_s28 = smov 20  }
0x1471   :  { %v2371_v58 = vmul.f32 %v2369_v36, %v5327_v56  ;;  %v2366_v39 = vpop.permute.xlu0 %2365 }
0x1472   :  { %v2368_v24 = vsel %vm226_vm9, %v2366_v39, %v5810_v1 }
0x1473   :  { %v2370_v26 = vmul.f32 %v2368_v24, %v5315_v50  ;;  %2375 = vrot.lane.b32.xlu1 %v2371_v58, %s5133_s29 }
0x1475   :  { %v2372_v28 = vmul.f32 %v2370_v26, %v5335_v0 }
0x1477   :  { %2377 = vrot.lane.b32.xlu1 %v2372_v28, %s5133_s29  ;;  %s6262_s29 = smov 48  }
0x147b   :  { %2791 = vrot.lane.b32.xlu1 %v5810_v1, %s5135_s30 }
0x147f   :  { %2757 = vrot.lane.b32.xlu1 %v5810_v1, %s5136_s0 }
0x14dd   :  { %v2412_v30 = vpop.permute.xlu1 %2411 }
0x14de   :  { %v2417_v31 = vadd.f32 %v2412_v30, %v2383_v29 }
0x14e0   :  { %2420 = vrot.lane.b32.xlu0 %v2417_v31, %s5128_s1 }
0x14e1   :  { %v2414_v33 = vpop.permute.xlu1 %2413 }
0x14e2   :  { %v2418_v34 = vadd.f32 %v2414_v33, %v2384_v32 }
0x14e4   :  { %2498 = vrot.lane.b32.xlu0 %v2418_v34, %s5128_s1  ;;  %s6259_s1 = smov 104  }
0x14e5   :  { %v2376_v35 = vpop.permute.xlu1 %2375 }
0x14e6   :  { %v2381_v42 = vadd.f32 %v2376_v35, %v2355_v41 }
0x14e8   :  { %2789 = vrot.lane.b32.xlu0 %v5814_v48, %s5135_s30 }
0x14e9   :  { %v2378_v44 = vpop.permute.xlu1 %2377 }
0x14ea   :  { %v2382_v46 = vadd.f32 %v2378_v44, %v2356_v43 }
0x14ec   :  { %2755 = vrot.lane.b32.xlu0 %v5814_v48, %s5136_s0 }
0x14ed   :  { %v2792_v16 = vpop.permute.xlu1 %2791 }
0x14ee   :  { %2798 = vrot.lane.b32.xlu1 %v2792_v16, %s5125_s26 }
0x14f1   :  { %v2758_v47 = vpop.permute.xlu1 %2757 }
0x14f2   :  { %2764 = vrot.lane.b32.xlu1 %v2758_v47, %s5125_s26 }
0x1552   :  { %v2421_v49 = vpop.permute.xlu0 %2420 }
0x1553   :  { %4695 = vmatpush3.xpose.msk.msra.mxu1 %vm312_vm11, %v2421_v49 }
0x1554   :  { %4699 = vmatprep.subr.mxu1 %v5134_v11 }
0x1556   :  { %v2499_v54 = vpop.permute.xlu0 %2498  ;;  %4697 = vmatmul.mubr.msk.f32.vlgmr.msra.gmra.mrb[24].mxu1 %vm312_vm11, %v2381_v42 }
0x1557   :  { %4700 = vmatpush3.xpose.msk.msra.mxu1 %vm312_vm11, %v2499_v54  ;;  %4701 = vmatprep.mubr.msk.f32.mxu1 %vm5137_vm10, %v5134_v11  ;;  %v2788_v54 = vmul.f32 %v5810_v1, %v5446_v21 }
0x1558   :  { %4709 = vmatprep.subr.mxu1 %v5134_v11 }
0x155a   :  { %v2790_v12 = vpop.permute.xlu0 %2789  ;;  %4702 = vmatmul.mubr.msk.f32.vlgmr.msra.gmra.mrb[26].mxu1 %vm312_vm11, %v2382_v46  ;;  %v2787_v46 = vmul.f32 %v5814_v48, %v5442_v15 }
0x155b   :  { %2795 = vrot.lane.b32.xlu0 %v2790_v12, %s5125_s26  ;;  %4711 = vmatprep.mubr.msk.f32.mxu1 %vm5137_vm10, %v5134_v11 }
0x155e   :  { %v2756_v55 = vpop.permute.xlu0 %2755 }
0x155f   :  { %2761 = vrot.lane.b32.xlu0 %v2756_v55, %s5125_s26 }
0x1560   :  { %v2799_v37 = vpop.permute.xlu1 %2798 }
0x1561   :  { %v2800_v61 = vsel %vm226_vm9, %v2799_v37, %v2792_v16 }
0x1562   :  { %2803 = vrot.lane.b32.xlu1 %v2800_v61, %s5125_s26 }
0x1564   :  { %v2765_v2 = vpop.permute.xlu1 %2764 }
0x1565   :  { %v2766_v20 = vsel %vm226_vm9, %v2765_v2, %v2758_v47 }
0x1566   :  { %2769 = vrot.lane.b32.xlu1 %v2766_v20, %s5125_s26 }
0x15cd   :  { %v2796_v6 = vpop.permute.xlu0 %2795 }
0x15ce   :  { %v2797_v9 = vsel %vm226_vm9, %v2796_v6, %v2790_v12 }
0x15cf   :  { %2801 = vrot.lane.b32.xlu0 %v2797_v9, %s5125_s26 }
0x15d1   :  { %v2762_v5 = vpop.permute.xlu0 %2761 }
0x15d2   :  { %v2763_v10 = vsel %vm226_vm9, %v2762_v5, %v2756_v55 }
0x15d3   :  { %2767 = vrot.lane.b32.xlu0 %v2763_v10, %s5125_s26 }
0x15d4   :  { %v2804_v39 = vpop.permute.xlu1 %2803 }
0x15d5   :  { %v2806_v24 = vsel %vm226_vm9, %v2804_v39, %v2792_v16 }
0x15d6   :  { %v2808_v28 = vmul.f32 %v2806_v24, %v5315_v50 }
0x15d8   :  { %v2770_v26 = vpop.permute.xlu1 %2769  ;;  %v2810_v31 = vmul.f32 %v2808_v28, %v5335_v0 }
0x15d9   :  { %v2772_v29 = vsel %vm226_vm9, %v2770_v26, %v2758_v47 }
0x15da   :  { %v2774_v32 = vmul.f32 %v2772_v29, %v5315_v50 }
0x15dc   :  { %v2776_v35 = vmul.f32 %v2774_v32, %v5335_v0 }
0x1629   :  { %v2493_v38 = vpop.f32.mrb[24].mxu1 }
0x162a   :  { %v2575_v60 = vmul.f32 0.35355338, %v2493_v38  ;;  %v4698_v13 = vpop.f32.mrb[25].mxu1 }
0x162b   :  { %v2753_v13 = vmul.f32 %v5814_v48, %v5451_v25 }
0x162c   :  { %v2577_v8 = vadd.f32 %v2575_v60, %v5404_v45 }
0x162d   :  { %v2571_v18 = vpop.f32.mrb[26].mxu1 }
0x162e   :  { %v2576_v22 = vmul.f32 0.35355338, %v2571_v18  ;;  %v4703_v17 = vpop.f32.mrb[27].mxu1  ;;  %v2579_v23 = vsel %vm312_vm11, %v2577_v8, -inf  ;;  %v2754_v18 = vmul.f32 %v5810_v1, %v5454_v27 }
0x162f   :  { %2580 = vmax.xlane.f32.xlu0 %v2579_v23 }
0x1630   :  { %v2578_v36 = vadd.f32 %v2576_v22, %v5410_v53 }
0x1632   :  { %v2582_v58 = vsel %vm312_vm11, %v2578_v36, -inf }
0x1633   :  { %2583 = vmax.xlane.f32.xlu1 %v2582_v58 }
0x1641   :  { %v2802_v30 = vpop.permute.xlu0 %2801 }
0x1642   :  { %v2805_v33 = vsel %vm226_vm9, %v2802_v30, %v2790_v12 }
0x1643   :  { %v2807_v34 = vmul.f32 %v2805_v33, %v5315_v50 }
0x1644   :  { %2815 = vrot.lane.b32.xlu1 %v2810_v31, %s5140_s11 }
0x1645   :  { %v2809_v40 = vmul.f32 %v2807_v34, %v5327_v56  ;;  %v2768_v41 = vpop.permute.xlu0 %2767 }
0x1646   :  { %v2771_v42 = vsel %vm226_vm9, %v2768_v41, %v2756_v55 }
0x1647   :  { %v2773_v4 = vmul.f32 %v2771_v42, %v5315_v50  ;;  %2813 = vrot.lane.b32.xlu0 %v2809_v40, %s5140_s11 }
0x1648   :  { %2781 = vrot.lane.b32.xlu1 %v2776_v35, %s5130_s24 }
0x1649   :  { %v2775_v43 = vmul.f32 %v2773_v4, %v5327_v56 }
0x164b   :  { %2779 = vrot.lane.b32.xlu0 %v2775_v43, %s5130_s24  ;;  %s6260_s24 = smov 52  }
0x164c   :  { %2677 = vrot.lane.b32.xlu1 %v5810_v1, %s5141_s12 }
0x164f   :  { %2601 = vrot.lane.b32.xlu0 %v5814_v48, %s5141_s12 }
0x16bc   :  { %v2581_v44 = vpop.xlane.xlu0 %2580 }
0x16bd   :  { %v2585_v20 = vsub.f32 %v2577_v8, %v2581_v44 }
0x16bf   :  { %v2587_v6 = vmul.f32 1.442695, %v2585_v20 }
0x16c0   :  { %v2814_v16 = vpop.permute.xlu0 %2813  ;;  %v2584_v47 = vpop.xlane.xlu1 %2583 }
0x16c1   :  { %v2819_v49 = vadd.f32 %v2814_v16, %v2787_v46  ;;  %4980 = vpow2.f32 %v2587_v6  ;;  %v2586_v9 = vsub.f32 %v2578_v36, %v2584_v47 }
0x16c3   :  { %2825 = vrot.lane.b32.xlu0 %v2819_v49, %s5135_s30  ;;  %v2589_v5 = vmul.f32 1.442695, %v2586_v9 }
0x16c4   :  { %v2780_v12 = vpop.permute.xlu0 %2779  ;;  %v2816_v55 = vpop.permute.xlu1 %2815 }
0x16c5   :  { %v2820_v37 = vadd.f32 %v2816_v55, %v2788_v54  ;;  %4982 = vpow2.f32 %v2589_v5  ;;  %v2785_v8 = vadd.f32 %v2780_v12, %v2753_v13 }
0x16c7   :  { %2905 = vrot.lane.b32.xlu1 %v2820_v37, %s5135_s30  ;;  %s6263_s30 = smov 40  }
0x16c8   :  { %v2602_v61 = vpop.permute.xlu0 %2601  ;;  %v2782_v2 = vpop.permute.xlu1 %2781 }
0x16c9   :  { %4705 = vmatpush3.msra.mxu0 %v2602_v61  ;;  %v2786_v22 = vadd.f32 %v2782_v2, %v2754_v18 }
0x16ca   :  { %4714 = vmatprep.subr.mxu0 %v5134_v11 }
0x16cb   :  { %v4981_v21 = vpop.eup %4980 }
0x16cc   :  { %v2678_v15 = vpop.permute.xlu1 %2677  ;;  %v2591_v10 = vsel %vm312_vm11, %v4981_v21, 0.0 }
0x16cd   :  { %4710 = vmatpush3.msra.mxu1 %v2678_v15 }
0x16ce   :  { %4719 = vmatprep.subr.mxu1 %v5134_v11 }
0x16cf   :  { %v4983_v38 = vpop.eup %4982 }
0x16d0   :  { %v2594_v60 = vsel %vm312_vm11, %v4983_v38, 0.0 }
0x16e2   :  { %2592 = vadd.xlane.f32.xlu0 %v2591_v10 }
0x16eb   :  { %2595 = vadd.xlane.f32.xlu1 %v2594_v60 }
0x16f8   :  { %2822 = vrot.lane.b32.xlu0 %v2785_v8, %s5136_s0 }
0x16fc   :  { %3195 = vrot.lane.b32.xlu0 %v5814_v48, %s5142_s3  ;;  %2902 = vrot.lane.b32.xlu1 %v2786_v22, %s5136_s0  ;;  %s6264_s0 = smov 16  }
0x1700   :  { %3161 = vrot.lane.b32.xlu0 %v5814_v48, %s5143_s13  ;;  %3197 = vrot.lane.b32.xlu1 %v5810_v1, %s5142_s3 }
0x1704   :  { %3163 = vrot.lane.b32.xlu1 %v5810_v1, %s5143_s13 }
0x1735   :  { %v2826_v25 = vpop.permute.xlu0 %2825 }
0x1739   :  { %v2906_v23 = vpop.permute.xlu1 %2905 }
0x176f   :  { %v2593_v17 = vpop.xlane.xlu0 %2592 }
0x1770   :  { %4984 = vrcp.f32 %v2593_v17 }
0x1773   :  { %v2823_v27 = vpop.permute.xlu0 %2822 }
0x1777   :  { %v3196_v36 = vpop.permute.xlu0 %3195 }
0x1778   :  { %3201 = vrot.lane.b32.xlu0 %v3196_v36, %s5125_s26  ;;  %v2596_v58 = vpop.xlane.xlu1 %2595 }
0x1779   :  { %4986 = vrcp.f32 %v2596_v58 }
0x177a   :  { %v4985_v39 = vpop.eup %4984 }
0x177b   :  { %v2598_v24 = vmul.f32 %v4985_v39, %v4981_v21  ;;  %v3162_v26 = vpop.permute.xlu0 %3161 }
0x177c   :  { %3167 = vrot.lane.b32.xlu0 %v3162_v26, %s5125_s26  ;;  %v2903_v28 = vpop.permute.xlu1 %2902 }
0x177d   :  { %4707 = vmatmul.mubr.msk.f32.vlgmr.msra.gmra.mrb[18].mxu0 %vm312_vm11, %v2598_v24  ;;  %v3193_v24 = vmul.f32 %v5814_v48, %v5538_v57 }
0x177e   :  { %4715 = vmatpush3.xpose.msk.msra.mxu0 %vm312_vm11, %v2826_v25  ;;  %4716 = vmatprep.mubr.msk.f32.mxu0 %vm5137_vm10, %v5134_v11 }
0x177f   :  { %4724 = vmatprep.subr.mxu0 %v5134_v11 }
0x1780   :  { %v3198_v29 = vpop.permute.xlu1 %3197 }
0x1781   :  { %4717 = vmatmul.mubr.msk.f32.vlgmr.msra.gmra.mrb[20].mxu0 %vm312_vm11, %v2823_v27  ;;  %3204 = vrot.lane.b32.xlu1 %v3198_v29, %s5125_s26 }
0x1782   :  { %4726 = vmatprep.mubr.msk.f32.mxu0 %vm5137_vm10, %v5134_v11 }
0x1783   :  { %v4987_v30 = vpop.eup %4986 }
0x1784   :  { %v2600_v31 = vmul.f32 %v4987_v30, %v4983_v38  ;;  %v3164_v32 = vpop.permute.xlu1 %3163 }
0x1785   :  { %3170 = vrot.lane.b32.xlu1 %v3164_v32, %s5125_s26 }
0x1786   :  { %4712 = vmatmul.mubr.msk.f32.vlgmr.msra.gmra.mrb[28].mxu1 %vm312_vm11, %v2600_v31 }
0x1787   :  { %4720 = vmatpush3.xpose.msk.msra.mxu1 %vm312_vm11, %v2906_v23  ;;  %4721 = vmatprep.mubr.msk.f32.mxu1 %vm5137_vm10, %v5134_v11 }
0x1788   :  { %4729 = vmatprep.subr.mxu1 %v5134_v11 }
0x178a   :  { %4722 = vmatmul.mubr.msk.f32.vlgmr.msra.gmra.mrb[30].mxu1 %vm312_vm11, %v2903_v28 }
0x178b   :  { %4731 = vmatprep.mubr.msk.f32.mxu1 %vm5137_vm10, %v5134_v11 }
0x17ea   :  { %v3202_v33 = vpop.permute.xlu0 %3201 }
0x17eb   :  { %v3203_v34 = vsel %vm226_vm9, %v3202_v33, %v3196_v36 }
0x17ec   :  { %3207 = vrot.lane.b32.xlu0 %v3203_v34, %s5125_s26 }
0x17ee   :  { %v3168_v40 = vpop.permute.xlu0 %3167 }
0x17ef   :  { %v3169_v41 = vsel %vm226_vm9, %v3168_v40, %v3162_v26 }
0x17f0   :  { %3173 = vrot.lane.b32.xlu0 %v3169_v41, %s5125_s26 }
0x17f3   :  { %v3205_v35 = vpop.permute.xlu1 %3204 }
0x17f4   :  { %v3206_v42 = vsel %vm226_vm9, %v3205_v35, %v3198_v29 }
0x17f5   :  { %3209 = vrot.lane.b32.xlu1 %v3206_v42, %s5125_s26 }
0x17f7   :  { %v3171_v4 = vpop.permute.xlu1 %3170 }
0x17f8   :  { %v3172_v43 = vsel %vm226_vm9, %v3171_v4, %v3164_v32 }
0x17f9   :  { %3175 = vrot.lane.b32.xlu1 %v3172_v43, %s5125_s26 }
0x1850   :  { %v5966_v44 = vpop.f32.mrb[18].mxu0 }
0x1851   :  { %v4708_v46 = vpop.f32.mrb[19].mxu0 }
0x1854   :  { %v2897_v16 = vpop.f32.mrb[20].mxu0 }
0x1855   :  { %v2981_v47 = vmul.f32 0.35355338, %v2897_v16  ;;  %v4718_v49 = vpop.f32.mrb[21].mxu0 }
0x1857   :  { %v2983_v54 = vadd.f32 %v2981_v47, %v5404_v45  ;;  %v3159_v47 = vmul.f32 %v5814_v48, %v5547_v3 }
0x1859   :  { %v5969_v12 = vpop.f32.mrb[28].mxu1  ;;  %v2985_v55 = vsel %vm312_vm11, %v2983_v54, -inf }
0x185a   :  { %2986 = vmax.xlane.f32.xlu0 %v2985_v55  ;;  %v4713_v37 = vpop.f32.mrb[29].mxu1 }
0x185d   :  { %v2977_v61 = vpop.f32.mrb[30].mxu1 }
0x185e   :  { %v2982_v2 = vmul.f32 0.35355338, %v2977_v61  ;;  %v4723_v20 = vpop.f32.mrb[31].mxu1  ;;  %v3208_v6 = vpop.permute.xlu0 %3207 }
0x185f   :  { %v3211_v5 = vsel %vm226_vm9, %v3208_v6, %v3196_v36 }
0x1860   :  { %v2984_v15 = vadd.f32 %v2982_v2, %v5410_v53  ;;  %v3213_v38 = vmul.f32 %v3211_v5, %v5315_v50 }
0x1862   :  { %v2988_v9 = vsel %vm312_vm11, %v2984_v15, -inf  ;;  %v3174_v10 = vpop.permute.xlu0 %3173  ;;  %v3215_v18 = vmul.f32 %v3213_v38, %v5327_v56 }
0x1863   :  { %2989 = vmax.xlane.f32.xlu1 %v2988_v9  ;;  %v3177_v60 = vsel %vm226_vm9, %v3174_v10, %v3162_v26 }
0x1864   :  { %v3179_v22 = vmul.f32 %v3177_v60, %v5315_v50 }
0x1866   :  { %v3181_v27 = vmul.f32 %v3179_v22, %v5327_v56 }
0x1867   :  { %v3210_v21 = vpop.permute.xlu1 %3209 }
0x1868   :  { %v3212_v13 = vsel %vm226_vm9, %v3210_v21, %v3198_v29 }
0x1869   :  { %v3214_v25 = vmul.f32 %v3212_v13, %v5315_v50 }
0x186b   :  { %v3176_v8 = vpop.permute.xlu1 %3175  ;;  %v3216_v23 = vmul.f32 %v3214_v25, %v5335_v0 }
0x186c   :  { %v3178_v17 = vsel %vm226_vm9, %v3176_v8, %v3164_v32  ;;  %v3194_v32 = vmul.f32 %v5810_v1, %v5543_v62 }
0x186d   :  { %v3180_v36 = vmul.f32 %v3178_v17, %v5315_v50 }
0x186f   :  { %v3182_v58 = vmul.f32 %v3180_v36, %v5335_v0 }
0x1870   :  { %3219 = vrot.lane.b32.xlu0 %v3215_v18, %s5145_s17 }
0x1874   :  { %3185 = vrot.lane.b32.xlu0 %v3181_v27, %s5147_s2  ;;  %3221 = vrot.lane.b32.xlu1 %v3216_v23, %s5145_s17 }
0x1878   :  { %3007 = vrot.lane.b32.xlu0 %v5814_v48, %s5148_s14  ;;  %3187 = vrot.lane.b32.xlu1 %v3182_v58, %s5147_s2 }
0x187c   :  { %3083 = vrot.lane.b32.xlu1 %v5810_v1, %s5148_s14 }
0x18e7   :  { %v2987_v39 = vpop.xlane.xlu0 %2986 }
0x18e8   :  { %v2991_v40 = vsub.f32 %v2983_v54, %v2987_v39  ;;  %v3160_v54 = vmul.f32 %v5810_v1, %v5550_v7 }
0x18ea   :  { %v2993_v57 = vmul.f32 1.442695, %v2991_v40 }
0x18eb   :  { %v3220_v26 = vpop.permute.xlu0 %3219 }
0x18ec   :  { %v3225_v28 = vadd.f32 %v3220_v26, %v3193_v24  ;;  %4988 = vpow2.f32 %v2993_v57 }
0x18ee   :  { %3231 = vrot.lane.b32.xlu0 %v3225_v28, %s5142_s3 }
0x18ef   :  { %v3186_v29 = vpop.permute.xlu0 %3185 }
0x18f0   :  { %v2990_v30 = vpop.xlane.xlu1 %2989  ;;  %v3191_v49 = vadd.f32 %v3186_v29, %v3159_v47 }
0x18f1   :  { %v2992_v42 = vsub.f32 %v2984_v15, %v2990_v30 }
0x18f3   :  { %v3008_v31 = vpop.permute.xlu0 %3007  ;;  %v2995_v43 = vmul.f32 1.442695, %v2992_v42 }
0x18f4   :  { %4725 = vmatpush3.msra.mxu0 %v3008_v31  ;;  %v3222_v33 = vpop.permute.xlu1 %3221 }
0x18f5   :  { %v3226_v34 = vadd.f32 %v3222_v33, %v3194_v32  ;;  %4734 = vmatprep.subr.mxu0 %v5134_v11  ;;  %4990 = vpow2.f32 %v2995_v43 }
0x18f6   :  { %v4989_v4 = vpop.eup %4988 }
0x18f7   :  { %3311 = vrot.lane.b32.xlu1 %v3226_v34, %s5142_s3  ;;  %v2997_v62 = vsel %vm312_vm11, %v4989_v4, 0.0 }
0x18f8   :  { %v3188_v41 = vpop.permute.xlu1 %3187 }
0x18f9   :  { %v3192_v55 = vadd.f32 %v3188_v41, %v3160_v54 }
0x18fc   :  { %v3084_v35 = vpop.permute.xlu1 %3083 }
0x18fd   :  { %4730 = vmatpush3.msra.mxu1 %v3084_v35 }
0x18fe   :  { %4739 = vmatprep.subr.mxu1 %v5134_v11 }
0x18ff   :  { %v4991_v46 = vpop.eup %4990 }
0x1900   :  { %v3000_v16 = vsel %vm312_vm11, %v4991_v46, 0.0 }
0x190d   :  { %2998 = vadd.xlane.f32.xlu0 %v2997_v62 }
0x191b   :  { %3001 = vadd.xlane.f32.xlu1 %v3000_v16 }
0x1923   :  { %3228 = vrot.lane.b32.xlu0 %v3191_v49, %s5143_s13 }
0x1927   :  { %3601 = vrot.lane.b32.xlu0 %v5814_v48, %s6258_s8 }
0x192b   :  { %3567 = vrot.lane.b32.xlu0 %v5814_v48, %s6259_s1 }
0x192c   :  { %3308 = vrot.lane.b32.xlu1 %v3192_v55, %s5143_s13 }
0x1930   :  { %3603 = vrot.lane.b32.xlu1 %v5810_v1, %s6258_s8 }
0x1934   :  { %3569 = vrot.lane.b32.xlu1 %v5810_v1, %s6259_s1 }
0x1960   :  { %v3232_v3 = vpop.permute.xlu0 %3231 }
0x1969   :  { %v3312_v7 = vpop.permute.xlu1 %3311 }
0x199a   :  { %v2999_v37 = vpop.xlane.xlu0 %2998 }
0x199b   :  { %4992 = vrcp.f32 %v2999_v37 }
0x199e   :  { %v3229_v61 = vpop.permute.xlu0 %3228 }
0x19a2   :  { %v3602_v2 = vpop.permute.xlu0 %3601 }
0x19a3   :  { %3607 = vrot.lane.b32.xlu0 %v3602_v2, %s5125_s26 }
0x19a5   :  { %v4993_v20 = vpop.eup %4992 }
0x19a6   :  { %v3004_v15 = vmul.f32 %v4993_v20, %v4989_v4  ;;  %v3568_v6 = vpop.permute.xlu0 %3567 }
0x19a7   :  { %3573 = vrot.lane.b32.xlu0 %v3568_v6, %s5125_s26 }
0x19a8   :  { %4727 = vmatmul.mubr.msk.f32.vlgmr.msra.gmra.mrb[22].mxu0 %vm312_vm11, %v3004_v15  ;;  %v3002_v9 = vpop.xlane.xlu1 %3001 }
0x19a9   :  { %4735 = vmatpush3.xpose.msk.msra.mxu0 %vm312_vm11, %v3232_v3  ;;  %4994 = vrcp.f32 %v3002_v9  ;;  %4736 = vmatprep.mubr.msk.f32.mxu0 %vm5137_vm10, %v5134_v11 }
0x19aa   :  { %4744 = vmatprep.subr.mxu0 %v5134_v11 }
0x19ac   :  { %4737 = vmatmul.mubr.msk.f32.vlgmr.msra.gmra.mrb[24].mxu0 %vm312_vm11, %v3229_v61  ;;  %v3309_v5 = vpop.permute.xlu1 %3308 }
0x19ad   :  { %4746 = vmatprep.mubr.msk.f32.mxu0 %vm5137_vm10, %v5134_v11 }
0x19b0   :  { %v3604_v21 = vpop.permute.xlu1 %3603 }
0x19b1   :  { %3610 = vrot.lane.b32.xlu1 %v3604_v21, %s5125_s26 }
0x19b3   :  { %v4995_v10 = vpop.eup %4994 }
0x19b4   :  { %v3006_v38 = vmul.f32 %v4995_v10, %v4991_v46  ;;  %v3570_v60 = vpop.permute.xlu1 %3569 }
0x19b5   :  { %3576 = vrot.lane.b32.xlu1 %v3570_v60, %s5125_s26 }
0x19b6   :  { %4732 = vmatmul.mubr.msk.f32.vlgmr.msra.gmra.mrb[32].mxu1 %vm312_vm11, %v3006_v38 }
0x19b7   :  { %4740 = vmatpush3.xpose.msk.msra.mxu1 %vm312_vm11, %v3312_v7  ;;  %4741 = vmatprep.mubr.msk.f32.mxu1 %vm5137_vm10, %v5134_v11  ;;  %v3599_v7 = vmul.f32 %v5814_v48, %v5634_v52 }
0x19b8   :  { %4749 = vmatprep.subr.mxu1 %v5134_v11 }
0x19ba   :  { %4742 = vmatmul.mubr.msk.f32.vlgmr.msra.gmra.mrb[34].mxu1 %vm312_vm11, %v3309_v5  ;;  %v3600_v5 = vmul.f32 %v5810_v1, %v5639_v51  ;;  %v3565_v51 = vmul.f32 %v5814_v48, %v5643_v59 }
0x19bb   :  { %4751 = vmatprep.mubr.msk.f32.mxu1 %vm5137_vm10, %v5134_v11 }
0x1a15   :  { %v3608_v13 = vpop.permute.xlu0 %3607 }
0x1a16   :  { %v3609_v8 = vsel %vm226_vm9, %v3608_v13, %v3602_v2 }
0x1a17   :  { %3613 = vrot.lane.b32.xlu0 %v3609_v8, %s5125_s26 }
0x1a19   :  { %v3574_v18 = vpop.permute.xlu0 %3573 }
0x1a1a   :  { %v3575_v22 = vsel %vm226_vm9, %v3574_v18, %v3568_v6 }
0x1a1b   :  { %3579 = vrot.lane.b32.xlu0 %v3575_v22, %s5125_s26 }
0x1a23   :  { %v3611_v25 = vpop.permute.xlu1 %3610 }
0x1a24   :  { %v3612_v17 = vsel %vm226_vm9, %v3611_v25, %v3604_v21 }
0x1a25   :  { %3615 = vrot.lane.b32.xlu1 %v3612_v17, %s5125_s26 }
0x1a27   :  { %v3577_v27 = vpop.permute.xlu1 %3576 }
0x1a28   :  { %v3578_v23 = vsel %vm226_vm9, %v3577_v27, %v3570_v60 }
0x1a29   :  { %3581 = vrot.lane.b32.xlu1 %v3578_v23, %s5125_s26  ;;  %v3566_v23 = vmul.f32 %v5810_v1, %v5647_v63 }
0x1a7b   :  { %v6046_v36 = vpop.f32.mrb[22].mxu0 }
0x1a7c   :  { %v4728_v58 = vpop.f32.mrb[23].mxu0 }
0x1a7f   :  { %v3303_v39 = vpop.f32.mrb[24].mxu0 }
0x1a80   :  { %v3387_v24 = vmul.f32 0.35355338, %v3303_v39  ;;  %v4738_v26 = vpop.f32.mrb[25].mxu0 }
0x1a82   :  { %v3389_v28 = vadd.f32 %v3387_v24, %v5404_v45 }
0x1a84   :  { %v3391_v29 = vsel %vm312_vm11, %v3389_v28, -inf }
0x1a85   :  { %3392 = vmax.xlane.f32.xlu0 %v3391_v29 }
0x1a89   :  { %v6050_v30 = vpop.f32.mrb[32].mxu1  ;;  %v3614_v32 = vpop.permute.xlu0 %3613 }
0x1a8a   :  { %v4733_v31 = vpop.f32.mrb[33].mxu1  ;;  %v3617_v57 = vsel %vm226_vm9, %v3614_v32, %v3602_v2 }
0x1a8b   :  { %v3619_v4 = vmul.f32 %v3617_v57, %v5315_v50 }
0x1a8d   :  { %v3383_v33 = vpop.f32.mrb[34].mxu1  ;;  %v3580_v42 = vpop.permute.xlu0 %3579  ;;  %v3621_v46 = vmul.f32 %v3619_v4, %v5327_v56 }
0x1a8e   :  { %v3388_v34 = vmul.f32 0.35355338, %v3383_v33  ;;  %v4743_v40 = vpop.f32.mrb[35].mxu1  ;;  %v3583_v43 = vsel %vm226_vm9, %v3580_v42, %v3568_v6 }
0x1a8f   :  { %v3585_v16 = vmul.f32 %v3583_v43, %v5315_v50 }
0x1a90   :  { %v3390_v41 = vadd.f32 %v3388_v34, %v5410_v53 }
0x1a91   :  { %v3587_v54 = vmul.f32 %v3585_v16, %v5327_v56 }
0x1a92   :  { %v3394_v35 = vsel %vm312_vm11, %v3390_v41, -inf }
0x1a93   :  { %3395 = vmax.xlane.f32.xlu1 %v3394_v35 }
0x1a97   :  { %v3616_v62 = vpop.permute.xlu1 %3615 }
0x1a98   :  { %v3618_v47 = vsel %vm226_vm9, %v3616_v62, %v3604_v21 }
0x1a99   :  { %v3620_v55 = vmul.f32 %v3618_v47, %v5315_v50 }
0x1a9b   :  { %3625 = vrot.lane.b32.xlu0 %v3621_v46, %s6260_s24  ;;  %v3582_v49 = vpop.permute.xlu1 %3581  ;;  %v3622_v37 = vmul.f32 %v3620_v55, %v5335_v0 }
0x1a9c   :  { %v3584_v3 = vsel %vm226_vm9, %v3582_v49, %v3570_v60 }
0x1a9d   :  { %v3586_v61 = vmul.f32 %v3584_v3, %v5315_v50 }
0x1a9f   :  { %3591 = vrot.lane.b32.xlu0 %v3587_v54, %s6261_s28  ;;  %v3588_v2 = vmul.f32 %v3586_v61, %v5335_v0 }
0x1aa3   :  { %3413 = vrot.lane.b32.xlu0 %v5814_v48, %s6262_s29 }
0x1aa4   :  { %3627 = vrot.lane.b32.xlu1 %v3622_v37, %s6260_s24 }
0x1aa8   :  { %3593 = vrot.lane.b32.xlu1 %v3588_v2, %s6261_s28 }
0x1aac   :  { %3489 = vrot.lane.b32.xlu1 %v5810_v1, %s6262_s29 }
0x1b12   :  { %v3393_v56 = vpop.xlane.xlu0 %3392 }
0x1b13   :  { %v3397_v0 = vsub.f32 %v3389_v28, %v3393_v56 }
0x1b15   :  { %v3399_v38 = vmul.f32 1.442695, %v3397_v0  ;;  %v4406_v0 = vld [vmem:[%s6231_s5 + $0x28] sm:$0xff] }
0x1b16   :  { %v3626_v20 = vpop.permute.xlu0 %3625 }
0x1b17   :  { %v3631_v15 = vadd.f32 %v3626_v20, %v3599_v7  ;;  %4996 = vpow2.f32 %v3399_v38 }
0x1b19   :  { %3637 = vrot.lane.b32.xlu0 %v3631_v15, %s6258_s8 }
0x1b1a   :  { %v3592_v50 = vpop.permute.xlu0 %3591 }
0x1b1b   :  { %v3597_v27 = vadd.f32 %v3592_v50, %v3565_v51 }
0x1b1e   :  { %v3414_v6 = vpop.permute.xlu0 %3413 }
0x1b1f   :  { %4745 = vmatpush3.msra.mxu0 %v3414_v6 }
0x1b20   :  { %v3396_v9 = vpop.xlane.xlu1 %3395  ;;  %4754 = vmatprep.subr.mxu0 %v5134_v11 }
0x1b21   :  { %v4997_v13 = vpop.eup %4996  ;;  %v3398_v8 = vsub.f32 %v3390_v41, %v3396_v9 }
0x1b22   :  { %v3403_v18 = vsel %vm312_vm11, %v4997_v13, 0.0 }
0x1b23   :  { %v3401_v22 = vmul.f32 1.442695, %v3398_v8 }
0x1b24   :  { %v3628_v21 = vpop.permute.xlu1 %3627 }
0x1b25   :  { %v3632_v10 = vadd.f32 %v3628_v21, %v3600_v5  ;;  %4998 = vpow2.f32 %v3401_v22  ;;  %v4407_v5 = vld [vmem:[%s6231_s5 + $0x30] sm:$0xff] }
0x1b27   :  { %3717 = vrot.lane.b32.xlu1 %v3632_v10, %s6258_s8  ;;  %v4408_v10 = vld [vmem:[%s6231_s5 + $0x38] sm:$0xff] }
0x1b28   :  { %v3594_v52 = vpop.permute.xlu1 %3593  ;;  %v4867_v38 = vpack.c.bf16 %v4408_v10, %v4407_v5 }
0x1b29   :  { %v3598_v58 = vadd.f32 %v3594_v52, %v3566_v23 }
0x1b2c   :  { %v3490_v60 = vpop.permute.xlu1 %3489 }
0x1b2d   :  { %4750 = vmatpush3.msra.mxu1 %v3490_v60 }
0x1b2e   :  { %4759 = vmatprep.subr.mxu1 %v5134_v11 }
0x1b2f   :  { %v4999_v25 = vpop.eup %4998 }
0x1b30   :  { %v3406_v17 = vsel %vm312_vm11, %v4999_v25, 0.0 }
0x1b38   :  { %3404 = vadd.xlane.f32.xlu0 %v3403_v18 }
0x1b4b   :  { %3407 = vadd.xlane.f32.xlu1 %v3406_v17 }
0x1b4e   :  { %3634 = vrot.lane.b32.xlu0 %v3597_v27, %s6259_s1 }
0x1b5c   :  { %3714 = vrot.lane.b32.xlu1 %v3598_v58, %s6259_s1 }
0x1b8b   :  { %v3638_v39 = vpop.permute.xlu0 %3637 }
0x1b99   :  { %v3718_v59 = vpop.permute.xlu1 %3717 }
0x1bc5   :  { %v3405_v24 = vpop.xlane.xlu0 %3404 }
0x1bc6   :  { %5000 = vrcp.f32 %v3405_v24 }
0x1bc9   :  { %v3635_v29 = vpop.permute.xlu0 %3634 }
0x1bd0   :  { %v5001_v26 = vpop.eup %5000 }
0x1bd1   :  { %v3410_v28 = vmul.f32 %v5001_v26, %v4997_v13 }
0x1bd3   :  { %4747 = vmatmul.mubr.msk.f32.vlgmr.msra.gmra.mrb[26].mxu0 %vm312_vm11, %v3410_v28 }
0x1bd4   :  { %4755 = vmatpush3.xpose.msk.msra.mxu0 %vm312_vm11, %v3638_v39  ;;  %4756 = vmatprep.mubr.msk.f32.mxu0 %vm5137_vm10, %v5134_v11 }
0x1bd5   :  { %4764 = vmatprep.subr.mxu0 %v5134_v11 }
0x1bd7   :  { %4757 = vmatmul.mubr.msk.f32.vlgmr.msra.gmra.mrb[28].mxu0 %vm312_vm11, %v3635_v29 }
0x1bd8   :  { %v3408_v63 = vpop.xlane.xlu1 %3407  ;;  %4766 = vmatprep.mubr.msk.f32.mxu0 %vm5137_vm10, %v5134_v11 }
0x1bd9   :  { %5002 = vrcp.f32 %v3408_v63 }
0x1bdc   :  { %v3715_v33 = vpop.permute.xlu1 %3714 }
0x1be3   :  { %v5003_v31 = vpop.eup %5002 }
0x1be4   :  { %v3412_v32 = vmul.f32 %v5003_v31, %v4999_v25 }
0x1be6   :  { %4752 = vmatmul.mubr.msk.f32.vlgmr.msra.gmra.mrb[36].mxu1 %vm312_vm11, %v3412_v32 }
0x1be7   :  { %4760 = vmatpush3.xpose.msk.msra.mxu1 %vm312_vm11, %v3718_v59  ;;  %4761 = vmatprep.mubr.msk.f32.mxu1 %vm5137_vm10, %v5134_v11 }
0x1be8   :  { %4769 = vmatprep.subr.mxu1 %v5134_v11 }
0x1bea   :  { %4762 = vmatmul.mubr.msk.f32.vlgmr.msra.gmra.mrb[38].mxu1 %vm312_vm11, %v3715_v33 }
0x1beb   :  { %4771 = vmatprep.mubr.msk.f32.mxu1 %vm5137_vm10, %v5134_v11 }
0x1ca6   :  { %v3485_v34 = vpop.f32.mrb[26].mxu0 }
0x1ca7   :  { %v4748_v40 = vpop.f32.mrb[27].mxu0 }
0x1caa   :  { %v3709_v41 = vpop.f32.mrb[28].mxu0 }
0x1cab   :  { %v3793_v57 = vmul.f32 0.35355338, %v3709_v41  ;;  %v4758_v35 = vpop.f32.mrb[29].mxu0  ;;  %v4416_v41 = vld [vmem:[%s6232_s6 + $0x38] sm:$0xff] }
0x1cad   :  { %v3795_v42 = vadd.f32 %v3793_v57, %v5404_v45 }
0x1caf   :  { %v3797_v4 = vsel %vm312_vm11, %v3795_v42, -inf }
0x1cb0   :  { %3798 = vmax.xlane.f32.xlu0 %v3797_v4 }
0x1cb9   :  { %v3561_v43 = vpop.f32.mrb[36].mxu1 }
0x1cba   :  { %v4753_v62 = vpop.f32.mrb[37].mxu1 }
0x1cbd   :  { %v3789_v46 = vpop.f32.mrb[38].mxu1 }
0x1cbe   :  { %v3794_v16 = vmul.f32 0.35355338, %v3789_v46  ;;  %v4763_v47 = vpop.f32.mrb[39].mxu1 }
0x1cc0   :  { %v3796_v49 = vadd.f32 %v3794_v16, %v5410_v53 }
0x1cc2   :  { %v3800_v54 = vsel %vm312_vm11, %v3796_v49, -inf }
0x1cc3   :  { %3801 = vmax.xlane.f32.xlu1 %v3800_v54  ;;  %v4412_v54 = vld [vmem:[%s6235_s9 + $0x1] ss:$0 sm:$0xff] }
0x1cd4   :  { %3819 = vrot.lane.b32.xlu1 %v5814_v48, %s6263_s30 }
0x1cd8   :  { %3973 = vrot.lane.b32.xlu1 %v6046_v36, %s5125_s26 }
0x1cdc   :  { %3975 = vrot.lane.b32.xlu1 %v6050_v30, %s5125_s26 }
0x1ce0   :  { %3983 = vrot.lane.b32.xlu1 %v3561_v43, %s6264_s0 }
0x1d3d   :  { %v3799_v11 = vpop.xlane.xlu0 %3798 }
0x1d3e   :  { %v3803_v45 = vsub.f32 %v3795_v42, %v3799_v11 }
0x1d40   :  { %v3805_v55 = vmul.f32 1.442695, %v3803_v45 }
0x1d42   :  { %5004 = vpow2.f32 %v3805_v55 }
0x1d4c   :  { %v5005_v3 = vpop.eup %5004 }
0x1d4d   :  { %v3809_v53 = vsel %vm312_vm11, %v5005_v3, 0.0 }
0x1d4e   :  { %3810 = vadd.xlane.f32.xlu0 %v3809_v53  ;;  %v4422_v53 = vld [vmem:[%s6233_s7 + $0x48] sm:$0xff] }
0x1d50   :  { %v3802_v37 = vpop.xlane.xlu1 %3801 }
0x1d51   :  { %v3804_v61 = vsub.f32 %v3796_v49, %v3802_v37  ;;  %v4423_v37 = vld [vmem:[%s6233_s7 + $0x50] sm:$0xff] }
0x1d53   :  { %v3807_v2 = vmul.f32 1.442695, %v3804_v61 }
0x1d54   :  { %v3820_v48 = vpop.permute.xlu1 %3819 }
0x1d55   :  { %5006 = vpow2.f32 %v3807_v2  ;;  %4765 = vmatpush3.msra.mxu0 %v3820_v48  ;;  %v4424_v2 = vld [vmem:[%s6233_s7 + $0x58] sm:$0xff] }
0x1d56   :  { %v4883_v48 = vpack.c.bf16 %v4424_v2, %v4423_v37 }
0x1d58   :  { %v3974_v18 = vpop.permute.xlu1 %3973 }
0x1d59   :  { %v3995_v25 = vsel %vm312_vm11, %v5966_v44, %v3974_v18 }
0x1d5c   :  { %v3976_v23 = vpop.permute.xlu1 %3975 }
0x1d5d   :  { %v3996_v39 = vsel %vm312_vm11, %v5969_v12, %v3976_v23 }
0x1d5f   :  { %v5007_v36 = vpop.eup %5006 }
0x1d60   :  { %v3812_v56 = vsel %vm312_vm11, %v5007_v36, 0.0  ;;  %v3984_v58 = vpop.permute.xlu1 %3983 }
0x1d61   :  { %3813 = vadd.xlane.f32.xlu0 %v3812_v56  ;;  %v3998_v24 = vsel %vm1924_vm13, %v3996_v39, %v3984_v58  ;;  %v4426_v56 = vld [vmem:[%s6233_s7 + $0x68] sm:$0xff] }
0x1d77   :  { %3895 = vrot.lane.b32.xlu0 %v5810_v1, %s6263_s30  ;;  %v4405_v1 = vld [vmem:[%s6231_s5 + $0x20] sm:$0xff] }
0x1d78   :  { %v4863_v21 = vpack.c.bf16 %v4406_v0, %v4405_v1 }
0x1d7a   :  { %4864 = vmatprep.subr.bf16.mxu0 %v4863_v21 }
0x1d7b   :  { %3981 = vrot.lane.b32.xlu0 %v3485_v34, %s6264_s0  ;;  %v4415_v34 = vld [vmem:[%s6232_s6 + $0x30] sm:$0xff] }
0x1d7c   :  { %v4875_v57 = vpack.c.bf16 %v4416_v41, %v4415_v34 }
0x1ddb   :  { %v3811_v30 = vpop.xlane.xlu0 %3810 }
0x1ddc   :  { %5008 = vrcp.f32 %v3811_v30 }
0x1de6   :  { %v5009_v7 = vpop.eup %5008 }
0x1de7   :  { %v3816_v20 = vmul.f32 %v5009_v7, %v5005_v3  ;;  %v4421_v3 = vld [vmem:[%s6233_s7 + $0x40] sm:$0xff]  ;;  %v4427_v7 = vld [vmem:[%s6233_s7 + $0x70] sm:$0xff] }
0x1de8   :  { %v4879_v61 = vpack.c.bf16 %v4422_v53, %v4421_v3 }
0x1de9   :  { %4767 = vmatmul.mubr.msk.f32.vlgmr.msra.gmra.mrb[30].mxu0 %vm312_vm11, %v3816_v20  ;;  %v4428_v20 = vld [vmem:[%s6233_s7 + $0x78] sm:$0xff] }
0x1dea   :  { %4866 = vmatpush3.bf16.msra.mxu0 %v4863_v21 }
0x1deb   :  { %4868 = vmatprep.subr.bf16.mxu0 %v4867_v38 }
0x1dee   :  { %v3814_v15 = vpop.xlane.xlu0 %3813  ;;  %4870 = vmatpush3.bf16.msra.mxu0 %v4867_v38 }
0x1def   :  { %5010 = vrcp.f32 %v3814_v15  ;;  %4880 = vmatprep.subr.bf16.mxu0 %v4879_v61  ;;  %v4891_v15 = vpack.c.bf16 %v4428_v20, %v4427_v7 }
0x1df2   :  { %v3896_v50 = vpop.permute.xlu0 %3895 }
0x1df3   :  { %4770 = vmatpush3.msra.mxu1 %v3896_v50 }
0x1df6   :  { %v3982_v22 = vpop.permute.xlu0 %3981 }
0x1df7   :  { %v3997_v51 = vsel %vm1924_vm13, %v3995_v25, %v3982_v22 }
0x1df9   :  { %v5011_v6 = vpop.eup %5010 }
0x1dfa   :  { %v3818_v9 = vmul.f32 %v5011_v6, %v5007_v36  ;;  %v4425_v36 = vld [vmem:[%s6233_s7 + $0x60] sm:$0xff]  ;;  %s5154_s7 = smov [#allocation8]  }
0x1dfb   :  { %v4887_v30 = vpack.c.bf16 %v4426_v56, %v4425_v36 }
0x1dfc   :  { %4772 = vmatmul.mubr.msk.f32.vlgmr.msra.gmra.mrb[40].mxu1 %vm312_vm11, %v3818_v9 }
0x1ebc   :  { %v3891_v52 = vpop.f32.mrb[30].mxu0 }
0x1ebd   :  { %3989 = vrot.lane.b32.xlu0 %v3891_v52, %s6265_s22  ;;  %v4768_v60 = vpop.f32.mrb[31].mxu0 }
0x1ecf   :  { %v3967_v13 = vpop.f32.mrb[40].mxu1 }
0x1ed0   :  { %3991 = vrot.lane.b32.xlu1 %v3967_v13, %s6265_s22  ;;  %v4773_v8 = vpop.f32.mrb[41].mxu1 }
0x1f2f   :  { %v3990_v17 = vpop.permute.xlu0 %3989 }
0x1f30   :  { %v3999_v27 = vsel %vm1927_vm12, %v3997_v51, %v3990_v17 }
0x1f31   :  { %4782 = vmatprep.mubr.msk.f32.mxu0 %vm114_vm0, %v3999_v27 }
0x1f42   :  { %v3992_v26 = vpop.permute.xlu1 %3991 }
0x1f43   :  { %v4000_v28 = vsel %vm1927_vm12, %v3998_v24, %v3992_v26 }
0x1f44   :  { %4783 = vmatmul.mubr.msk.f32.vlgmr.msra.gmra.mrb[32].mxu0 %vm114_vm0, %v4000_v28 }
0x1f45   :  { %4882 = vmatpush3.bf16.msra.mxu0 %v4879_v61 }
0x1f46   :  { %4884 = vmatprep.subr.bf16.mxu0 %v4883_v48 }
0x1f49   :  { %4886 = vmatpush3.bf16.msra.mxu0 %v4883_v48 }
0x1f4a   :  { %4888 = vmatprep.subr.bf16.mxu0 %v4887_v30 }
0x1f4d   :  { %4890 = vmatpush3.bf16.msra.mxu0 %v4887_v30 }
0x1f4e   :  { %4892 = vmatprep.subr.bf16.mxu0 %v4891_v15 }
0x1f51   :  { %4894 = vmatpush3.bf16.msra.mxu0 %v4891_v15 }
0x2017   :  { %v4784_v44 = vpop.f32.mrb[32].mxu0 }
0x2018   :  { %v6149_v59 = vadd.f32 %v4784_v44, %v5777_v14  ;;  %v4078_v29 = vpop.f32.mrb[33].mxu0  ;;  %v4413_v14 = vld [vmem:[%s6232_s6 + $0x20] sm:$0xff] }
0x2019   :  { %v6152_v63 = vadd.f32 %v4078_v29, %v5780_v19  ;;  %v4414_v19 = vld [vmem:[%s6232_s6 + $0x28] sm:$0xff] }
0x201a   :  { %v4090_v31 = vmul.f32 %v6149_v59, %v6149_v59  ;;  %v4871_v40 = vpack.c.bf16 %v4414_v19, %v4413_v14 }
0x201b   :  { %v4089_v12 = vmul.f32 %v6152_v63, %v6152_v63 }
0x201c   :  { %v4094_v32 = vsel %vm114_vm0, %v4090_v31, 0.0  ;;  %4872 = vmatprep.subr.bf16.mxu1 %v4871_v40 }
0x201d   :  { %4095 = vadd.xlane.f32.xlu1 %v4094_v32  ;;  %v4091_v33 = vsel %vm114_vm0, %v4089_v12, 0.0  ;;  %4874 = vmatpush3.bf16.msra.mxu1 %v4871_v40 }
0x201e   :  { %4092 = vadd.xlane.f32.xlu0 %v4091_v33  ;;  %4876 = vmatprep.subr.bf16.mxu1 %v4875_v57 }
0x2021   :  { %4878 = vmatpush3.bf16.msra.mxu1 %v4875_v57 }
0x20aa   :  { %v4096_v35 = vpop.xlane.xlu1 %4095 }
0x20ab   :  { %v4098_v42 = vmul.f32 0.03125, %v4096_v35  ;;  %v4093_v4 = vpop.xlane.xlu0 %4092 }
0x20ac   :  { %v4097_v43 = vmul.f32 0.03125, %v4093_v4 }
0x20ad   :  { %v4100_v62 = vadd.f32 1e-06, %v4098_v42 }
0x20ae   :  { %v4099_v46 = vadd.f32 1e-06, %v4097_v43 }
0x20af   :  { %5012 = vrsqrt.f32 %v4100_v62 }
0x20b0   :  { %5014 = vrsqrt.f32 %v4099_v46 }
0x20b9   :  { %v5013_v16 = vpop.eup %5012 }
0x20ba   :  { %v5015_v47 = vpop.eup %5014  ;;  %v4104_v49 = vmul.f32 %v5013_v16, %v6149_v59 }
0x20bb   :  { %v4103_v11 = vmul.f32 %v5015_v47, %v6152_v63 }
0x20bc   :  { %v4114_v55 = vmul.f32 %v4412_v54, %v4104_v49 }
0x20bd   :  { %v4113_v45 = vmul.f32 %v4412_v54, %v4103_v11 }
0x20bf   :  { %4793 = vmatprep.mubr.msk.f32.mxu1 %vm114_vm0, %v4113_v45 }
0x20c0   :  { %4794 = vmatmul.mubr.msk.f32.vlgmr.msra.gmra.mrb[42].mxu1 %vm114_vm0, %v4114_v55 }
0x2193   :  { %v4795_v50 = vpop.f32.mrb[42].mxu1 }
0x2194   :  { %4219 = vrot.lane.b32.xlu1 %v4795_v50, %s5141_s12  ;;  %v4192_v6 = vpop.f32.mrb[43].mxu1  ;;  %v4420_v1 = vmul.f32 -1.442695, %v4795_v50 }
0x2195   :  { %4217 = vrot.lane.b32.xlu0 %v4192_v6, %s5141_s12  ;;  %v4419_v9 = vmul.f32 -1.442695, %v4192_v6  ;;  %s4324_s12 = sshll.u32 %s5154_s7, 4  ;;  %s4325_s12 = int_to_ptr.vmem [resolvable:$true] %s4324_s12 }
0x2196   :  { %s5094_s22 = scalar_lea.vmem %s4325_s12, 256  ;;  %p5099_p11 = scmp.lt.s32.totalorder %s4325_s12, %s4325_s12 }
0x2197   :  { %5016 = vpow2.f32 %v4419_v9  ;;  %p5095_p10 = scmp.ne.s32.totalorder %s4325_s12, %s5094_s22  ;;  %p5100_p12 = scmp.lt.s32.totalorder %s5094_s22, %s5094_s22 }
0x2198   :  { %5018 = vpow2.f32 %v4420_v1 }
0x2199   :  { %p5101_p13 = por %p5100_p12, %p5099_p11 }
0x219b   :  { %p5102_p0 = pnand %p5101_p13, %p5095_p10 }
0x21a1   :  { %v5017_v0 = vpop.eup %5016 }
0x21a2   :  { %v5019_v5 = vpop.eup %5018  ;;  %v4207_v21 = vadd.f32 1.0, %v5017_v0 }
0x21a3   :  { %v4208_v10 = vadd.f32 1.0, %v5019_v5 }
0x21a4   :  { %5020 = vrcp.f32 %v4207_v21 }
0x21a5   :  { %5022 = vrcp.f32 %v4208_v10 }
0x21ae   :  { %v5021_v38 = vpop.eup %5020 }
0x21af   :  { %v5023_v52 = vpop.eup %5022  ;;  %v4213_v60 = vmul.f32 %v5021_v38, %v4192_v6 }
0x21b0   :  { %v4214_v8 = vmul.f32 %v5023_v52, %v4795_v50 }
0x2206   :  { %v4220_v13 = vpop.permute.xlu1 %4219 }
0x2207   :  { %v4218_v18 = vpop.permute.xlu0 %4217  ;;  %v4224_v25 = vmul.f32 %v4220_v13, %v4214_v8 }
0x2208   :  { %v4223_v22 = vmul.f32 %v4218_v18, %v4213_v60 }
0x220a   :  { %4812 = vmatprep.mubr.msk.f32.mxu0 %vm2159_vm14, %v4223_v22 }
0x220b   :  { %4813 = vmatmul.mubr.msk.f32.vlgmr.msra.gmra.mrb[34].mxu0 %vm2159_vm14, %v4224_v25 }
0x22de   :  { %v4814_v51 = vpop.f32.mrb[34].mxu0 }
0x22df   :  { %v4316_v17 = vadd.f32 %v4814_v51, %v6149_v59  ;;  %v4306_v27 = vpop.f32.mrb[35].mxu0 }
0x22e0   :  { %v4315_v23 = vadd.f32 %v4306_v27, %v6152_v63 }
0x22e1   :  { %4318 = vst.msk [vmem:[#allocation8 + $0x8] sm:$0xff] %vm114_vm0, %v4316_v17 }
0x22e2   :  { %4317 = vst.msk [vmem:[#allocation8] sm:$0xff] %vm114_vm0, %v4315_v23 }
0x22e3   :  { %5105 = shalt.err (!%p5102_p0)
}
0x22e4   :  { %s5106_s16 = scalar_lea.hbm %s6236_s10, 256 }
0x22e5   :  { %p5107_p1 = scmp.ne.s32.totalorder %s6236_s10, %s5106_s16  ;;  %p5110_p2 = scmp.lt.u32.totalorder %s5106_s16, %s6236_s10 }
0x22e7   :  { %p5112_p3 = pnand %p5110_p2, %p5107_p1 }
0x22e9   :  { %5115 = shalt.err (!%p5112_p3)
}
0x22ea   :  { %s6266_s4 = smov 128  }
0x22eb   :  { %4330 = dma.vmem_to_hbm [thread:$0]  %s4325_s12, 256, %s6236_s10, [#allocation4], %s6266_s4, %s6266_s4, %s5125_s26  }
0x22ec   :  { %5120 = dma.done.wait [#allocation4], 256  }
0x22ed   :  { %5121 = vsyncadd [#allocation4], 4294967040 }
0x22ee   :  { %4334 = vsyncpa [#allocation3], 1 }
0x22ef   :  { %4335 = vsyncpa [#allocation6], 1 }
0x22f0   :  { %4336 = vsyncpa [#allocation4], 1 }

</bundles_post_ra>
